<compile_context>
chip_gen: v5e
topology: v5e:2x2
jax: 0.10.0
libtpu: 0.0.40
codegen_flags: <defaults>
</compile_context>

<pallas_src>
import functools

import jax
import jax.numpy as jnp
from jax.experimental import pallas as pl
from jax.experimental.pallas import tpu as pltpu


# ----------------------------- Pallas kernel --------------------------------
def _bottleneck_kernel(x_ref, w1_ref, b1_ref, w2_ref, b2_ref, w3_ref, b3_ref,
                       out_ref, *scratch, use_im2col):
    """One batch tile: conv1(1x1)+BN+ReLU -> conv2(3x3)+BN+ReLU ->
    conv3(1x1)+BN + residual + ReLU.  BN is pre-folded into weights/biases."""
    B, H, W, Cin = x_ref.shape
    P = w1_ref.shape[-1]
    Cout = w3_ref.shape[-1]
    cd = w1_ref.dtype                       # matmul compute dtype (bf16 / f32)
    M = B * H * W

    # ---- conv1 (1x1) + folded-BN bias + relu --------------------------------
    x_in = x_ref[...].reshape(M, Cin)       # io dtype (bf16) goes straight in
    h1 = jnp.dot(x_in.astype(cd), w1_ref[...],
                 preferred_element_type=jnp.float32)
    h1 = jnp.maximum(h1 + b1_ref[...], 0.0)                     # (M, P) f32
    h1c = h1.astype(cd).reshape(B, H, W, P)

    # ---- conv2 (3x3, stride 1, pad 1) ----------------------------------------
    if use_im2col:
        # Single K = 9P matmul: best MXU fill when P < 128.
        zcol = jnp.zeros((B, H, 1, P), cd)
        padw = jnp.concatenate([zcol, h1c, zcol], axis=2)       # (B,H,W+2,P)
        zrow = jnp.zeros((B, 1, W + 2, P), cd)
        padded = jnp.concatenate([zrow, padw, zrow], axis=1)    # (B,H+2,W+2,P)
        patches = [padded[:, kh:kh + H, kw:kw + W, :]
                   for kh in range(3) for kw in range(3)]
        im2col = jnp.concatenate(patches, axis=-1).reshape(M, 9 * P)
        h2 = jnp.dot(im2col, w2_ref[...], preferred_element_type=jnp.float32)
    else:
        # 9 accumulated taps over a zero-haloed VMEM scratch: avoids the 9x
        # im2col expansion / copies when P >= 128 (MXU already full depth).
        pad_ref = scratch[0]
        pad_ref[:, 0:1, :, :] = jnp.zeros((B, 1, W + 2, P), cd)
        pad_ref[:, H + 1:H + 2, :, :] = jnp.zeros((B, 1, W + 2, P), cd)
        pad_ref[:, 1:H + 1, 0:1, :] = jnp.zeros((B, H, 1, P), cd)
        pad_ref[:, 1:H + 1, W + 1:W + 2, :] = jnp.zeros((B, H, 1, P), cd)
        pad_ref[:, 1:H + 1, 1:W + 1, :] = h1c
        h2 = jnp.zeros((M, P), jnp.float32)
        for kh in range(3):
            for kw in range(3):
                tap = pad_ref[:, kh:kh + H, kw:kw + W, :].reshape(M, P)
                h2 = h2 + jnp.dot(tap, w2_ref[kh * 3 + kw],
                                  preferred_element_type=jnp.float32)
    h2 = jnp.maximum(h2 + b2_ref[...], 0.0)                      # (M, P) f32

    # ---- conv3 (1x1) + folded-BN bias + residual + relu ----------------------
    h3 = jnp.dot(h2.astype(cd), w3_ref[...],
                 preferred_element_type=jnp.float32)
    residual = x_ref[...].reshape(M, Cout).astype(jnp.float32)   # re-read x
    out = jnp.maximum(h3 + b3_ref[...] + residual, 0.0)
    out_ref[...] = out.reshape(B, H, W, Cout).astype(out_ref.dtype)


# ----------------------------- parameter prep --------------------------------
def _prepare_params(params, compute_dtype, use_im2col, eps=1e-5):
    """Fold BN scale into conv weights; return (w1,b1,w2,b2,w3,b3)."""
    def fold(bn):
        gamma, beta, mean, var = bn
        scale = gamma / jnp.sqrt(var + eps)
        bias = beta - mean * scale
        return scale, bias

    s1, b1 = fold(params['bn1'])
    s2, b2 = fold(params['bn2'])
    s3, b3 = fold(params['bn3'])

    P = params['conv1'].shape[0]
    w1 = (params['conv1'][:, :, 0, 0] * s1[:, None]).T              # (Cin, P)
    w2 = params['conv2'] * s2[:, None, None, None]                  # (P,P,3,3)
    w2 = jnp.transpose(w2, (2, 3, 1, 0))                            # (3,3,Pin,Pout)
    w2 = w2.reshape(9 * P, P) if use_im2col else w2.reshape(9, P, P)
    w3 = (params['conv3'][:, :, 0, 0] * s3[:, None]).T              # (P, 4P)

    cd = compute_dtype
    return (w1.astype(cd), b1[None, :].astype(jnp.float32),
            w2.astype(cd), b2[None, :].astype(jnp.float32),
            w3.astype(cd), b3[None, :].astype(jnp.float32))


# ----------------------------- sizing helpers --------------------------------
def _vmem_limit_bytes():
    """Generation-aware scoped-VMEM limit with ~25% headroom for the compiler."""
    try:
        cap = int(pltpu.get_tpu_info().vmem_capacity_bytes)
    except Exception:
        cap = 128 * 1024 * 1024
    # 128 MiB parts (v5e/v6e) -> 96 MiB; 64 MiB parts (v7x) -> 48 MiB.
    return min(96 * 1024 * 1024, (cap * 3) // 4)


def _pick_batch_tile(N, H, W, Cin, P, Cout, io_bytes, cd_bytes, vmem_budget,
                     use_im2col):
    """Largest batch tile that fits the VMEM budget; keep grid >= 2 if N >= 2
    so both v7x TensorCores have work; stop growing once M >= 512."""
    weights = cd_bytes * (Cin * P + 9 * P * P + P * Cout)
    best = 1
    for bt in range(1, N + 1):
        if N % bt != 0:
            continue
        if N >= 2 and N // bt < 2:
            break
        m = bt * H * W
        act = 2 * io_bytes * bt * H * W * (Cin + Cout)      # dbl-buffered x/out
        inter = 4 * m * (P + P + Cout)                      # f32 h1/h2/h3
        inter += cd_bytes * m * P                           # h1 in compute dtype
        inter += cd_bytes * bt * (H + 2) * (W + 2) * P      # padded halo
        if use_im2col:
            inter += cd_bytes * m * 9 * P                   # im2col slab
        if weights + act + inter > int(0.7 * vmem_budget):
            break
        best = bt
        if m >= 512:
            break
    return best


# ----------------------------- NHWC forward (hot path) -----------------------
def bottleneck_forward_nhwc(x_nhwc, params, compute_dtype=jnp.bfloat16,
                            io_dtype=jnp.bfloat16, conv2_impl="auto"):
    """x_nhwc: (N, H, W, Cin), Cin == planes*4 (downsample=None).
    Returns (N, H, W, Cout) in io_dtype.  No layout transposes."""
    N, H, W, Cin = x_nhwc.shape
    P = params['conv1'].shape[0]
    Cout = 4 * P
    assert Cin == Cout, "downsample=None requires inplanes == planes*4"

    if conv2_impl == "auto":
        use_im2col = P < 128
        # TODO(synk): on v5e prefer the 9-tap path even at P=64 (single vst
        # slot, 128-deep MXU) — plumb chip version from pltpu.get_tpu_info().
    else:
        use_im2col = (conv2_impl == "im2col")

    w1, b1, w2, b2, w3, b3 = _prepare_params(params, compute_dtype, use_im2col)
    x = x_nhwc.astype(io_dtype)

    io_bytes = jnp.dtype(io_dtype).itemsize
    cd_bytes = jnp.dtype(compute_dtype).itemsize
    vmem_limit = _vmem_limit_bytes()
    bt = _pick_batch_tile(N, H, W, Cin, P, Cout, io_bytes, cd_bytes,
                          vmem_limit, use_im2col)
    grid = (N // bt,)

    flops = 2 * N * H * W * (Cin * P + 9 * P * P + P * Cout)
    bytes_accessed = (io_bytes * N * H * W * (Cin + Cout)
                      + cd_bytes * (Cin * P + 9 * P * P + P * Cout)
                      + 4 * (P + P + Cout))

    kernel = functools.partial(_bottleneck_kernel, use_im2col=use_im2col)
    scratch = [] if use_im2col else [
        pltpu.VMEM((bt, H + 2, W + 2, P), compute_dtype)]

    def build(single_buffer_weights):
        const_kw = ({'pipeline_mode': pl.Buffered(1)}
                    if single_buffer_weights else {})

        def wspec(shape):
            return pl.BlockSpec(shape, lambda n, _s=shape: (0,) * len(_s),
                                **const_kw)

        in_specs = [
            pl.BlockSpec((bt, H, W, Cin), lambda n: (n, 0, 0, 0)),
            wspec(w1.shape), wspec(b1.shape),
            wspec(w2.shape), wspec(b2.shape),
            wspec(w3.shape), wspec(b3.shape),
        ]
        return pl.pallas_call(
            kernel,
            out_shape=jax.ShapeDtypeStruct((N, H, W, Cout), io_dtype),
            grid=grid,
            in_specs=in_specs,
            out_specs=pl.BlockSpec((bt, H, W, Cout), lambda n: (n, 0, 0, 0)),
            scratch_shapes=scratch,
            compiler_params=pltpu.CompilerParams(
                dimension_semantics=("parallel",),
                vmem_limit_bytes=int(vmem_limit)),
            cost_estimate=pl.CostEstimate(
                flops=int(flops), transcendentals=0,
                bytes_accessed=int(bytes_accessed)),
        )

    args = (x, w1, b1, w2, b2, w3, b3)
    try:
        # Constant-index weight/bias blocks: single-buffer them (no re-fetch
        # across the batch grid), freeing VMEM for larger batch tiles on v7x.
        return jax.block_until_ready(build(True)(*args))
    except Exception:
        # Fallback if this Pallas build rejects pipeline_mode / Buffered(1).
        return build(False)(*args)


# ----------------------------- NCHW adapter ----------------------------------
def bottleneck_forward(x_nchw, params, compute_dtype=jnp.bfloat16,
                       io_dtype=jnp.bfloat16, conv2_impl="auto"):
    """Compatibility shim for PyTorch NCHW tensors.
    TODO(synk): in a full ResNet keep activations NHWC (+bf16) end-to-end and
    call bottleneck_forward_nhwc directly; these wrapper transposes cost one
    extra HBM round trip per block."""
    out_nhwc = bottleneck_forward_nhwc(
        jnp.transpose(x_nchw, (0, 2, 3, 1)), params,
        compute_dtype=compute_dtype, io_dtype=io_dtype, conv2_impl=conv2_impl)
    return jnp.transpose(out_nhwc, (0, 3, 1, 2))


# ----------------------------- references ------------------------------------
def ref_forward(x, p, eps=1e-5):
    """PyTorch-semantics f32 reference (conv + inference BN, unfolded)."""
    def conv(x, w, pad=0):
        return jax.lax.conv_general_dilated(
            x, w, window_strides=(1, 1), padding=[(pad, pad), (pad, pad)],
            dimension_numbers=('NCHW', 'OIHW', 'NCHW'),
            precision=jax.lax.Precision.HIGHEST)

    def bn(x, g, b, m, v):
        s = g / jnp.sqrt(v + eps)
        return x * s[None, :, None, None] + (b - m * s)[None, :, None, None]

    out = jax.nn.relu(bn(conv(x, p['conv1']), *p['bn1']))
    out = jax.nn.relu(bn(conv(out, p['conv2'], pad=1), *p['bn2']))
    out = bn(conv(out, p['conv3']), *p['bn3'])
    return jax.nn.relu(out + x)


def ref_policy_forward(x_nchw, params, compute_dtype, io_dtype):
    """Same math / precision policy as the kernel, in plain JAX."""
    N, Cin, H, W = x_nchw.shape
    P = params['conv1'].shape[0]
    w1, b1, w2, b2, w3, b3 = _prepare_params(params, compute_dtype,
                                             use_im2col=True)
    cd = compute_dtype

    x = jnp.transpose(x_nchw, (0, 2, 3, 1)).astype(io_dtype)
    xf = x.reshape(N * H * W, Cin)
    h1 = jnp.maximum(
        jnp.dot(xf.astype(cd), w1, preferred_element_type=jnp.float32) + b1, 0.)
    h1 = h1.astype(cd).reshape(N, H, W, P)
    pad = jnp.pad(h1, ((0, 0), (1, 1), (1, 1), (0, 0)))
    im2col = jnp.concatenate(
        [pad[:, kh:kh + H, kw:kw + W, :] for kh in range(3) for kw in range(3)],
        axis=-1).reshape(N * H * W, 9 * P)
    h2 = jnp.maximum(
        jnp.dot(im2col, w2, preferred_element_type=jnp.float32) + b2, 0.)
    h3 = jnp.dot(h2.astype(cd), w3, preferred_element_type=jnp.float32) + b3
    out = jnp.maximum(h3 + xf.astype(jnp.float32), 0.).reshape(N, H, W, 4 * P)
    return jnp.transpose(out.astype(io_dtype), (0, 3, 1, 2))


# ----------------------------- self-test --------------------------------------
if __name__ == "__main__":
    key = jax.random.PRNGKey(0)
    N, H, W = 2, 16, 16
    P = 8                   # planes
    Cin = 4 * P             # inplanes = planes * expansion (downsample=None)

    ks = jax.random.split(key, 8)

    def bn_params(k, c):
        k1, k2, k3, k4 = jax.random.split(k, 4)
        gamma = 1.0 + 0.1 * jax.random.normal(k1, (c,), jnp.float32)
        beta = 0.1 * jax.random.normal(k2, (c,), jnp.float32)
        mean = 0.1 * jax.random.normal(k3, (c,), jnp.float32)
        var = 1.0 + 0.1 * jnp.abs(jax.random.normal(k4, (c,), jnp.float32))
        return gamma, beta, mean, var

    params = {
        'conv1': 0.2 * jax.random.normal(ks[0], (P, Cin, 1, 1), jnp.float32),
        'conv2': 0.2 * jax.random.normal(ks[1], (P, P, 3, 3), jnp.float32),
        'conv3': 0.2 * jax.random.normal(ks[2], (4 * P, P, 1, 1), jnp.float32),
        'bn1': bn_params(ks[3], P),
        'bn2': bn_params(ks[4], P),
        'bn3': bn_params(ks[5], 4 * P),
    }

    x = jax.random.normal(ks[6], (N, Cin, H, W), jnp.float32)
    ref = jax.block_until_ready(ref_forward(x, params))

    # 1) Full-precision path (f32 compute, f32 I/O, im2col conv2) vs. the
    #    PyTorch-semantics reference: validates BN folding + conv + residual.
    out_f32 = jax.block_until_ready(
        bottleneck_forward(x, params, compute_dtype=jnp.float32,
                           io_dtype=jnp.float32, conv2_impl="im2col"))
    assert out_f32.shape == (N, 4 * P, H, W), out_f32.shape
    assert jnp.allclose(out_f32, ref, atol=1e-2, rtol=1e-2), \
        f"f32 im2col max abs err {jnp.max(jnp.abs(out_f32 - ref))}"

    # 2) 9-tap scratch conv2 path (used for P>=128 stages) smoke/correctness
    #    test at full precision.
    out_taps = jax.block_until_ready(
        bottleneck_forward(x, params, compute_dtype=jnp.float32,
                           io_dtype=jnp.float32, conv2_impl="taps"))
    assert jnp.allclose(out_taps, ref, atol=1e-2, rtol=1e-2), \
        f"f32 taps max abs err {jnp.max(jnp.abs(out_taps - ref))}"

    # 3) Default bf16-I/O + bf16-matmul path vs. a plain-JAX reference using
    #    the identical precision policy.
    out_bf16 = jax.block_until_ready(bottleneck_forward(x, params))
    ref_bf16 = jax.block_until_ready(
        ref_policy_forward(x, params, jnp.bfloat16, jnp.bfloat16))
    assert out_bf16.shape == (N, 4 * P, H, W), out_bf16.shape
    err_pol = jnp.max(jnp.abs(out_bf16.astype(jnp.float32)
                              - ref_bf16.astype(jnp.float32)))
    assert err_pol < 2e-2, f"bf16 policy max abs err {err_pol}"
    # bf16 path also tracks the full-precision reference within bf16 noise.
    err_ref = jnp.max(jnp.abs(out_bf16.astype(jnp.float32) - ref))
    assert err_ref < 2e-1, f"bf16 vs f32-ref max abs err {err_ref}"

    print("KERNEL_OK")
</pallas_src>

<mosaic_0001>
module attributes {stable_mosaic.version = 11 : i64} {
  func.func @_bottleneck_kernel(%arg0: i32, %arg1: memref<1x16x16x32xf32, #tpu.memory_space<vmem>>, %arg2: memref<32x8xf32, #tpu.memory_space<vmem>>, %arg3: memref<1x8xf32, #tpu.memory_space<vmem>>, %arg4: memref<72x8xf32, #tpu.memory_space<vmem>>, %arg5: memref<1x8xf32, #tpu.memory_space<vmem>>, %arg6: memref<8x32xf32, #tpu.memory_space<vmem>>, %arg7: memref<1x32xf32, #tpu.memory_space<vmem>>, %arg8: memref<1x16x16x32xf32, #tpu.memory_space<vmem>>) attributes {dimension_semantics = [#tpu.dimension_semantics<parallel>], iteration_bounds = array<i64: 2>, scalar_prefetch = 0 : i64, scratch_operands = 0 : i64, tpu.core_type = #tpu.core_type<tc>, window_params = [{transform_indices = @transform_0, window_bounds = array<i64: 1, 16, 16, 32>}, {pipeline_mode = #tpu.pipeline_mode<synchronous>, transform_indices = @transform_1, window_bounds = array<i64: 32, 8>}, {pipeline_mode = #tpu.pipeline_mode<synchronous>, transform_indices = @transform_2, window_bounds = array<i64: 1, 8>}, {pipeline_mode = #tpu.pipeline_mode<synchronous>, transform_indices = @transform_3, window_bounds = array<i64: 72, 8>}, {pipeline_mode = #tpu.pipeline_mode<synchronous>, transform_indices = @transform_4, window_bounds = array<i64: 1, 8>}, {pipeline_mode = #tpu.pipeline_mode<synchronous>, transform_indices = @transform_5, window_bounds = array<i64: 8, 32>}, {pipeline_mode = #tpu.pipeline_mode<synchronous>, transform_indices = @transform_6, window_bounds = array<i64: 1, 32>}, {transform_indices = @transform_7, window_bounds = array<i64: 1, 16, 16, 32>}]} {
    %c0 = arith.constant 0 : index
    %c0_0 = arith.constant 0 : index
    %c0_1 = arith.constant 0 : index
    %c0_2 = arith.constant 0 : index
    %0 = vector.load %arg1[%c0, %c0_0, %c0_1, %c0_2] : memref<1x16x16x32xf32, #tpu.memory_space<vmem>>, vector<1x16x16x32xf32>
    %1 = vector.shape_cast %0 : vector<1x16x16x32xf32> to vector<256x32xf32>
    %c0_3 = arith.constant 0 : index
    %c0_4 = arith.constant 0 : index
    %2 = vector.load %arg2[%c0_3, %c0_4] : memref<32x8xf32, #tpu.memory_space<vmem>>, vector<32x8xf32>
    %cst = arith.constant dense<0.000000e+00> : vector<256x8xf32>
    %3 = tpu.matmul %1, %2, %cst {dimension_numbers = #tpu.dot_dimension_numbers<[1], [0], [0], [1], [0, 0, 1, 1], [], []>} : vector<256x32xf32>, vector<32x8xf32>, vector<256x8xf32> -> vector<256x8xf32>
    %c0_5 = arith.constant 0 : index
    %c0_6 = arith.constant 0 : index
    %4 = vector.load %arg3[%c0_5, %c0_6] : memref<1x8xf32, #tpu.memory_space<vmem>>, vector<1x8xf32>
    %5 = vector.broadcast %4 : vector<1x8xf32> to vector<256x8xf32>
    %6 = arith.addf %3, %5 : vector<256x8xf32>
    %cst_7 = arith.constant 0.000000e+00 : f32
    %7 = vector.broadcast %cst_7 : f32 to vector<256x8xf32>
    %8 = arith.maximumf %6, %7 : vector<256x8xf32>
    %9 = vector.shape_cast %8 : vector<256x8xf32> to vector<1x16x16x8xf32>
    %cst_8 = arith.constant 0.000000e+00 : f32
    %10 = vector.broadcast %cst_8 : f32 to vector<1x16x1x8xf32>
    %11 = tpu.concatenate %10, %9, %10 in 2 : vector<1x16x1x8xf32>, vector<1x16x16x8xf32>, vector<1x16x1x8xf32> -> vector<1x16x18x8xf32>
    %cst_9 = arith.constant 0.000000e+00 : f32
    %12 = vector.broadcast %cst_9 : f32 to vector<1x1x18x8xf32>
    %13 = tpu.concatenate %12, %11, %12 in 1 : vector<1x1x18x8xf32>, vector<1x16x18x8xf32>, vector<1x1x18x8xf32> -> vector<1x18x18x8xf32>
    %14 = vector.extract_strided_slice %13 {offsets = [0, 0, 0, 0], sizes = [1, 16, 16, 8], strides = [1, 1, 1, 1]} : vector<1x18x18x8xf32> to vector<1x16x16x8xf32>
    %15 = vector.extract_strided_slice %13 {offsets = [0, 0, 1, 0], sizes = [1, 16, 16, 8], strides = [1, 1, 1, 1]} : vector<1x18x18x8xf32> to vector<1x16x16x8xf32>
    %16 = vector.extract_strided_slice %13 {offsets = [0, 0, 2, 0], sizes = [1, 16, 16, 8], strides = [1, 1, 1, 1]} : vector<1x18x18x8xf32> to vector<1x16x16x8xf32>
    %17 = vector.extract_strided_slice %13 {offsets = [0, 1, 0, 0], sizes = [1, 16, 16, 8], strides = [1, 1, 1, 1]} : vector<1x18x18x8xf32> to vector<1x16x16x8xf32>
    %18 = vector.extract_strided_slice %13 {offsets = [0, 1, 1, 0], sizes = [1, 16, 16, 8], strides = [1, 1, 1, 1]} : vector<1x18x18x8xf32> to vector<1x16x16x8xf32>
    %19 = vector.extract_strided_slice %13 {offsets = [0, 1, 2, 0], sizes = [1, 16, 16, 8], strides = [1, 1, 1, 1]} : vector<1x18x18x8xf32> to vector<1x16x16x8xf32>
    %20 = vector.extract_strided_slice %13 {offsets = [0, 2, 0, 0], sizes = [1, 16, 16, 8], strides = [1, 1, 1, 1]} : vector<1x18x18x8xf32> to vector<1x16x16x8xf32>
    %21 = vector.extract_strided_slice %13 {offsets = [0, 2, 1, 0], sizes = [1, 16, 16, 8], strides = [1, 1, 1, 1]} : vector<1x18x18x8xf32> to vector<1x16x16x8xf32>
    %22 = vector.extract_strided_slice %13 {offsets = [0, 2, 2, 0], sizes = [1, 16, 16, 8], strides = [1, 1, 1, 1]} : vector<1x18x18x8xf32> to vector<1x16x16x8xf32>
    %23 = tpu.concatenate %14, %15, %16, %17, %18, %19, %20, %21, %22 in 3 : vector<1x16x16x8xf32>, vector<1x16x16x8xf32>, vector<1x16x16x8xf32>, vector<1x16x16x8xf32>, vector<1x16x16x8xf32>, vector<1x16x16x8xf32>, vector<1x16x16x8xf32>, vector<1x16x16x8xf32>, vector<1x16x16x8xf32> -> vector<1x16x16x72xf32>
    %24 = vector.shape_cast %23 : vector<1x16x16x72xf32> to vector<256x72xf32>
    %c0_10 = arith.constant 0 : index
    %c0_11 = arith.constant 0 : index
    %25 = vector.load %arg4[%c0_10, %c0_11] : memref<72x8xf32, #tpu.memory_space<vmem>>, vector<72x8xf32>
    %cst_12 = arith.constant dense<0.000000e+00> : vector<256x8xf32>
    %26 = tpu.matmul %24, %25, %cst_12 {dimension_numbers = #tpu.dot_dimension_numbers<[1], [0], [0], [1], [0, 0, 1, 1], [], []>} : vector<256x72xf32>, vector<72x8xf32>, vector<256x8xf32> -> vector<256x8xf32>
    %c0_13 = arith.constant 0 : index
    %c0_14 = arith.constant 0 : index
    %27 = vector.load %arg5[%c0_13, %c0_14] : memref<1x8xf32, #tpu.memory_space<vmem>>, vector<1x8xf32>
    %28 = vector.broadcast %27 : vector<1x8xf32> to vector<256x8xf32>
    %29 = arith.addf %26, %28 : vector<256x8xf32>
    %cst_15 = arith.constant 0.000000e+00 : f32
    %30 = vector.broadcast %cst_15 : f32 to vector<256x8xf32>
    %31 = arith.maximumf %29, %30 : vector<256x8xf32>
    %c0_16 = arith.constant 0 : index
    %c0_17 = arith.constant 0 : index
    %32 = vector.load %arg6[%c0_16, %c0_17] : memref<8x32xf32, #tpu.memory_space<vmem>>, vector<8x32xf32>
    %cst_18 = arith.constant dense<0.000000e+00> : vector<256x32xf32>
    %33 = tpu.matmul %31, %32, %cst_18 {dimension_numbers = #tpu.dot_dimension_numbers<[1], [0], [0], [1], [0, 0, 1, 1], [], []>} : vector<256x8xf32>, vector<8x32xf32>, vector<256x32xf32> -> vector<256x32xf32>
    %c0_19 = arith.constant 0 : index
    %c0_20 = arith.constant 0 : index
    %c0_21 = arith.constant 0 : index
    %c0_22 = arith.constant 0 : index
    %34 = vector.load %arg1[%c0_19, %c0_20, %c0_21, %c0_22] : memref<1x16x16x32xf32, #tpu.memory_space<vmem>>, vector<1x16x16x32xf32>
    %35 = vector.shape_cast %34 : vector<1x16x16x32xf32> to vector<256x32xf32>
    %c0_23 = arith.constant 0 : index
    %c0_24 = arith.constant 0 : index
    %36 = vector.load %arg7[%c0_23, %c0_24] : memref<1x32xf32, #tpu.memory_space<vmem>>, vector<1x32xf32>
    %37 = vector.broadcast %36 : vector<1x32xf32> to vector<256x32xf32>
    %38 = arith.addf %33, %37 : vector<256x32xf32>
    %39 = arith.addf %38, %35 : vector<256x32xf32>
    %cst_25 = arith.constant 0.000000e+00 : f32
    %40 = vector.broadcast %cst_25 : f32 to vector<256x32xf32>
    %41 = arith.maximumf %39, %40 : vector<256x32xf32>
    %42 = vector.shape_cast %41 : vector<256x32xf32> to vector<1x16x16x32xf32>
    %c0_26 = arith.constant 0 : index
    %c0_27 = arith.constant 0 : index
    %c0_28 = arith.constant 0 : index
    %c0_29 = arith.constant 0 : index
    %43 = vector.load %arg8[%c0_26, %c0_27, %c0_28, %c0_29] : memref<1x16x16x32xf32, #tpu.memory_space<vmem>>, vector<1x16x16x32xf32>
    tpu.vector_store %arg8[%c0_26, %c0_27, %c0_28, %c0_29], %42 {strides = array<i32>} : memref<1x16x16x32xf32, #tpu.memory_space<vmem>>, vector<1x16x16x32xf32>,
    return
  }
  func.func @transform_0(%arg0: i32) -> (i32, i32, i32, i32) {
    %c0_i32 = arith.constant 0 : i32
    %c0_i32_0 = arith.constant 0 : i32
    %c0_i32_1 = arith.constant 0 : i32
    %c0_i32_2 = arith.constant 0 : i32
    return %arg0, %c0_i32, %c0_i32_0, %c0_i32_1 : i32, i32, i32, i32
  }
  func.func @transform_1(%arg0: i32) -> (i32, i32) {
    %c0_i32 = arith.constant 0 : i32
    %c0_i32_0 = arith.constant 0 : i32
    %c0_i32_1 = arith.constant 0 : i32
    return %c0_i32, %c0_i32_0 : i32, i32
  }
  func.func @transform_2(%arg0: i32) -> (i32, i32) {
    %c0_i32 = arith.constant 0 : i32
    %c0_i32_0 = arith.constant 0 : i32
    %c0_i32_1 = arith.constant 0 : i32
    return %c0_i32, %c0_i32_0 : i32, i32
  }
  func.func @transform_3(%arg0: i32) -> (i32, i32) {
    %c0_i32 = arith.constant 0 : i32
    %c0_i32_0 = arith.constant 0 : i32
    %c0_i32_1 = arith.constant 0 : i32
    return %c0_i32, %c0_i32_0 : i32, i32
  }
  func.func @transform_4(%arg0: i32) -> (i32, i32) {
    %c0_i32 = arith.constant 0 : i32
    %c0_i32_0 = arith.constant 0 : i32
    %c0_i32_1 = arith.constant 0 : i32
    return %c0_i32, %c0_i32_0 : i32, i32
  }
  func.func @transform_5(%arg0: i32) -> (i32, i32) {
    %c0_i32 = arith.constant 0 : i32
    %c0_i32_0 = arith.constant 0 : i32
    %c0_i32_1 = arith.constant 0 : i32
    return %c0_i32, %c0_i32_0 : i32, i32
  }
  func.func @transform_6(%arg0: i32) -> (i32, i32) {
    %c0_i32 = arith.constant 0 : i32
    %c0_i32_0 = arith.constant 0 : i32
    %c0_i32_1 = arith.constant 0 : i32
    return %c0_i32, %c0_i32_0 : i32, i32
  }
  func.func @transform_7(%arg0: i32) -> (i32, i32, i32, i32) {
    %c0_i32 = arith.constant 0 : i32
    %c0_i32_0 = arith.constant 0 : i32
    %c0_i32_1 = arith.constant 0 : i32
    %c0_i32_2 = arith.constant 0 : i32
    return %arg0, %c0_i32, %c0_i32_0, %c0_i32_1 : i32, i32, i32, i32
  }
}

module attributes {stable_mosaic.version = 11 : i64} {
  func.func @_bottleneck_kernel(%arg0: i32, %arg1: memref<1x16x16x32xf32, #tpu.memory_space<vmem>>, %arg2: memref<32x8xf32, #tpu.memory_space<vmem>>, %arg3: memref<1x8xf32, #tpu.memory_space<vmem>>, %arg4: memref<72x8xf32, #tpu.memory_space<vmem>>, %arg5: memref<1x8xf32, #tpu.memory_space<vmem>>, %arg6: memref<8x32xf32, #tpu.memory_space<vmem>>, %arg7: memref<1x32xf32, #tpu.memory_space<vmem>>, %arg8: memref<1x16x16x32xf32, #tpu.memory_space<vmem>>) attributes {dimension_semantics = [#tpu.dimension_semantics<parallel>], iteration_bounds = array<i64: 2>, scalar_prefetch = 0 : i64, scratch_operands = 0 : i64, tpu.core_type = #tpu.core_type<tc>, window_params = [{transform_indices = @transform_0, window_bounds = array<i64: 1, 16, 16, 32>}, {pipeline_mode = #tpu.pipeline_mode<synchronous>, transform_indices = @transform_1, window_bounds = array<i64: 32, 8>}, {pipeline_mode = #tpu.pipeline_mode<synchronous>, transform_indices = @transform_2, window_bounds = array<i64: 1, 8>}, {pipeline_mode = #tpu.pipeline_mode<synchronous>, transform_indices = @transform_3, window_bounds = array<i64: 72, 8>}, {pipeline_mode = #tpu.pipeline_mode<synchronous>, transform_indices = @transform_4, window_bounds = array<i64: 1, 8>}, {pipeline_mode = #tpu.pipeline_mode<synchronous>, transform_indices = @transform_5, window_bounds = array<i64: 8, 32>}, {pipeline_mode = #tpu.pipeline_mode<synchronous>, transform_indices = @transform_6, window_bounds = array<i64: 1, 32>}, {transform_indices = @transform_7, window_bounds = array<i64: 1, 16, 16, 32>}]} {
    %c0 = arith.constant 0 : index
    %c0_0 = arith.constant 0 : index
    %c0_1 = arith.constant 0 : index
    %c0_2 = arith.constant 0 : index
    %0 = vector.load %arg1[%c0, %c0_0, %c0_1, %c0_2] : memref<1x16x16x32xf32, #tpu.memory_space<vmem>>, vector<1x16x16x32xf32>
    %1 = vector.shape_cast %0 : vector<1x16x16x32xf32> to vector<256x32xf32>
    %c0_3 = arith.constant 0 : index
    %c0_4 = arith.constant 0 : index
    %2 = vector.load %arg2[%c0_3, %c0_4] : memref<32x8xf32, #tpu.memory_space<vmem>>, vector<32x8xf32>
    %cst = arith.constant dense<0.000000e+00> : vector<256x8xf32>
    %3 = tpu.matmul %1, %2, %cst {dimension_numbers = #tpu.dot_dimension_numbers<[1], [0], [0], [1], [0, 0, 1, 1], [], []>} : vector<256x32xf32>, vector<32x8xf32>, vector<256x8xf32> -> vector<256x8xf32>
    %c0_5 = arith.constant 0 : index
    %c0_6 = arith.constant 0 : index
    %4 = vector.load %arg3[%c0_5, %c0_6] : memref<1x8xf32, #tpu.memory_space<vmem>>, vector<1x8xf32>
    %5 = vector.broadcast %4 : vector<1x8xf32> to vector<256x8xf32>
    %6 = arith.addf %3, %5 : vector<256x8xf32>
    %cst_7 = arith.constant 0.000000e+00 : f32
    %7 = vector.broadcast %cst_7 : f32 to vector<256x8xf32>
    %8 = arith.maximumf %6, %7 : vector<256x8xf32>
    %9 = vector.shape_cast %8 : vector<256x8xf32> to vector<1x16x16x8xf32>
    %cst_8 = arith.constant 0.000000e+00 : f32
    %10 = vector.broadcast %cst_8 : f32 to vector<1x16x1x8xf32>
    %11 = tpu.concatenate %10, %9, %10 in 2 : vector<1x16x1x8xf32>, vector<1x16x16x8xf32>, vector<1x16x1x8xf32> -> vector<1x16x18x8xf32>
    %cst_9 = arith.constant 0.000000e+00 : f32
    %12 = vector.broadcast %cst_9 : f32 to vector<1x1x18x8xf32>
    %13 = tpu.concatenate %12, %11, %12 in 1 : vector<1x1x18x8xf32>, vector<1x16x18x8xf32>, vector<1x1x18x8xf32> -> vector<1x18x18x8xf32>
    %14 = vector.extract_strided_slice %13 {offsets = [0, 0, 0, 0], sizes = [1, 16, 16, 8], strides = [1, 1, 1, 1]} : vector<1x18x18x8xf32> to vector<1x16x16x8xf32>
    %15 = vector.extract_strided_slice %13 {offsets = [0, 0, 1, 0], sizes = [1, 16, 16, 8], strides = [1, 1, 1, 1]} : vector<1x18x18x8xf32> to vector<1x16x16x8xf32>
    %16 = vector.extract_strided_slice %13 {offsets = [0, 0, 2, 0], sizes = [1, 16, 16, 8], strides = [1, 1, 1, 1]} : vector<1x18x18x8xf32> to vector<1x16x16x8xf32>
    %17 = vector.extract_strided_slice %13 {offsets = [0, 1, 0, 0], sizes = [1, 16, 16, 8], strides = [1, 1, 1, 1]} : vector<1x18x18x8xf32> to vector<1x16x16x8xf32>
    %18 = vector.extract_strided_slice %13 {offsets = [0, 1, 1, 0], sizes = [1, 16, 16, 8], strides = [1, 1, 1, 1]} : vector<1x18x18x8xf32> to vector<1x16x16x8xf32>
    %19 = vector.extract_strided_slice %13 {offsets = [0, 1, 2, 0], sizes = [1, 16, 16, 8], strides = [1, 1, 1, 1]} : vector<1x18x18x8xf32> to vector<1x16x16x8xf32>
    %20 = vector.extract_strided_slice %13 {offsets = [0, 2, 0, 0], sizes = [1, 16, 16, 8], strides = [1, 1, 1, 1]} : vector<1x18x18x8xf32> to vector<1x16x16x8xf32>
    %21 = vector.extract_strided_slice %13 {offsets = [0, 2, 1, 0], sizes = [1, 16, 16, 8], strides = [1, 1, 1, 1]} : vector<1x18x18x8xf32> to vector<1x16x16x8xf32>
    %22 = vector.extract_strided_slice %13 {offsets = [0, 2, 2, 0], sizes = [1, 16, 16, 8], strides = [1, 1, 1, 1]} : vector<1x18x18x8xf32> to vector<1x16x16x8xf32>
    %23 = tpu.concatenate %14, %15, %16, %17, %18, %19, %20, %21, %22 in 3 : vector<1x16x16x8xf32>, vector<1x16x16x8xf32>, vector<1x16x16x8xf32>, vector<1x16x16x8xf32>, vector<1x16x16x8xf32>, vector<1x16x16x8xf32>, vector<1x16x16x8xf32>, vector<1x16x16x8xf32>, vector<1x16x16x8xf32> -> vector<1x16x16x72xf32>
    %24 = vector.shape_cast %23 : vector<1x16x16x72xf32> to vector<256x72xf32>
    %c0_10 = arith.constant 0 : index
    %c0_11 = arith.constant 0 : index
    %25 = vector.load %arg4[%c0_10, %c0_11] : memref<72x8xf32, #tpu.memory_space<vmem>>, vector<72x8xf32>
    %cst_12 = arith.constant dense<0.000000e+00> : vector<256x8xf32>
    %26 = tpu.matmul %24, %25, %cst_12 {dimension_numbers = #tpu.dot_dimension_numbers<[1], [0], [0], [1], [0, 0, 1, 1], [], []>} : vector<256x72xf32>, vector<72x8xf32>, vector<256x8xf32> -> vector<256x8xf32>
    %c0_13 = arith.constant 0 : index
    %c0_14 = arith.constant 0 : index
    %27 = vector.load %arg5[%c0_13, %c0_14] : memref<1x8xf32, #tpu.memory_space<vmem>>, vector<1x8xf32>
    %28 = vector.broadcast %27 : vector<1x8xf32> to vector<256x8xf32>
    %29 = arith.addf %26, %28 : vector<256x8xf32>
    %cst_15 = arith.constant 0.000000e+00 : f32
    %30 = vector.broadcast %cst_15 : f32 to vector<256x8xf32>
    %31 = arith.maximumf %29, %30 : vector<256x8xf32>
    %c0_16 = arith.constant 0 : index
    %c0_17 = arith.constant 0 : index
    %32 = vector.load %arg6[%c0_16, %c0_17] : memref<8x32xf32, #tpu.memory_space<vmem>>, vector<8x32xf32>
    %cst_18 = arith.constant dense<0.000000e+00> : vector<256x32xf32>
    %33 = tpu.matmul %31, %32, %cst_18 {dimension_numbers = #tpu.dot_dimension_numbers<[1], [0], [0], [1], [0, 0, 1, 1], [], []>} : vector<256x8xf32>, vector<8x32xf32>, vector<256x32xf32> -> vector<256x32xf32>
    %c0_19 = arith.constant 0 : index
    %c0_20 = arith.constant 0 : index
    %c0_21 = arith.constant 0 : index
    %c0_22 = arith.constant 0 : index
    %34 = vector.load %arg1[%c0_19, %c0_20, %c0_21, %c0_22] : memref<1x16x16x32xf32, #tpu.memory_space<vmem>>, vector<1x16x16x32xf32>
    %35 = vector.shape_cast %34 : vector<1x16x16x32xf32> to vector<256x32xf32>
    %c0_23 = arith.constant 0 : index
    %c0_24 = arith.constant 0 : index
    %36 = vector.load %arg7[%c0_23, %c0_24] : memref<1x32xf32, #tpu.memory_space<vmem>>, vector<1x32xf32>
    %37 = vector.broadcast %36 : vector<1x32xf32> to vector<256x32xf32>
    %38 = arith.addf %33, %37 : vector<256x32xf32>
    %39 = arith.addf %38, %35 : vector<256x32xf32>
    %cst_25 = arith.constant 0.000000e+00 : f32
    %40 = vector.broadcast %cst_25 : f32 to vector<256x32xf32>
    %41 = arith.maximumf %39, %40 : vector<256x32xf32>
    %42 = vector.shape_cast %41 : vector<256x32xf32> to vector<1x16x16x32xf32>
    %c0_26 = arith.constant 0 : index
    %c0_27 = arith.constant 0 : index
    %c0_28 = arith.constant 0 : index
    %c0_29 = arith.constant 0 : index
    %43 = vector.load %arg8[%c0_26, %c0_27, %c0_28, %c0_29] : memref<1x16x16x32xf32, #tpu.memory_space<vmem>>, vector<1x16x16x32xf32>
    tpu.vector_store %arg8[%c0_26, %c0_27, %c0_28, %c0_29], %42 {strides = array<i32>} : memref<1x16x16x32xf32, #tpu.memory_space<vmem>>, vector<1x16x16x32xf32>,
    return
  }
  func.func @transform_0(%arg0: i32) -> (i32, i32, i32, i32) {
    %c0_i32 = arith.constant 0 : i32
    %c0_i32_0 = arith.constant 0 : i32
    %c0_i32_1 = arith.constant 0 : i32
    %c0_i32_2 = arith.constant 0 : i32
    return %arg0, %c0_i32, %c0_i32_0, %c0_i32_1 : i32, i32, i32, i32
  }
  func.func @transform_1(%arg0: i32) -> (i32, i32) {
    %c0_i32 = arith.constant 0 : i32
    %c0_i32_0 = arith.constant 0 : i32
    %c0_i32_1 = arith.constant 0 : i32
    return %c0_i32, %c0_i32_0 : i32, i32
  }
  func.func @transform_2(%arg0: i32) -> (i32, i32) {
    %c0_i32 = arith.constant 0 : i32
    %c0_i32_0 = arith.constant 0 : i32
    %c0_i32_1 = arith.constant 0 : i32
    return %c0_i32, %c0_i32_0 : i32, i32
  }
  func.func @transform_3(%arg0: i32) -> (i32, i32) {
    %c0_i32 = arith.constant 0 : i32
    %c0_i32_0 = arith.constant 0 : i32
    %c0_i32_1 = arith.constant 0 : i32
    return %c0_i32, %c0_i32_0 : i32, i32
  }
  func.func @transform_4(%arg0: i32) -> (i32, i32) {
    %c0_i32 = arith.constant 0 : i32
    %c0_i32_0 = arith.constant 0 : i32
    %c0_i32_1 = arith.constant 0 : i32
    return %c0_i32, %c0_i32_0 : i32, i32
  }
  func.func @transform_5(%arg0: i32) -> (i32, i32) {
    %c0_i32 = arith.constant 0 : i32
    %c0_i32_0 = arith.constant 0 : i32
    %c0_i32_1 = arith.constant 0 : i32
    return %c0_i32, %c0_i32_0 : i32, i32
  }
  func.func @transform_6(%arg0: i32) -> (i32, i32) {
    %c0_i32 = arith.constant 0 : i32
    %c0_i32_0 = arith.constant 0 : i32
    %c0_i32_1 = arith.constant 0 : i32
    return %c0_i32, %c0_i32_0 : i32, i32
  }
  func.func @transform_7(%arg0: i32) -> (i32, i32, i32, i32) {
    %c0_i32 = arith.constant 0 : i32
    %c0_i32_0 = arith.constant 0 : i32
    %c0_i32_1 = arith.constant 0 : i32
    %c0_i32_2 = arith.constant 0 : i32
    return %arg0, %c0_i32, %c0_i32_0, %c0_i32_1 : i32, i32, i32, i32
  }
}

</mosaic_0001>

<bundles_post_ra>
// kernel: tpu_custom_call.1
= control target key start
LH: loop header
LB: loop body
LE: loop exit
PB: predicated region body
PF: predicated region fallthrough
CT: control target
= control target key end

     0   :  { %12 = vsyncpa [#allocation3], 0  ;;  %s4912_s0 = inlined_call_operand.hbm [shape: f32[2,16,16,32], index: 0, kind: input, shape index: {}]   ;;  %s4913_s1 = inlined_call_operand.vmem [shape: f32[32,8], index: 1, kind: input, shape index: {}]   ;;  %s4914_s2 = inlined_call_operand.vmem [shape: f32[1,8], index: 2, kind: input, shape index: {}]   ;;  %s4915_s3 = inlined_call_operand.vmem [shape: f32[72,8], index: 3, kind: input, shape index: {}]   ;;  %s4916_s4 = inlined_call_operand.vmem [shape: f32[1,8], index: 4, kind: input, shape index: {}]   ;;  %s4917_s5 = inlined_call_operand.vmem [shape: f32[8,32], index: 5, kind: input, shape index: {}]   ;;  %s4918_s6 = inlined_call_operand.vmem [shape: f32[1,32], index: 6, kind: input, shape index: {}]   ;;  %s4919_s7 = inlined_call_operand.hbm [shape: f32[2,16,16,32], index: 7, kind: output, shape index: {}]  }
   0x1   :  { %14 = vsyncpa [#allocation3 + $0x1], 0 }
   0x2   :  { %15 = vsyncpa [#allocation4], 0 }
   0x3   :  { %17 = vsyncpa [#allocation4 + $0x1], 0  ;;  %s2980_s24 = smov 0   ;;  %s2982_s25 = smov 0  }
   0x4   :  { %s2984_s26 = smov 0   ;;  %s2986_s27 = smov 0  }
   0x5 LB: > { %s3001_s28 = sadd.s32 4294967295, %s2926_s27   ;;  %s2608_s29 = sadd.s32 4294967294, %s2926_s27   ;;  %s2926_s27 = sphi %s2986_s27, %s5097_s27   ;;  %s2922_s26 = sphi %s2984_s26, %s5096_s26   ;;  %s2918_s25 = sphi %s2982_s25, %s5095_s25   ;;  %s2914_s24 = sphi %s2980_s24, %s5094_s24  }
   0x6   : > { %s3005_s30 = sadd.s32 1, %s2926_s27   ;;  %s30_s8 = sadd.s32 1, %s2922_s26 }
   0x7   : > { %s27_s9 = ssub.s32 %s2926_s27, %s3005_s30  ;;  %p37_p0 = scmp.ne.s32.totalorder %s2922_s26, %s2918_s25 }
   0x8   : > { %p28_p1 = scmp.eq.s32.totalorder %s27_s9, 0  ;;  %p38_p2 = scmp.eq.s32.totalorder %s2926_s27, 0 }
   0x9   : > { %p43_p3 = scmp.ne.s32.totalorder %s2918_s25, %s2914_s24  ;;  %p44_p4 = scmp.eq.s32.totalorder %s3001_s28, 0 }
   0xa   : > { %s3017_s10 = scalar_select %p28_p1, %s2922_s26, %s30_s8  }
   0xb   : > { %p3019_p5 = por %p38_p2, %p37_p0  ;;  %p3023_p6 = por %p44_p4, %p43_p3 }
   0xc   : > { %4977 = sst [smem:[#allocation8_spill]] %s3017_s10  ;;  %p193_p7 = scmp.eq.s32.totalorder %s3001_s28, 1 }
   0xd   : > { %p199_p8 = scmp.eq.s32.totalorder %s2608_s29, 1  ;;  %p2746_p10 = scmp.lt.s32.totalorder %s2926_s27, 2 }
   0xe   : > { %p3030_p11 = por %p193_p7, %p37_p0  ;;  %s237_s15 = sand.u32 1, %s2922_s26  }
   0xf   : > { %p3034_p12 = por %p199_p8, %p43_p3  ;;  %s2718_s16 = sshll.u32 %s2926_s27, 8 }
  0x10   : > { %s2611_s17 = sshll.u32 %s237_s15, 8  ;;  %s246_s20 = scalar_lea.hbm %s4912_s0, %s2718_s16 }
  0x11   : > { %s247_s21 = sshll.u32 %s246_s20, 4  ;;  %s241_s22 = scalar_lea.vmem [#allocation2], %s2611_s17  ;;  %s248_s21 = int_to_ptr.hbm [resolvable:$true] %s247_s21 }
  0x12   : > { %s249_s23 = sshll.u32 %s241_s22, 4  ;;  %p3045_p13 = pnand %p2746_p10, %p3019_p5  ;;  %s250_s23 = int_to_ptr.vmem [resolvable:$true] %s249_s23 }
  0x13   : > { %p2614_p0 = scmp.ge.s32.totalorder %s2926_s27, 1  ;;  %p257_p1 = scmp.lt.s32.totalorder %s2926_s27, 3 }
  0x14   : > { %s238_s8 = scalar_lea.sflag [#allocation3], %s237_s15  ;;  %s2830_s9 = sshra.s32 %s248_s21, 4  ;;  %s2831_s9 = int_to_ptr.hbm [resolvable:$true] %s2830_s9 }
  0x15   : > { %s2832_s10 = scalar_lea.hbm %s2831_s9, 256  ;;  %p2834_p3 = pneg %p3045_p13 }
  0x16   : > { %p2833_p2 = scmp.ne.s32.totalorder %s2831_s9, %s2832_s10  ;;  %s2837_s11 = scalar_lea.hbm %s4912_s0, 512 }
  0x17   : > { %p2838_p5 = scmp.lt.s32.totalorder %s2831_s9, %s4912_s0  ;;  %p2839_p8 = scmp.lt.s32.totalorder %s2837_s11, %s2832_s10 }
  0x18   : > { %p2835_p4 = pnand %p2834_p3, %p2833_p2 }
  0x19   : > { %p2840_p10 = por %p2839_p8, %p2838_p5 }
  0x1a   : > { %p2836_p7 = pneg %p2835_p4 }
  0x1c   : > { %p2841_p9 = pnand %p2840_p10, %p2836_p7 }
  0x1e   : > { %2844 = shalt.err (!%p2841_p9)
}
  0x1f   : > { %s2928_s15 = smov 128   ;;  %s2929_s20 = smov 8  }
  0x20   : > { %2741 = dma.hbm_to_vmem [thread:$0]  (!%p3045_p13), %s248_s21, 4096, %s250_s23, %s238_s8, %s2928_s15, %s2928_s15, %s2929_s20  }
  0x21   : > { %p258_p2 = pnand %p2614_p0, %p257_p1 }
  0x23   : > { %261 = sbr.rel (%p258_p2) target bundleno = 1250 (0x4e2), region = 48 }
  0x28   : > { %s3066_s22 = sand.u32 1, %s2918_s25  }
  0x29   : > { %s4920_s10 = sshll.u32 %s3066_s22, 8  ;;  %s264_s9 = scalar_lea.sflag [#allocation3], %s3066_s22 }
  0x2a   : > { %s3072_s16 = scalar_lea.vmem [#allocation2], %s4920_s10 }
  0x2b   : > { %2905 = dma.done.wait (%p3023_p6), %s264_s9, 4096  }
  0x2c   : > { %2907 = vsyncadd (%p3023_p6), %s264_s9, 4294963200  ;;  %v334_v0 = vld [vmem:[%s4913_s1 + $0x18] sm:$0xff]  ;;  %v333_v1 = vld [vmem:[%s4913_s1 + $0x10] sm:$0xff]  ;;  %vm339_vm0 = vcmask 261120   ;;  %v4923_v19 = vmov 0.0   ;;  %s2931_s19 = smov 8  }
  0x2d   : > { %448 = vmatpush.msra.mxu0 %v334_v0  ;;  %2720 = vmatpush.msra.mxu3 %v334_v0  ;;  %v332_v2 = vld [vmem:[%s4913_s1 + $0x8] sm:$0xff]  ;;  %v331_v3 = vld [vmem:[%s4913_s1] sm:$0xff]  ;;  %v325_v7 = vld [vmem:[%s3072_s16 + $0xd0] sm:$0xff]  ;;  %v3121_v20 = vrot.slane %v4923_v19, 1  ;;  %v3124_v21 = vrot.slane %v4923_v19, 2  ;;  %s2932_s15 = smov 16  }
  0x2e   : > { %v299_v4 = vld [vmem:[%s3072_s16] sm:$0xff]  ;;  %v324_v5 = vld [vmem:[%s3072_s16 + $0xc8] sm:$0xff]  ;;  %v301_v8 = vld [vmem:[%s3072_s16 + $0x10] sm:$0xff]  ;;  %vm613_vm1 = vcmask 1040384   ;;  %s2933_s21 = smov 24   ;;  %vm943_vm2 = vcmask 1045504  }
  0x2f   : > { %449 = vmatpush.msra.mxu0 %v333_v1  ;;  %2721 = vmatpush.msra.mxu3 %v333_v1  ;;  %v300_v6 = vld [vmem:[%s3072_s16 + $0x8] sm:$0xff]  ;;  %v326_v9 = vld [vmem:[%s3072_s16 + $0xd8] sm:$0xff]  ;;  %v303_v11 = vld [vmem:[%s3072_s16 + $0x20] sm:$0xff]  ;;  %4983 = vst [vmem:[#allocation9_spill] sm:$0xff] %v3121_v20  ;;  %vm772_vm3 = vcmask 1046528   ;;  %s2934_s23 = smov 32  }
  0x30   : > { %v302_v10 = vld [vmem:[%s3072_s16 + $0x18] sm:$0xff]  ;;  %v327_v12 = vld [vmem:[%s3072_s16 + $0xe0] sm:$0xff]  ;;  %v304_v13 = vld [vmem:[%s3072_s16 + $0x28] sm:$0xff]  ;;  %4984 = vst [vmem:[#allocation10_spill] sm:$0xff] %v3124_v21  ;;  %850 = vrot.lane.b32.xlu0 %v3121_v20, %s2931_s19  ;;  %s2935_s29 = smov 40   ;;  %s2936_s8 = smov 48  }
  0x31   : > { %450 = vmatpush.msra.mxu0 %v332_v2  ;;  %2722 = vmatpush.msra.mxu3 %v332_v2  ;;  %v328_v14 = vld [vmem:[%s3072_s16 + $0xe8] sm:$0xff]  ;;  %v305_v15 = vld [vmem:[%s3072_s16 + $0x30] sm:$0xff]  ;;  %v306_v16 = vld [vmem:[%s3072_s16 + $0x38] sm:$0xff]  ;;  %s4921_s17 = smov 64   ;;  %s2938_s11 = smov 56   ;;  %vm1693_vm4 = vcmask 64512  }
  0x32   : > { %v307_v17 = vld [vmem:[%s3072_s16 + $0x40] sm:$0xff]  ;;  %v308_v18 = vld [vmem:[%s3072_s16 + $0x48] sm:$0xff]  ;;  %1021 = vrot.lane.b32.xlu1 %v3124_v21, %s2932_s15  ;;  %v309_v22 = vld [vmem:[%s3072_s16 + $0x50] sm:$0xff]  ;;  %vm1725_vm5 = vcmask 130048   ;;  %vm1757_vm6 = vcmask 195584   ;;  %s5001_s18 = smov 64  }
  0x33   : > { %451 = vmatpush.msra.mxu0 %v331_v3  ;;  %2723 = vmatpush.msra.mxu3 %v331_v3  ;;  %v310_v23 = vld [vmem:[%s3072_s16 + $0x58] sm:$0xff]  ;;  %v311_v24 = vld [vmem:[%s3072_s16 + $0x60] sm:$0xff]  ;;  %v312_v25 = vld [vmem:[%s3072_s16 + $0x68] sm:$0xff]  ;;  %vm1855_vm7 = vcmask 392192   ;;  %vm1822_vm8 = vcmask 326656   ;;  %vm1888_vm9 = vcmask 457728  }
  0x34   : > { %2617 = vmatmul.msk.f32.vlgmr.msra.gmra.mxu0 %vm339_vm0, %v299_v4  ;;  %2642 = vmatmul.msk.f32.vlgmr.msra.gmra.mxu3 %vm339_vm0, %v324_v5  ;;  %v313_v26 = vld [vmem:[%s3072_s16 + $0x70] sm:$0xff]  ;;  %v314_v27 = vld [vmem:[%s3072_s16 + $0x78] sm:$0xff]  ;;  %v3145_v28 = vld [vmem:[%s4914_s2] ss:$0 sm:$0xff]  ;;  %vm1921_vm10 = vcmask 523264   ;;  %vm1967_vm11 = vcmask 588800  }
  0x35   : > { %v315_v30 = vld [vmem:[%s3072_s16 + $0x80] sm:$0xff]  ;;  %v316_v36 = vld [vmem:[%s3072_s16 + $0x88] sm:$0xff]  ;;  %v317_v44 = vld [vmem:[%s3072_s16 + $0x90] sm:$0xff]  ;;  %s5037_s9 = sshll.u32 %s3066_s22, 8 }
  0x36   : > { %v318_v55 = vld [vmem:[%s3072_s16 + $0x98] sm:$0xff]  ;;  %v319_v1 = vld [vmem:[%s3072_s16 + $0xa0] sm:$0xff] }
  0x3c   : > { %2618 = vmatmul.msk.f32.gmra.mxu0 %vm339_vm0, %v300_v6  ;;  %2643 = vmatmul.msk.f32.gmra.mxu3 %vm339_vm0, %v325_v7 }
  0x44   : > { %2619 = vmatmul.msk.f32.gmra.mxu0 %vm339_vm0, %v301_v8  ;;  %2644 = vmatmul.msk.f32.gmra.mxu3 %vm339_vm0, %v326_v9  ;;  %v320_v9 = vld [vmem:[%s3072_s16 + $0xa8] sm:$0xff] }
  0x4c   : > { %2620 = vmatmul.msk.f32.gmra.mxu0 %vm339_vm0, %v302_v10  ;;  %2645 = vmatmul.msk.f32.gmra.mxu3 %vm339_vm0, %v327_v12 }
  0x54   : > { %2621 = vmatmul.msk.f32.gmra.mxu0 %vm339_vm0, %v303_v11  ;;  %2646 = vmatmul.msk.f32.gmra.mxu3 %vm339_vm0, %v328_v14 }
  0x5c   : > { %2622 = vmatmul.msk.f32.gmra.mxu0 %vm339_vm0, %v304_v13 }
  0x64   : > { %2623 = vmatmul.msk.f32.gmra.mxu0 %vm339_vm0, %v305_v15 }
  0x6c   : > { %2624 = vmatmul.msk.f32.gmra.mxu0 %vm339_vm0, %v306_v16 }
  0x74   : > { %2625 = vmatmul.msk.f32.gmra.mxu0 %vm339_vm0, %v307_v17 }
  0x7c   : > { %2626 = vmatmul.msk.f32.gmra.mxu0 %vm339_vm0, %v308_v18  ;;  %v321_v18 = vld [vmem:[%s3072_s16 + $0xb0] sm:$0xff] }
  0x84   : > { %2627 = vmatmul.msk.f32.gmra.mxu0 %vm339_vm0, %v309_v22 }
  0x8c   : > { %2628 = vmatmul.msk.f32.gmra.mxu0 %vm339_vm0, %v310_v23 }
  0x94   : > { %2629 = vmatmul.msk.f32.gmra.mxu0 %vm339_vm0, %v311_v24 }
  0x9c   : > { %2630 = vmatmul.msk.f32.gmra.mxu0 %vm339_vm0, %v312_v25 }
  0xa4   : > { %2631 = vmatmul.msk.f32.gmra.mxu0 %vm339_vm0, %v313_v26 }
  0xac   : > { %2632 = vmatmul.msk.f32.gmra.mxu0 %vm339_vm0, %v314_v27 }
  0xb1   : > { %v453_v29 = vpop.f32.mrf.mxu0 }
  0xb2   : > { %v454_v31 = vadd.f32 %v3145_v28, %v453_v29 }
  0xb4   : > { %v549_v32 = vmax.f32 %v454_v31, 0.0  ;;  %2633 = vmatmul.msk.f32.gmra.mxu0 %vm339_vm0, %v315_v30  ;;  %v322_v31 = vld [vmem:[%s3072_s16 + $0xb8] sm:$0xff] }
  0xb6   : > { %v614_v33 = vrot.slane %v549_v32, 7 }
  0xb7   : > { %v3156_v37 = vpop.f32.mrf.mxu3 }
  0xb8   : > { %v3151_v34 = vsel %vm613_vm1, 0.0, %v614_v33 }
  0xb9   : > { %v456_v35 = vpop.f32.mrf.mxu0  ;;  %1115 = vrot.lane.b32.xlu2 %v3151_v34, %s2933_s21  ;;  %v946_v45 = vrot.slane %v3151_v34, 2  ;;  %v775_v53 = vrot.slane %v3151_v34, 1 }
  0xba   : > { %v457_v38 = vadd.f32 %v3145_v28, %v456_v35 }
  0xbc   : > { %v550_v39 = vmax.f32 %v457_v38, 0.0  ;;  %2634 = vmatmul.msk.f32.gmra.mxu0 %vm339_vm0, %v316_v36 }
  0xbe   : > { %v615_v40 = vrot.slane %v550_v39, 7 }
  0xbf   : > { %v531_v50 = vpop.f32.mrf.mxu3 }
  0xc0   : > { %v725_v41 = vsel %vm613_vm1, %v615_v40, 0.0  ;;  %v3162_v42 = vsel %vm613_vm1, %v614_v33, %v615_v40  ;;  %v532_v62 = vadd.f32 %v3145_v28, %v531_v50 }
  0xc1   : > { %v778_v43 = vrot.slane %v725_v41, 1  ;;  %1117 = vrot.lane.b32.xlu0 %v3162_v42, %s2933_s21  ;;  %v947_v46 = vrot.slane %v3162_v42, 2  ;;  %v776_v47 = vrot.slane %v3162_v42, 1  ;;  %v459_v51 = vpop.f32.mrf.mxu0  ;;  %v949_v57 = vrot.slane %v725_v41, 2 }
  0xc2   : > { %v460_v52 = vadd.f32 %v3145_v28, %v459_v51  ;;  %v575_v4 = vmax.f32 %v532_v62, 0.0 }
  0xc3   : > { %v948_v48 = vsel %vm943_vm2, %v946_v45, %v947_v46  ;;  %v779_v49 = vsel %vm772_vm3, %v776_v47, %v778_v43  ;;  %v777_v54 = vsel %vm772_vm3, %v775_v53, %v776_v47  ;;  %v950_v0 = vsel %vm943_vm2, %v947_v46, %v949_v57  ;;  %v323_v43 = vld [vmem:[%s3072_s16 + $0xc0] sm:$0xff] }
  0xc4   : > { %2635 = vmatmul.msk.f32.gmra.mxu0 %vm339_vm0, %v317_v44  ;;  %1023 = vrot.lane.b32.xlu2 %v948_v48, %s2932_s15  ;;  %v551_v56 = vmax.f32 %v460_v52, 0.0  ;;  %v653_v7 = vrot.slane %v575_v4, 7 }
  0xc5   : > { %854 = vrot.lane.b32.xlu1 %v779_v49, %s2931_s19 }
  0xc6   : > { %v617_v59 = vrot.slane %v551_v56, 7  ;;  %v3213_v17 = vsel %vm613_vm1, 0.0, %v653_v7 }
  0xc7   : > { %v534_v58 = vpop.f32.mrf.mxu3  ;;  %4986 = vst [vmem:[#allocation12_spill] sm:$0xff] %v3213_v17  ;;  %v840_v25 = vrot.slane %v3213_v17, 1  ;;  %v1011_v30 = vrot.slane %v3213_v17, 2 }
  0xc8   : > { %v535_v63 = vadd.f32 %v3145_v28, %v534_v58  ;;  %v3190_v2 = vsel %vm613_vm1, 0.0, %v617_v59 }
  0xc9   : > { %852 = vrot.lane.b32.xlu0 %v777_v54, %s2931_s19  ;;  %v462_v60 = vpop.f32.mrf.mxu0  ;;  %v951_v35 = vrot.slane %v3190_v2, 2  ;;  %v780_v40 = vrot.slane %v3190_v2, 1 }
  0xca   : > { %v463_v61 = vadd.f32 %v3145_v28, %v462_v60  ;;  %v576_v5 = vmax.f32 %v535_v63, 0.0 }
  0xcc   : > { %2636 = vmatmul.msk.f32.gmra.mxu0 %vm339_vm0, %v318_v55  ;;  %1217 = vrot.lane.b32.xlu2 %v777_v54, %s2934_s23  ;;  %v552_v3 = vmax.f32 %v463_v61, 0.0  ;;  %v654_v8 = vrot.slane %v576_v5, 7 }
  0xcd   : > { %1219 = vrot.lane.b32.xlu1 %v779_v49, %s2934_s23 }
  0xce   : > { %v618_v6 = vrot.slane %v552_v3, 7  ;;  %v3202_v11 = vsel %vm613_vm1, %v653_v7, %v654_v8  ;;  %v738_v12 = vsel %vm613_vm1, %v654_v8, 0.0 }
  0xcf   : > { %4985 = vst [vmem:[#allocation11_spill] sm:$0xff] %v3202_v11  ;;  %v1014_v13 = vrot.slane %v738_v12, 2  ;;  %v1012_v14 = vrot.slane %v3202_v11, 2  ;;  %v843_v15 = vrot.slane %v738_v12, 1  ;;  %v841_v16 = vrot.slane %v3202_v11, 1  ;;  %v537_v41 = vpop.f32.mrf.mxu3 }
  0xd0   : > { %v3199_v10 = vsel %vm613_vm1, %v617_v59, %v618_v6  ;;  %v726_v23 = vsel %vm613_vm1, %v618_v6, 0.0  ;;  %v538_v49 = vadd.f32 %v3145_v28, %v537_v41 }
  0xd1   : > { %1025 = vrot.lane.b32.xlu0 %v950_v0, %s2932_s15  ;;  %v3219_v22 = vsel %vm943_vm2, %v1012_v14, %v1014_v13  ;;  %v3224_v24 = vsel %vm772_vm3, %v841_v16, %v843_v15  ;;  %v783_v26 = vrot.slane %v726_v23, 1  ;;  %v781_v27 = vrot.slane %v3199_v10, 1  ;;  %v465_v46 = vpop.f32.mrf.mxu0 }
  0xd2   : > { %4987 = vst [vmem:[#allocation13_spill] sm:$0xff] %v3219_v22  ;;  %v3233_v29 = vsel %vm772_vm3, %v840_v25, %v841_v16  ;;  %v3242_v33 = vsel %vm943_vm2, %v1011_v30, %v1012_v14  ;;  %v952_v36 = vrot.slane %v3199_v10, 2  ;;  %v954_v38 = vrot.slane %v726_v23, 2 }
  0xd3   : > { %4988 = vst [vmem:[#allocation14_spill] sm:$0xff] %v3224_v24  ;;  %v784_v32 = vsel %vm772_vm3, %v781_v27, %v783_v26  ;;  %v782_v45 = vsel %vm772_vm3, %v780_v40, %v781_v27  ;;  %v466_v47 = vadd.f32 %v3145_v28, %v465_v46  ;;  %v577_v52 = vmax.f32 %v538_v49, 0.0 }
  0xd4   : > { %2637 = vmatmul.msk.f32.gmra.mxu0 %vm339_vm0, %v319_v1  ;;  %1320 = vrot.lane.b32.xlu2 %v950_v0, %s2935_s29  ;;  %4989 = vst [vmem:[#allocation15_spill] sm:$0xff] %v3233_v29  ;;  %v953_v39 = vsel %vm943_vm2, %v951_v35, %v952_v36  ;;  %v955_v44 = vsel %vm943_vm2, %v952_v36, %v954_v38 }
  0xd5   : > { %1119 = vrot.lane.b32.xlu1 %v3190_v2, %s2933_s21  ;;  %4990 = vst [vmem:[#allocation16_spill] sm:$0xff] %v3242_v33  ;;  %v553_v51 = vmax.f32 %v466_v47, 0.0  ;;  %v656_v55 = vrot.slane %v577_v52, 7  ;;  %v1961_v52 = vld [vmem:[%s4915_s3 + $0x38] sm:$0xff] }
  0xd7   : > { %v620_v54 = vrot.slane %v553_v51, 7  ;;  %v3284_v4 = vsel %vm613_vm1, 0.0, %v656_v55 }
  0xd8   : > { %4993 = vst [vmem:[#allocation19_spill] sm:$0xff] %v3284_v4  ;;  %v1016_v6 = vrot.slane %v3284_v4, 2 }
  0xd9   : > { %1318 = vrot.lane.b32.xlu0 %v948_v48, %s2935_s29  ;;  %v540_v48 = vpop.f32.mrf.mxu3  ;;  %v3268_v57 = vsel %vm613_vm1, 0.0, %v620_v54  ;;  %v468_v58 = vpop.f32.mrf.mxu0 }
  0xda   : > { %v541_v50 = vadd.f32 %v3145_v28, %v540_v48  ;;  %v469_v59 = vadd.f32 %v3145_v28, %v468_v58  ;;  %v785_v23 = vrot.slane %v3268_v57, 1  ;;  %v1962_v48 = vld [vmem:[%s4915_s3 + $0x40] sm:$0xff]  ;;  %v1959_v58 = vld [vmem:[%s4915_s3 + $0x28] sm:$0xff] }
  0xdb   : > { %2071 = vmatpush.msra.mxu1 %v1962_v48  ;;  %2724 = vmatpush.msrb.mxu3 %v1962_v48 }
  0xdc   : > { %2638 = vmatmul.msk.f32.gmra.mxu0 %vm339_vm0, %v320_v9  ;;  %1121 = vrot.lane.b32.xlu2 %v3199_v10, %s2933_s21  ;;  %v578_v53 = vmax.f32 %v541_v50, 0.0  ;;  %v554_v62 = vmax.f32 %v469_v59, 0.0  ;;  %v845_v9 = vrot.slane %v3284_v4, 1 }
  0xdd   : > { %1414 = vrot.lane.b32.xlu1 %v3190_v2, %s2936_s8  ;;  %2072 = vmatpush.msra.mxu1 %v1961_v52 }
  0xde   : > { %v657_v56 = vrot.slane %v578_v53, 7  ;;  %v621_v1 = vrot.slane %v554_v62, 7  ;;  %2725 = vmatpush.msrb.mxu3 %v1961_v52  ;;  %v1958_v62 = vld [vmem:[%s4915_s3 + $0x20] sm:$0xff] }
  0xe0   : > { %v3272_v60 = vsel %vm613_vm1, %v656_v55, %v657_v56  ;;  %v739_v61 = vsel %vm613_vm1, %v657_v56, 0.0  ;;  %v3289_v5 = vsel %vm613_vm1, %v620_v54, %v621_v1  ;;  %v727_v13 = vsel %vm613_vm1, %v621_v1, 0.0  ;;  %v1960_v55 = vld [vmem:[%s4915_s3 + $0x30] sm:$0xff] }
  0xe1   : > { %1416 = vrot.lane.b32.xlu0 %v3199_v10, %s2936_s8  ;;  %4991 = vst [vmem:[#allocation17_spill] sm:$0xff] %v3272_v60  ;;  %v848_v63 = vrot.slane %v739_v61, 1  ;;  %v846_v0 = vrot.slane %v3272_v60, 1  ;;  %v1017_v7 = vrot.slane %v3272_v60, 2  ;;  %v788_v15 = vrot.slane %v727_v13, 1  ;;  %v471_v40 = vpop.f32.mrf.mxu0  ;;  %2073 = vmatpush.msra.mxu1 %v1960_v55 }
  0xe2   : > { %v786_v16 = vrot.slane %v3289_v5, 1  ;;  %v1019_v25 = vrot.slane %v739_v61, 2  ;;  %v959_v36 = vrot.slane %v727_v13, 2  ;;  %2726 = vmatpush.msrb.mxu3 %v1960_v55 }
  0xe3   : > { %v3281_v3 = vsel %vm772_vm3, %v846_v0, %v848_v63  ;;  %v3301_v12 = vsel %vm943_vm2, %v1016_v6, %v1017_v7  ;;  %v3307_v14 = vsel %vm772_vm3, %v845_v9, %v846_v0  ;;  %2074 = vmatpush.msra.mxu1 %v1959_v58  ;;  %v1957_v0 = vld [vmem:[%s4915_s3 + $0x18] sm:$0xff]  ;;  %v1955_v9 = vld [vmem:[%s4915_s3 + $0x8] sm:$0xff] }
  0xe4   : > { %2639 = vmatmul.msk.f32.gmra.mxu0 %vm339_vm0, %v321_v18  ;;  %1077 = vrot.lane.b32.xlu2 %v3219_v22, %s2932_s15  ;;  %4992 = vst [vmem:[#allocation18_spill] sm:$0xff] %v3281_v3  ;;  %v789_v26 = vsel %vm772_vm3, %v786_v16, %v788_v15  ;;  %v787_v27 = vsel %vm772_vm3, %v785_v23, %v786_v16  ;;  %v1954_v23 = vld [vmem:[%s4915_s3] sm:$0xff] }
  0xe5   : > { %906 = vrot.lane.b32.xlu1 %v3224_v24, %s2931_s19  ;;  %4994 = vst [vmem:[#allocation20_spill] sm:$0xff] %v3301_v12  ;;  %v3321_v30 = vsel %vm943_vm2, %v1017_v7, %v1019_v25  ;;  %2727 = vmatpush.msrb.mxu3 %v1959_v58  ;;  %v1956_v7 = vld [vmem:[%s4915_s3 + $0x10] sm:$0xff] }
  0xe6   : > { %4995 = vst [vmem:[#allocation21_spill] sm:$0xff] %v3307_v14  ;;  %2075 = vmatpush.msra.mxu1 %v1958_v62 }
  0xe7   : > { %4996 = vst [vmem:[#allocation22_spill] sm:$0xff] %v3321_v30  ;;  %2728 = vmatpush.msrb.mxu3 %v1958_v62 }
  0xe8   : > { %2076 = vmatpush.msra.mxu1 %v1957_v0 }
  0xe9   : > { %904 = vrot.lane.b32.xlu0 %v3233_v29, %s2931_s19  ;;  %v474_v50 = vpop.f32.mrf.mxu0  ;;  %2729 = vmatpush.msrb.mxu3 %v1957_v0 }
  0xea   : > { %v475_v53 = vadd.f32 %v3145_v28, %v474_v50  ;;  %2077 = vmatpush.msra.mxu1 %v1956_v7 }
  0xeb   : > { %2730 = vmatpush.msrb.mxu3 %v1956_v7 }
  0xec   : > { %2640 = vmatmul.msk.f32.gmra.mxu0 %vm339_vm0, %v322_v31  ;;  %858 = vrot.lane.b32.xlu2 %v784_v32, %s2931_s19  ;;  %v956_v31 = vrot.slane %v3268_v57, 2  ;;  %v556_v59 = vmax.f32 %v475_v53, 0.0 }
  0xed   : > { %1075 = vrot.lane.b32.xlu1 %v3242_v33, %s2932_s15  ;;  %2078 = vmatpush.msra.mxu1 %v1955_v9 }
  0xee   : > { %v624_v1 = vrot.slane %v556_v59, 7  ;;  %2731 = vmatpush.msrb.mxu3 %v1955_v9 }
  0xef   : > { %2079 = vmatpush.msra.mxu1 %v1954_v23 }
  0xf0   : > { %v728_v16 = vsel %vm613_vm1, %v624_v1, 0.0  ;;  %2732 = vmatpush.msrb.mxu3 %v1954_v23 }
  0xf1   : > { %1600 = vrot.lane.b32.xlu0 %v953_v39, %s4921_s17  ;;  %v964_v53 = vrot.slane %v728_v16, 2 }
  0xf4   : > { %2641 = vmatmul.msk.f32.gmra.mxu0 %vm339_vm0, %v323_v43  ;;  %1029 = vrot.lane.b32.xlu2 %v955_v44, %s2932_s15  ;;  %v472_v43 = vadd.f32 %v3145_v28, %v471_v40  ;;  %v477_v40 = vpop.f32.mrf.mxu0 }
  0xf5   : > { %856 = vrot.lane.b32.xlu1 %v782_v45, %s2931_s19  ;;  %v478_v9 = vadd.f32 %v3145_v28, %v477_v40 }
  0xf6   : > { %v555_v46 = vmax.f32 %v472_v43, 0.0 }
  0xf8   : > { %v623_v49 = vrot.slane %v555_v46, 7 }
  0xf9   : > { %1221 = vrot.lane.b32.xlu0 %v782_v45, %s2934_s23 }
  0xfa   : > { %v3362_v56 = vsel %vm613_vm1, 0.0, %v623_v49  ;;  %v3393_v15 = vsel %vm613_vm1, %v623_v49, %v624_v1 }
  0xfb   : > { %4998 = vst [vmem:[#allocation24_spill] sm:$0xff] %v3393_v15  ;;  %v961_v48 = vrot.slane %v3362_v56, 2  ;;  %v962_v49 = vrot.slane %v3393_v15, 2 }
  0xfc   : > { %1507 = vrot.lane.b32.xlu2 %v782_v45, %s2938_s11  ;;  %v3340_v45 = vpop.permute.xlu1 %1021  ;;  %v480_v55 = vpop.f32.mrf.mxu0 }
  0xfd   : > { %1027 = vrot.lane.b32.xlu1 %v953_v39, %s2932_s15  ;;  %v963_v52 = vsel %vm943_vm2, %v961_v48, %v962_v49  ;;  %v965_v62 = vsel %vm943_vm2, %v962_v49, %v964_v53  ;;  %v481_v49 = vadd.f32 %v3145_v28, %v480_v55 }
 0x101   : > { %1324 = vrot.lane.b32.xlu0 %v955_v44, %s2935_s29 }
 0x104   : > { %1602 = vrot.lane.b32.xlu2 %v955_v44, %s4921_s17 }
 0x105   : > { %1509 = vrot.lane.b32.xlu1 %v784_v32, %s2938_s11 }
 0x109   : > { %1123 = vrot.lane.b32.xlu0 %v3268_v57, %s2933_s21 }
 0x10c   : > { %1223 = vrot.lane.b32.xlu2 %v784_v32, %s2934_s23  ;;  %v957_v32 = vrot.slane %v3289_v5, 2 }
 0x10d   : > { %1322 = vrot.lane.b32.xlu1 %v953_v39, %s2935_s29  ;;  %v3332_v39 = vpop.permute.xlu0 %850 }
 0x10e   : > { %v958_v38 = vsel %vm943_vm2, %v956_v31, %v957_v32  ;;  %v960_v41 = vsel %vm943_vm2, %v957_v32, %v959_v36  ;;  %v791_v31 = vrot.slane %v3393_v15, 1  ;;  %v790_v32 = vrot.slane %v3362_v56, 1 }
 0x10f   : > { %v1694_v0 = vsel %vm1693_vm4, 0.0, %v3332_v39 }
 0x110   : > { %v1726_v7 = vsel %vm1725_vm5, %v1694_v0, %v3340_v45 }
 0x111   : > { %910 = vrot.lane.b32.xlu0 %v3281_v3, %s2931_s19 }
 0x113   : > { %v3297_v8 = vpop.permute.xlu2 %1115 }
 0x114   : > { %1418 = vrot.lane.b32.xlu2 %v3268_v57, %s2936_s8  ;;  %v1758_v23 = vsel %vm1757_vm6, %v1726_v7, %v3297_v8 }
 0x115   : > { %1125 = vrot.lane.b32.xlu1 %v3289_v5, %s2933_s21 }
 0x119   : > { %1079 = vrot.lane.b32.xlu0 %v3301_v12, %s2932_s15 }
 0x11c   : > { %908 = vrot.lane.b32.xlu2 %v3307_v14, %s2931_s19 }
 0x11d   : > { %1420 = vrot.lane.b32.xlu1 %v3289_v5, %s2936_s8 }
 0x11e   : > { %v3314_v18 = vpop.permute.xlu2 %1023 }
 0x121   : > { %862 = vrot.lane.b32.xlu0 %v789_v26, %s2931_s19 }
 0x124   : > { %860 = vrot.lane.b32.xlu2 %v787_v27, %s2931_s19 }
 0x125   : > { %1081 = vrot.lane.b32.xlu1 %v3321_v30, %s2932_s15 }
 0x126   : > { %v3328_v35 = vpop.permute.xlu2 %1217 }
 0x129   : > { %1031 = vrot.lane.b32.xlu0 %v958_v38, %s2932_s15 }
 0x12c   : > { %1513 = vrot.lane.b32.xlu2 %v789_v26, %s2938_s11 }
 0x12d   : > { %1033 = vrot.lane.b32.xlu1 %v960_v41, %s2932_s15 }
 0x12e   : > { %v3338_v44 = vpop.permute.xlu2 %1320 }
 0x131   : > { %1511 = vrot.lane.b32.xlu0 %v787_v27, %s2938_s11 }
 0x133   : > { %v3343_v47 = vpop.permute.xlu0 %1117 }
 0x134   : > { %1326 = vrot.lane.b32.xlu2 %v958_v38, %s2935_s29 }
 0x135   : > { %1604 = vrot.lane.b32.xlu1 %v958_v38, %s4921_s17 }
 0x136   : > { %v3350_v51 = vpop.permute.xlu2 %1121 }
 0x137   : > { %v3356_v54 = vpop.permute.xlu1 %854 }
 0x139   : > { %1606 = vrot.lane.b32.xlu0 %v960_v41, %s4921_s17  ;;  %s4189_s17 = scalar_lea.vmem [#allocation5], %s5037_s9  ;;  %s2520_s9 = scalar_lea.sflag [#allocation4], %s3066_s22 }
 0x13b   : > { %v3368_v61 = vpop.permute.xlu0 %852 }
 0x13c   : > { %1127 = vrot.lane.b32.xlu2 %v3362_v56, %s2933_s21 }
 0x13d   : > { %1225 = vrot.lane.b32.xlu1 %v787_v27, %s2934_s23 }
 0x13e   : > { %v3376_v63 = vpop.permute.xlu2 %1077 }
 0x13f   : > { %4997 = vst [vmem:[#allocation23_spill] sm:$0xff] %v3376_v63  ;;  %v3381_v6 = vpop.permute.xlu1 %1219 }
 0x141   : > { %1227 = vrot.lane.b32.xlu0 %v789_v26, %s2934_s23  ;;  %v793_v26 = vrot.slane %v728_v16, 1 }
 0x143   : > { %v3390_v13 = vpop.permute.xlu0 %1025  ;;  %v794_v38 = vsel %vm772_vm3, %v791_v31, %v793_v26  ;;  %v3442_v26 = vpop.f32.mrf.mxu0 }
 0x144   : > { %1424 = vrot.lane.b32.xlu2 %v3393_v15, %s2936_s8 }
 0x145   : > { %1328 = vrot.lane.b32.xlu1 %v960_v41, %s2935_s29  ;;  %v792_v41 = vsel %vm772_vm3, %v790_v32, %v791_v31  ;;  %v1790_v31 = vsel %vm339_vm0, %v1758_v23, %v3328_v35  ;;  %v557_v32 = vmax.f32 %v478_v9, 0.0 }
 0x146   : > { %v3402_v25 = vpop.permute.xlu2 %858 }
 0x147   : > { %v3404_v27 = vpop.permute.xlu1 %1119 }
 0x149   : > { %1422 = vrot.lane.b32.xlu0 %v3362_v56, %s2936_s8 }
 0x14b   : > { %v1319_v36 = vpop.permute.xlu0 %1318  ;;  %v486_v55 = vpop.f32.mrf.mxu0 }
 0x14c   : > { %866 = vrot.lane.b32.xlu2 %v794_v38, %s2931_s19  ;;  %v1823_v45 = vsel %vm1822_vm8, %v1790_v31, %v1319_v36  ;;  %v626_v36 = vrot.slane %v557_v32, 7 }
 0x14d   : > { %864 = vrot.lane.b32.xlu1 %v792_v41, %s2931_s19 }
 0x14e   : > { %v3414_v43 = vpop.permute.xlu2 %1029 }
 0x14f   : > { %v1415_v46 = vpop.permute.xlu1 %1414 }
 0x150   : > { %v1856_v40 = vsel %vm1855_vm7, %v1823_v45, %v1415_v46  ;;  %v558_v46 = vmax.f32 %v481_v49, 0.0 }
 0x151   : > { %1129 = vrot.lane.b32.xlu0 %v3393_v15, %s2933_s21 }
 0x153   : > { %v3420_v50 = vpop.permute.xlu0 %1416 }
 0x154   : > { %1035 = vrot.lane.b32.xlu2 %v963_v52, %s2932_s15 }
 0x155   : > { %1515 = vrot.lane.b32.xlu1 %v792_v41, %s2938_s11 }
 0x156   : > { %v1508_v58 = vpop.permute.xlu2 %1507 }
 0x157   : > { %v3425_v59 = vpop.permute.xlu1 %906  ;;  %v1889_v8 = vsel %vm1888_vm9, %v1856_v40, %v1508_v58  ;;  %v3461_v58 = vsel %vm613_vm1, 0.0, %v626_v36  ;;  %v489_v40 = vpop.f32.mrf.mxu0 }
 0x158   : > { %4999 = vst [vmem:[#allocation25_spill] sm:$0xff] %v3425_v59 }
 0x159   : > { %1037 = vrot.lane.b32.xlu0 %v965_v62, %s2932_s15  ;;  %5003 = vst [vmem:[#allocation28_spill] sm:$0xff] %v3461_v58 }
 0x15b   : > { %v3431_v1 = vpop.permute.xlu0 %904 }
 0x15c   : > { %5000 = vst [vmem:[#allocation26_spill] sm:$0xff] %v3431_v1  ;;  %1608 = vrot.lane.b32.xlu2 %v963_v52, %s5001_s18 }
 0x15d   : > { %1610 = vrot.lane.b32.xlu1 %v965_v62, %s5001_s18 }
 0x15e   : > { %v1603_v16 = vpop.permute.xlu2 %1602 }
 0x15f   : > { %v3440_v39 = vpop.permute.xlu1 %1075 }
 0x160   : > { %5002 = vst [vmem:[#allocation27_spill] sm:$0xff] %v3440_v39 }
 0x161   : > { %1517 = vrot.lane.b32.xlu0 %v794_v38, %s2938_s11 }
 0x163   : > { %v1601_v48 = vpop.permute.xlu0 %1600 }
 0x164   : > { %1229 = vrot.lane.b32.xlu2 %v792_v41, %s2934_s23  ;;  %v1922_v35 = vsel %vm1921_vm10, %v1889_v8, %v1601_v48  ;;  %v627_v41 = vrot.slane %v558_v46, 7  ;;  %v795_v8 = vrot.slane %v3461_v58, 1 }
 0x165   : > { %1231 = vrot.lane.b32.xlu1 %v794_v38, %s2934_s23  ;;  %2649 = vmatmul.msk.f32.vlgmr.msra.gmra.mxu1 %vm1967_vm11, %v1922_v35 }
 0x166   : > { %v3455_v53 = vpop.permute.xlu2 %1223  ;;  %v3473_v31 = vsel %vm613_vm1, %v626_v36, %v627_v41  ;;  %v729_v32 = vsel %vm613_vm1, %v627_v41, 0.0 }
 0x167   : > { %v3457_v0 = vpop.permute.xlu1 %856  ;;  %5004 = vst [vmem:[#allocation29_spill] sm:$0xff] %v3473_v31  ;;  %v796_v48 = vrot.slane %v3473_v31, 1  ;;  %v967_v36 = vrot.slane %v3473_v31, 2  ;;  %v798_v46 = vrot.slane %v729_v32, 1 }
 0x169   : > { %1330 = vrot.lane.b32.xlu0 %v963_v52, %s2935_s29  ;;  %v1759_v52 = vsel %vm1757_vm6, %v1726_v7, %v3343_v47 }
 0x16a   : > { %v1791_v45 = vsel %vm339_vm0, %v1759_v52, %v3381_v6  ;;  %v969_v6 = vrot.slane %v729_v32, 2  ;;  %v797_v52 = vsel %vm772_vm3, %v795_v8, %v796_v48  ;;  %v966_v32 = vrot.slane %v3461_v58, 2  ;;  %v492_v8 = vpop.f32.mrf.mxu0 }
 0x16b   : > { %v3463_v9 = vpop.permute.xlu0 %1221  ;;  %v1824_v47 = vsel %vm1822_vm8, %v1791_v45, %v3338_v44  ;;  %v493_v21 = vadd.f32 %v3145_v28, %v492_v8 }
 0x16c   : > { %1332 = vrot.lane.b32.xlu2 %v965_v62, %s2935_s29  ;;  %v1857_v49 = vsel %vm1855_vm7, %v1824_v47, %v3420_v50  ;;  %v3505_v45 = vsel %vm943_vm2, %v967_v36, %v969_v6  ;;  %v3508_v50 = vsel %vm772_vm3, %v796_v48, %v798_v46  ;;  %v968_v47 = vsel %vm943_vm2, %v966_v32, %v967_v36 }
 0x16d   : > { %1131 = vrot.lane.b32.xlu1 %v3461_v58, %s2933_s21  ;;  %v484_v48 = vadd.f32 %v3145_v28, %v3442_v26  ;;  %v562_v60 = vmax.f32 %v493_v21, 0.0 }
 0x16e   : > { %v3468_v38 = vpop.permute.xlu2 %1418 }
 0x16f   : > { %v3470_v23 = vpop.permute.xlu1 %1027  ;;  %v633_v12 = vrot.slane %v562_v60, 7 }
 0x171   : > { %1428 = vrot.lane.b32.xlu0 %v3473_v31, %s2936_s8 }
 0x173   : > { %v3481_v62 = vpop.permute.xlu0 %1324 }
 0x174   : > { %1133 = vrot.lane.b32.xlu2 %v3473_v31, %s2933_s21 }
 0x175   : > { %1426 = vrot.lane.b32.xlu1 %v3461_v58, %s2936_s8 }
 0x176   : > { %v3492_v7 = vpop.permute.xlu2 %908 }
 0x177   : > { %5005 = vst [vmem:[#allocation30_spill] sm:$0xff] %v3492_v7  ;;  %v1510_v35 = vpop.permute.xlu1 %1509  ;;  %v495_v7 = vpop.f32.mrf.mxu0 }
 0x178   : > { %v1890_v41 = vsel %vm1888_vm9, %v1857_v49, %v1510_v35  ;;  %v487_v49 = vadd.f32 %v3145_v28, %v486_v55  ;;  %v559_v35 = vmax.f32 %v484_v48, 0.0 }
 0x179   : > { %868 = vrot.lane.b32.xlu0 %v797_v52, %s2931_s19  ;;  %v1923_v19 = vsel %vm1921_vm10, %v1890_v41, %v1603_v16 }
 0x17a   : > { %2650 = vmatmul.msk.f32.gmra.mxu1 %vm1967_vm11, %v1923_v19  ;;  %v560_v36 = vmax.f32 %v487_v49, 0.0  ;;  %v629_v32 = vrot.slane %v559_v35, 7 }
 0x17b   : > { %v3502_v44 = vpop.permute.xlu0 %1123 }
 0x17c   : > { %1041 = vrot.lane.b32.xlu2 %v3505_v45, %s2932_s15  ;;  %v630_v26 = vrot.slane %v560_v36, 7  ;;  %v3538_v55 = vsel %vm613_vm1, 0.0, %v629_v32 }
 0x17d   : > { %870 = vrot.lane.b32.xlu1 %v3508_v50, %s2931_s19  ;;  %5008 = vst [vmem:[#allocation33_spill] sm:$0xff] %v3538_v55  ;;  %v971_v8 = vrot.slane %v3538_v55, 2 }
 0x17e   : > { %v3515_v16 = vpop.permute.xlu2 %860  ;;  %v3545_v49 = vsel %vm613_vm1, %v629_v32, %v630_v26  ;;  %v490_v32 = vadd.f32 %v3145_v28, %v489_v40 }
 0x17f   : > { %v1323_v19 = vpop.permute.xlu1 %1322  ;;  %v498_v35 = vpop.f32.mrf.mxu0  ;;  %v801_v59 = vrot.slane %v3545_v49, 1 }
 0x180   : > { %v561_v3 = vmax.f32 %v490_v32, 0.0 }
 0x181   : > { %1612 = vrot.lane.b32.xlu0 %v968_v47, %s5001_s18 }
 0x183   : > { %v3521_v6 = vpop.permute.xlu0 %910 }
 0x184   : > { %5006 = vst [vmem:[#allocation31_spill] sm:$0xff] %v3521_v6  ;;  %1519 = vrot.lane.b32.xlu2 %v797_v52, %s2938_s11 }
 0x185   : > { %1039 = vrot.lane.b32.xlu1 %v968_v47, %s2932_s15 }
 0x186   : > { %v3526_v46 = vpop.permute.xlu2 %1513 }
 0x187   : > { %v3528_v41 = vpop.permute.xlu1 %1125  ;;  %v3573_v40 = vpop.f32.mrf.mxu0 }
 0x189   : > { %1233 = vrot.lane.b32.xlu0 %v797_v52, %s2934_s23  ;;  %v730_v52 = vsel %vm613_vm1, %v630_v26, 0.0  ;;  %v800_v26 = vrot.slane %v3538_v55, 1 }
 0x18b   : > { %v3531_v63 = vpop.permute.xlu0 %1079 }
 0x18c   : > { %5007 = vst [vmem:[#allocation32_spill] sm:$0xff] %v3531_v63  ;;  %1614 = vrot.lane.b32.xlu2 %v3505_v45, %s5001_s18  ;;  %v803_v63 = vrot.slane %v730_v52, 1 }
 0x18d   : > { %1521 = vrot.lane.b32.xlu1 %v3508_v50, %s2938_s11 }
 0x18e   : > { %v3540_v48 = vpop.permute.xlu2 %1326  ;;  %v3564_v20 = vsel %vm772_vm3, %v801_v59, %v803_v63  ;;  %v972_v63 = vrot.slane %v3545_v49, 2 }
 0x18f   : > { %v3542_v6 = vpop.permute.xlu1 %1420 }
 0x190   : > { %v3591_v4 = vsel %vm943_vm2, %v971_v8, %v972_v63 }
 0x191   : > { %1135 = vrot.lane.b32.xlu0 %v3538_v55, %s2933_s21 }
 0x193   : > { %v3550_v36 = vpop.permute.xlu0 %862 }
 0x194   : > { %1430 = vrot.lane.b32.xlu2 %v3538_v55, %s2936_s8 }
 0x195   : > { %1334 = vrot.lane.b32.xlu1 %v968_v47, %s2935_s29  ;;  %v3571_v47 = vsel %vm772_vm3, %v800_v26, %v801_v59  ;;  %v632_v59 = vrot.slane %v561_v3, 7  ;;  %v974_v26 = vrot.slane %v730_v52, 2 }
 0x196   : > { %v3556_v39 = vpop.permute.xlu2 %1127 }
 0x197   : > { %v3559_v1 = vpop.permute.xlu1 %1081  ;;  %v3600_v3 = vsel %vm613_vm1, 0.0, %v632_v59 }
 0x198   : > { %5009 = vst [vmem:[#allocation34_spill] sm:$0xff] %v3559_v1  ;;  %v1695_v1 = vsel %vm1693_vm4, %v3151_v34, %v3368_v61 }
 0x199   : > { %874 = vrot.lane.b32.xlu0 %v3564_v20, %s2931_s19  ;;  %v1727_v14 = vsel %vm1725_vm5, %v1695_v1, %v3314_v18  ;;  %v731_v18 = vsel %vm613_vm1, %v633_v12, 0.0  ;;  %v3605_v1 = vsel %vm943_vm2, %v972_v63, %v974_v26 }
 0x19a   : > { %v1760_v22 = vsel %vm1757_vm6, %v1727_v14, %v3404_v27  ;;  %v3610_v14 = vsel %vm613_vm1, %v632_v59, %v633_v12  ;;  %v496_v27 = vadd.f32 %v3145_v28, %v495_v7  ;;  %v808_v63 = vrot.slane %v731_v18, 1 }
 0x19b   : > { %v3568_v30 = vpop.permute.xlu0 %1031  ;;  %v1792_v34 = vsel %vm339_vm0, %v1760_v22, %v3463_v9  ;;  %v499_v22 = vadd.f32 %v3145_v28, %v498_v35  ;;  %v1696_v9 = vsel %vm1693_vm4, %v3162_v42, %v3356_v54  ;;  %v806_v59 = vrot.slane %v3610_v14, 1 }
 0x19c   : > { %872 = vrot.lane.b32.xlu2 %v3571_v47, %s2931_s19  ;;  %v1825_v60 = vsel %vm1822_vm8, %v1792_v34, %v1323_v19  ;;  %v504_v19 = vpop.f32.mrf.mxu0  ;;  %v1728_v52 = vsel %vm1725_vm5, %v1696_v9, %v3390_v13  ;;  %v805_v54 = vrot.slane %v3600_v3, 1  ;;  %v563_v26 = vmax.f32 %v496_v27, 0.0 }
 0x19d   : > { %1137 = vrot.lane.b32.xlu1 %v3545_v49, %s2933_s21  ;;  %v1858_v8 = vsel %vm1855_vm7, %v1825_v60, %v3468_v38  ;;  %v564_v34 = vmax.f32 %v499_v22, 0.0  ;;  %v1761_v13 = vsel %vm1757_vm6, %v1728_v52, %v3350_v51  ;;  %v3639_v9 = vsel %vm772_vm3, %v806_v59, %v808_v63 }
 0x19e   : > { %v3584_v32 = vpop.permute.xlu2 %1424  ;;  %v1793_v38 = vsel %vm339_vm0, %v1761_v13, %v3455_v53  ;;  %v979_v27 = vrot.slane %v731_v18, 2  ;;  %v3644_v51 = vsel %vm772_vm3, %v805_v54, %v806_v59  ;;  %v977_v52 = vrot.slane %v3610_v14, 2 }
 0x19f   : > { %v3586_v21 = vpop.permute.xlu1 %1033  ;;  %v1826_v60 = vsel %vm1822_vm8, %v1793_v38, %v3481_v62  ;;  %v635_v53 = vrot.slane %v563_v26, 7 }
 0x1a0   : > { %v1859_v22 = vsel %vm1855_vm7, %v1826_v60, %v3542_v6  ;;  %v976_v6 = vrot.slane %v3600_v3, 2  ;;  %v3658_v59 = vsel %vm943_vm2, %v977_v52, %v979_v27 }
 0x1a1   : > { %1043 = vrot.lane.b32.xlu0 %v3591_v4, %s2932_s15  ;;  %v1892_v18 = vsel %vm1888_vm9, %v1859_v22, %v3526_v46  ;;  %v502_v46 = vadd.f32 %v3145_v28, %v3573_v40 }
 0x1a3   : > { %v1512_v61 = vpop.permute.xlu0 %1511  ;;  %v565_v40 = vmax.f32 %v502_v46, 0.0 }
 0x1a4   : > { %1139 = vrot.lane.b32.xlu2 %v3600_v3, %s2933_s21  ;;  %v1891_v7 = vsel %vm1888_vm9, %v1858_v8, %v1512_v61  ;;  %v636_v8 = vrot.slane %v564_v34, 7  ;;  %v3674_v34 = vsel %vm943_vm2, %v976_v6, %v977_v52 }
 0x1a5   : > { %1045 = vrot.lane.b32.xlu1 %v3605_v1, %s2932_s15  ;;  %v638_v6 = vrot.slane %v565_v40, 7 }
 0x1a6   : > { %v3623_v12 = vpop.permute.xlu2 %866  ;;  %v3664_v54 = vsel %vm613_vm1, %v635_v53, %v636_v8  ;;  %v732_v60 = vsel %vm613_vm1, %v636_v8, 0.0 }
 0x1a7   : > { %5010 = vst [vmem:[#allocation35_spill] sm:$0xff] %v3623_v12  ;;  %v1605_v35 = vpop.permute.xlu1 %1604  ;;  %v811_v38 = vrot.slane %v3664_v54, 1  ;;  %v813_v52 = vrot.slane %v732_v60, 1  ;;  %v984_v24 = vrot.slane %v732_v60, 2  ;;  %v982_v40 = vrot.slane %v3664_v54, 2 }
 0x1a8   : > { %v1924_v42 = vsel %vm1921_vm10, %v1891_v7, %v1605_v35  ;;  %v507_v7 = vpop.f32.mrf.mxu0 }
 0x1a9   : > { %2651 = vmatmul.msk.f32.gmra.mxu1 %vm1967_vm11, %v1924_v42  ;;  %1141 = vrot.lane.b32.xlu0 %v3610_v14, %s2933_s21  ;;  %v3661_v42 = vsel %vm613_vm1, 0.0, %v635_v53 }
 0x1aa   : > { %5011 = vst [vmem:[#allocation36_spill] sm:$0xff] %v3661_v42  ;;  %v810_v13 = vrot.slane %v3661_v42, 1 }
 0x1ab   : > { %v1607_v61 = vpop.permute.xlu0 %1606 }
 0x1ac   : > { %878 = vrot.lane.b32.xlu2 %v3639_v9, %s2931_s19  ;;  %v1925_v35 = vsel %vm1921_vm10, %v1892_v18, %v1607_v61  ;;  %v505_v61 = vadd.f32 %v3145_v28, %v504_v19  ;;  %v3687_v53 = vsel %vm772_vm3, %v810_v13, %v811_v38  ;;  %v3692_v19 = vsel %vm772_vm3, %v811_v38, %v813_v52 }
 0x1ad   : > { %876 = vrot.lane.b32.xlu1 %v3644_v51, %s2931_s19  ;;  %v3699_v13 = vsel %vm613_vm1, 0.0, %v638_v6  ;;  %v1697_v38 = vsel %vm1693_vm4, %v3190_v2, %v3457_v0  ;;  %v981_v52 = vrot.slane %v3661_v42, 2  ;;  %v3724_v2 = vsel %vm943_vm2, %v982_v40, %v984_v24 }
 0x1ae   : > { %v3651_v62 = vpop.permute.xlu2 %1035  ;;  %v566_v18 = vmax.f32 %v505_v61, 0.0  ;;  %v1729_v31 = vsel %vm1725_vm5, %v1697_v38, %v3470_v23 }
 0x1af   : > { %v1226_v63 = vpop.permute.xlu1 %1225  ;;  %v1762_v60 = vsel %vm1757_vm6, %v1729_v31, %v3502_v44  ;;  %v2209_v31 = vld [vmem:[%s4917_s5] sm:$0xff] }
 0x1b0   : > { %v639_v46 = vrot.slane %v566_v18, 7  ;;  %v1794_v29 = vsel %vm339_vm0, %v1762_v60, %v1226_v63  ;;  %2325 = vmatpush.msra.mxu2 %v2209_v31  ;;  %2733 = vmatpush.msra.mxu3 %v2209_v31  ;;  %v508_v63 = vadd.f32 %v3145_v28, %v507_v7 }
 0x1b1   : > { %2652 = vmatmul.msk.f32.gmra.mxu1 %vm1967_vm11, %v1925_v35  ;;  %1049 = vrot.lane.b32.xlu0 %v3658_v59, %s2932_s15  ;;  %v510_v35 = vpop.f32.mrf.mxu0  ;;  %v1827_v24 = vsel %vm1822_vm8, %v1794_v29, %v3540_v48 }
 0x1b2   : > { %v3711_v18 = vsel %vm613_vm1, %v638_v6, %v639_v46  ;;  %v733_v55 = vsel %vm613_vm1, %v639_v46, 0.0  ;;  %v3727_v46 = vsel %vm943_vm2, %v981_v52, %v982_v40  ;;  %v815_v52 = vrot.slane %v3699_v13, 1 }
 0x1b3   : > { %v3671_v26 = vpop.permute.xlu0 %1227  ;;  %v818_v0 = vrot.slane %v733_v55, 1  ;;  %v816_v23 = vrot.slane %v3711_v18, 1  ;;  %v511_v60 = vadd.f32 %v3145_v28, %v510_v35  ;;  %v567_v48 = vmax.f32 %v508_v63, 0.0 }
 0x1b4   : > { %1047 = vrot.lane.b32.xlu2 %v3674_v34, %s2932_s15  ;;  %v1698_v28 = vsel %vm1693_vm4, %v3199_v10, %v3402_v25 }
 0x1b5   : > { %1143 = vrot.lane.b32.xlu1 %v3661_v42, %s2933_s21  ;;  %v3747_v17 = vsel %vm772_vm3, %v816_v23, %v818_v0  ;;  %v568_v35 = vmax.f32 %v511_v60, 0.0  ;;  %v986_v0 = vrot.slane %v3699_v13, 2  ;;  %v641_v10 = vrot.slane %v567_v48, 7 }
 0x1b6   : > { %v1609_v27 = vpop.permute.xlu2 %1608 }
 0x1b7   : > { %v3684_v22 = vpop.permute.xlu1 %1328 }
 0x1b9   : > { %880 = vrot.lane.b32.xlu0 %v3687_v53, %s2931_s19  ;;  %v513_v6 = vpop.f32.mrf.mxu0 }
 0x1bb   : > { %v1423_v8 = vpop.permute.xlu0 %1422 }
 0x1bc   : > { %1145 = vrot.lane.b32.xlu2 %v3664_v54, %s2933_s21  ;;  %v1860_v40 = vsel %vm1855_vm7, %v1827_v24, %v1423_v8  ;;  %v3756_v8 = vsel %vm772_vm3, %v815_v52, %v816_v23 }
 0x1bd   : > { %882 = vrot.lane.b32.xlu1 %v3692_v19, %s2931_s19 }
 0x1be   : > { %v3701_v61 = vpop.permute.xlu2 %1229 }
 0x1bf   : > { %v3703_v11 = vpop.permute.xlu1 %864 }
 0x1c1   : > { %1147 = vrot.lane.b32.xlu0 %v3699_v13, %s2933_s21  ;;  %v516_v23 = vpop.f32.mrf.mxu0 }
 0x1c3   : > { %v3721_v33 = vpop.permute.xlu0 %1129 }
 0x1c4   : > { %1053 = vrot.lane.b32.xlu2 %v3724_v2, %s2932_s15 }
 0x1c5   : > { %1051 = vrot.lane.b32.xlu1 %v3727_v46, %s2932_s15 }
 0x1c6   : > { %v3739_v44 = vpop.permute.xlu2 %1332 }
 0x1c7   : > { %v1516_v38 = vpop.permute.xlu1 %1515 }
 0x1c8   : > { %v1893_v58 = vsel %vm1888_vm9, %v1860_v40, %v1516_v38  ;;  %v989_v40 = vrot.slane %v733_v55, 2  ;;  %v642_v38 = vrot.slane %v568_v35, 7 }
 0x1c9   : > { %886 = vrot.lane.b32.xlu0 %v3747_v17, %s2931_s19  ;;  %v1926_v29 = vsel %vm1921_vm10, %v1893_v58, %v1609_v27  ;;  %v987_v58 = vrot.slane %v3711_v18, 2  ;;  %v1730_v27 = vsel %vm1725_vm5, %v1698_v28, %v3414_v43 }
 0x1ca   : > { %2653 = vmatmul.msk.f32.gmra.mxu1 %vm1967_vm11, %v1926_v29  ;;  %v1763_v31 = vsel %vm1757_vm6, %v1730_v27, %v3528_v41  ;;  %v3783_v41 = vsel %vm613_vm1, 0.0, %v641_v10  ;;  %v3809_v27 = vld [vmem:[%s4914_s2] ss:$0 sm:$0xff] }
 0x1cb   : > { %v3753_v7 = vpop.permute.xlu0 %1037  ;;  %v1795_v25 = vsel %vm339_vm0, %v1763_v31, %v3671_v26  ;;  %v3778_v43 = vsel %vm943_vm2, %v986_v0, %v987_v58  ;;  %v734_v26 = vsel %vm613_vm1, %v642_v38, 0.0  ;;  %v3790_v48 = vsel %vm943_vm2, %v987_v58, %v989_v40  ;;  %5016 = vst [vmem:[#allocation41_spill] sm:$0xff] %v3809_v27 }
 0x1cc   : > { %5012 = vst [vmem:[#allocation37_spill] sm:$0xff] %v3753_v7  ;;  %884 = vrot.lane.b32.xlu2 %v3756_v8, %s2931_s19  ;;  %v1828_v52 = vsel %vm1822_vm8, %v1795_v25, %v3684_v22  ;;  %v3795_v22 = vsel %vm613_vm1, %v641_v10, %v642_v38  ;;  %v823_v35 = vrot.slane %v734_v26, 1  ;;  %v514_v31 = vadd.f32 %v3809_v27, %v513_v6  ;;  %v519_v10 = vpop.f32.mrf.mxu0 }
 0x1cd   : > { %1149 = vrot.lane.b32.xlu1 %v3711_v18, %s2933_s21  ;;  %v1861_v60 = vsel %vm1855_vm7, %v1828_v52, %v3584_v32  ;;  %5014 = vst [vmem:[#allocation39_spill] sm:$0xff] %v3790_v48  ;;  %v821_v58 = vrot.slane %v3795_v22, 1  ;;  %v820_v25 = vrot.slane %v3783_v41, 1  ;;  %v994_v52 = vrot.slane %v734_v26, 2  ;;  %v3832_v26 = vld [vmem:[%s4916_s4] ss:$0 sm:$0xff] }
 0x1ce   : > { %v3771_v24 = vpop.permute.xlu2 %1133  ;;  %v992_v6 = vrot.slane %v3795_v22, 2 }
 0x1cf   : > { %5013 = vst [vmem:[#allocation38_spill] sm:$0xff] %v3771_v24  ;;  %v1611_v63 = vpop.permute.xlu1 %1610  ;;  %v3817_v38 = vsel %vm772_vm3, %v821_v58, %v823_v35  ;;  %v991_v35 = vrot.slane %v3783_v41, 2 }
 0x1d0   : > { %5017 = vst [vmem:[#allocation42_spill] sm:$0xff] %v3817_v38 }
 0x1d1   : > { %1055 = vrot.lane.b32.xlu0 %v3778_v43, %s2932_s15  ;;  %v3845_v7 = vsel %vm943_vm2, %v991_v35, %v992_v6 }
 0x1d2   : > { %5020 = vst [vmem:[#allocation45_spill] sm:$0xff] %v3845_v7 }
 0x1d3   : > { %v1518_v29 = vpop.permute.xlu0 %1517 }
 0x1d4   : > { %v1894_v55 = vsel %vm1888_vm9, %v1861_v60, %v1518_v29  ;;  %1151 = vrot.lane.b32.xlu2 %v3783_v41, %s2933_s21  ;;  %v569_v60 = vmax.f32 %v514_v31, 0.0  ;;  %v3820_v29 = vsel %vm772_vm3, %v820_v25, %v821_v58  ;;  %v3836_v31 = vsel %vm943_vm2, %v992_v6, %v994_v52 }
 0x1d5   : > { %1057 = vrot.lane.b32.xlu1 %v3790_v48, %s2932_s15  ;;  %v1927_v28 = vsel %vm1921_vm10, %v1894_v55, %v1611_v63  ;;  %v517_v63 = vadd.f32 %v3809_v27, %v516_v23  ;;  %5018 = vst [vmem:[#allocation43_spill] sm:$0xff] %v3820_v29 }
 0x1d6   : > { %v3800_v32 = vpop.permute.xlu2 %1041  ;;  %2654 = vmatmul.msk.f32.gmra.mxu1 %vm1967_vm11, %v1927_v28  ;;  %v644_v58 = vrot.slane %v569_v60, 7  ;;  %5019 = vst [vmem:[#allocation44_spill] sm:$0xff] %v3836_v31 }
 0x1d7   : > { %5015 = vst [vmem:[#allocation40_spill] sm:$0xff] %v3800_v32  ;;  %v3803_v0 = vpop.permute.xlu1 %1231  ;;  %v570_v55 = vmax.f32 %v517_v63, 0.0  ;;  %v522_v63 = vpop.f32.mrf.mxu0 }
 0x1d8   : > { %v523_v32 = vadd.f32 %v3809_v27, %v522_v63  ;;  %v3848_v60 = vsel %vm613_vm1, 0.0, %v644_v58  ;;  %v520_v63 = vadd.f32 %v3809_v27, %v519_v10 }
 0x1d9   : > { %1153 = vrot.lane.b32.xlu0 %v3795_v22, %s2933_s21  ;;  %v645_v25 = vrot.slane %v570_v55, 7 }
 0x1da   : > { %v572_v6 = vmax.f32 %v523_v32, 0.0  ;;  %v571_v12 = vmax.f32 %v520_v63, 0.0 }
 0x1db   : > { %v1331_v40 = vpop.permute.xlu0 %1330  ;;  %v3853_v52 = vsel %vm613_vm1, %v644_v58, %v645_v25  ;;  %v735_v55 = vsel %vm613_vm1, %v645_v25, 0.0  ;;  %v1699_v58 = vsel %vm1693_vm4, %v3268_v57, %v3515_v16 }
 0x1dc   : > { %890 = vrot.lane.b32.xlu2 %v3817_v38, %s2931_s19  ;;  %v828_v15 = vrot.slane %v735_v55, 1  ;;  %v1731_v10 = vsel %vm1725_vm5, %v1699_v58, %v3568_v30  ;;  %v647_v63 = vrot.slane %v571_v12, 7  ;;  %v997_v12 = vrot.slane %v3853_v52, 2 }
 0x1dd   : > { %888 = vrot.lane.b32.xlu1 %v3820_v29, %s2931_s19  ;;  %v1764_v57 = vsel %vm1757_vm6, %v1731_v10, %v3556_v39 }
 0x1de   : > { %v1520_v23 = vpop.permute.xlu2 %1519  ;;  %v1796_v30 = vsel %vm339_vm0, %v1764_v57, %v3701_v61  ;;  %v996_v61 = vrot.slane %v3848_v60, 2  ;;  %v3907_v57 = vsel %vm613_vm1, 0.0, %v647_v63 }
 0x1df   : > { %v3827_v28 = vpop.permute.xlu1 %1131  ;;  %v525_v48 = vpop.f32.mrf.mxu0 }
 0x1e0   : > { %v526_v39 = vadd.f32 %v3809_v27, %v525_v48 }
 0x1e1   : > { %1061 = vrot.lane.b32.xlu0 %v3836_v31, %s2932_s15 }
 0x1e2   : > { %v2081_v38 = vpop.f32.mrf.mxu1 }
 0x1e3   : > { %v2082_v29 = vadd.f32 %v3832_v26, %v2081_v38  ;;  %v3842_v24 = vpop.permute.xlu0 %1428 }
 0x1e4   : > { %1059 = vrot.lane.b32.xlu2 %v3845_v7, %s2932_s15  ;;  %v826_v7 = vrot.slane %v3853_v52, 1 }
 0x1e5   : > { %v2177_v31 = vmax.f32 %v2082_v29, 0.0  ;;  %1155 = vrot.lane.b32.xlu1 %v3848_v60, %s2933_s21  ;;  %v648_v29 = vrot.slane %v572_v6, 7 }
 0x1e6   : > { %v3859_v38 = vpop.permute.xlu2 %1614  ;;  %v3873_v32 = vsel %vm772_vm3, %v826_v7, %v828_v15  ;;  %v999_v15 = vrot.slane %v735_v55, 2 }
 0x1e7   : > { %v1427_v35 = vpop.permute.xlu1 %1426  ;;  %2681 = vmatmul.msk.f32.vlgmr.msra.gmra.mxu2 %vm1693_vm4, %v2177_v31  ;;  %5021 = vst [vmem:[#allocation46_spill] sm:$0xff] %v3873_v32  ;;  %v825_v31 = vrot.slane %v3848_v60, 1  ;;  %v3887_v6 = vsel %vm613_vm1, %v648_v29, 0.0  ;;  %v3900_v55 = vsel %vm613_vm1, %v647_v63, %v648_v29  ;;  %v3915_v29 = vsel %vm943_vm2, %v996_v61, %v997_v12 }
 0x1e8   : > { %v833_v48 = vrot.slane %v3887_v6, 1  ;;  %5023 = vst [vmem:[#allocation48_spill] sm:$0xff] %v3915_v29  ;;  %v831_v63 = vrot.slane %v3900_v55, 1  ;;  %v1700_v61 = vsel %vm1693_vm4, %v3289_v5, %v3550_v36 }
 0x1e9   : > { %1523 = vrot.lane.b32.xlu0 %v3571_v47, %s2938_s11 }
 0x1eb   : > { %v3870_v25 = vpop.permute.xlu0 %868 }
 0x1ec   : > { %1235 = vrot.lane.b32.xlu2 %v3508_v50, %s2934_s23  ;;  %v1829_v50 = vsel %vm1822_vm8, %v1796_v30, %v1331_v40  ;;  %v529_v40 = vadd.f32 %v3809_v27, %v3156_v37  ;;  %v573_v30 = vmax.f32 %v526_v39, 0.0 }
 0x1ed   : > { %894 = vrot.lane.b32.xlu1 %v3873_v32, %s2931_s19  ;;  %v1862_v10 = vsel %vm1855_vm7, %v1829_v50, %v1427_v35  ;;  %v3896_v32 = vsel %vm772_vm3, %v825_v31, %v826_v7  ;;  %v3911_v7 = vsel %vm943_vm2, %v997_v12, %v999_v15  ;;  %v830_v12 = vrot.slane %v3907_v57, 1 }
 0x1ee   : > { %v3884_v16 = vpop.permute.xlu2 %1430  ;;  %5022 = vst [vmem:[#allocation47_spill] sm:$0xff] %v3911_v7  ;;  %v1895_v31 = vsel %vm1888_vm9, %v1862_v10, %v1520_v23  ;;  %v574_v15 = vmax.f32 %v529_v40, 0.0  ;;  %v650_v10 = vrot.slane %v573_v30, 7  ;;  %v1732_v40 = vsel %vm1725_vm5, %v1700_v61, %v3586_v21 }
 0x1ef   : > { %v3890_v58 = vpop.permute.xlu1 %870  ;;  %v1765_v27 = vsel %vm1757_vm6, %v1732_v40, %v3721_v33  ;;  %v3947_v36 = vsel %vm772_vm3, %v830_v12, %v831_v63  ;;  %v1001_v21 = vrot.slane %v3907_v57, 2  ;;  %v1002_v33 = vrot.slane %v3900_v55, 2 }
 0x1f0   : > { %5024 = vst [vmem:[#allocation49_spill] sm:$0xff] %v3947_v36  ;;  %v1004_v61 = vrot.slane %v3887_v6, 2  ;;  %v3983_v6 = vsel %vm613_vm1, 0.0, %v650_v10 }
 0x1f1   : > { %892 = vrot.lane.b32.xlu0 %v3896_v32, %s2931_s19  ;;  %v3970_v40 = vsel %vm943_vm2, %v1001_v21, %v1002_v33 }
 0x1f2   : > { %5025 = vst [vmem:[#allocation50_spill] sm:$0xff] %v3970_v40 }
 0x1f3   : > { %v1613_v35 = vpop.permute.xlu0 %1612 }
 0x1f4   : > { %1065 = vrot.lane.b32.xlu2 %v3911_v7, %s2932_s15  ;;  %v1928_v37 = vsel %vm1921_vm10, %v1895_v31, %v1613_v35  ;;  %v3934_v31 = vsel %vm772_vm3, %v831_v63, %v833_v48  ;;  %v1797_v7 = vsel %vm339_vm0, %v1765_v27, %v3803_v0 }
 0x1f5   : > { %1063 = vrot.lane.b32.xlu1 %v3915_v29, %s2932_s15  ;;  %2655 = vmatmul.msk.f32.gmra.mxu1 %vm1967_vm11, %v1928_v37  ;;  %v651_v37 = vrot.slane %v574_v15, 7  ;;  %v1830_v27 = vsel %vm1822_vm8, %v1797_v7, %v3739_v44 }
 0x1f6   : > { %v3924_v50 = vpop.permute.xlu2 %872  ;;  %v1863_v15 = vsel %vm1855_vm7, %v1830_v27, %v3842_v24 }
 0x1f7   : > { %v3926_v23 = vpop.permute.xlu1 %1039  ;;  %v2084_v39 = vpop.f32.mrf.mxu1  ;;  %v3950_v48 = vsel %vm613_vm1, %v650_v10, %v651_v37  ;;  %v737_v0 = vsel %vm613_vm1, %v651_v37, 0.0  ;;  %v3986_v37 = vsel %vm943_vm2, %v1002_v33, %v1004_v61  ;;  %v835_v33 = vrot.slane %v3983_v6, 1 }
 0x1f8   : > { %v2085_v35 = vadd.f32 %v3832_v26, %v2084_v39  ;;  %v836_v12 = vrot.slane %v3950_v48, 1  ;;  %v1007_v21 = vrot.slane %v3950_v48, 2 }
 0x1f9   : > { %898 = vrot.lane.b32.xlu0 %v3934_v31, %s2931_s19 }
 0x1fa   : > { %v2178_v30 = vmax.f32 %v2085_v35, 0.0 }
 0x1fb   : > { %v3944_v5 = vpop.permute.xlu0 %1233 }
 0x1fc   : > { %2682 = vmatmul.msk.f32.gmra.mxu2 %vm1693_vm4, %v2178_v30  ;;  %896 = vrot.lane.b32.xlu2 %v3947_v36, %s2931_s19  ;;  %v838_v30 = vrot.slane %v737_v0, 1 }
 0x1fd   : > { %1616 = vrot.lane.b32.xlu1 %v3591_v4, %s5001_s18 }
 0x1fe   : > { %v3962_v63 = vpop.permute.xlu2 %1139  ;;  %v3980_v7 = vsel %vm772_vm3, %v836_v12, %v838_v30 }
 0x1ff   : > { %v1522_v39 = vpop.permute.xlu1 %1521 }
 0x200   : > { %v1896_v35 = vsel %vm1888_vm9, %v1863_v15, %v1522_v39  ;;  %v1006_v39 = vrot.slane %v3983_v6, 2 }
 0x201   : > { %1067 = vrot.lane.b32.xlu0 %v3970_v40, %s2932_s15  ;;  %v1929_v44 = vsel %vm1921_vm10, %v1896_v35, %v3859_v38  ;;  %v1009_v38 = vrot.slane %v737_v0, 2  ;;  %v4010_v0 = vsel %vm772_vm3, %v835_v33, %v836_v12 }
 0x202   : > { %2656 = vmatmul.msk.f32.gmra.mxu1 %vm1967_vm11, %v1929_v44  ;;  %v4007_v35 = vsel %vm943_vm2, %v1006_v39, %v1007_v21 }
 0x203   : > { %v3977_v24 = vpop.permute.xlu0 %1135  ;;  %v3999_v10 = vsel %vm943_vm2, %v1007_v21, %v1009_v38 }
 0x204   : > { %902 = vrot.lane.b32.xlu2 %v3980_v7, %s2931_s19 }
 0x205   : > { %1069 = vrot.lane.b32.xlu1 %v3986_v37, %s2932_s15 }
 0x206   : > { %v3993_v27 = vpop.permute.xlu2 %878 }
 0x207   : > { %5026 = vst [vmem:[#allocation51_spill] sm:$0xff] %v3993_v27  ;;  %v3995_v15 = vpop.permute.xlu1 %1334 }
 0x209   : > { %1073 = vrot.lane.b32.xlu0 %v3999_v10, %s2932_s15 }
 0x20b   : > { %v4004_v61 = vpop.permute.xlu0 %874 }
 0x20c   : > { %1071 = vrot.lane.b32.xlu2 %v4007_v35, %s2932_s15  ;;  %s2532_s15 = sshll.u32 %s4189_s17, 4  ;;  %s2533_s15 = int_to_ptr.vmem [resolvable:$true] %s2532_s15 }
 0x20d   : > { %900 = vrot.lane.b32.xlu1 %v4010_v0, %s2931_s19 }
 0x20e   : > { %v4016_v30 = vpop.permute.xlu2 %1047 }
 0x20f   : > { %5027 = vst [vmem:[#allocation52_spill] sm:$0xff] %v4016_v30  ;;  %v4018_v44 = vpop.permute.xlu1 %1137 }
 0x211   : > { %1336 = vrot.lane.b32.xlu0 %v3505_v45, %s2935_s29 }
 0x213   : > { %v4022_v38 = vpop.permute.xlu0 %1043 }
 0x214   : > { %1525 = vrot.lane.b32.xlu2 %v3564_v20, %s2938_s11 }
 0x215   : > { %1432 = vrot.lane.b32.xlu1 %v3545_v49, %s2936_s8 }
 0x216   : > { %v4028_v12 = vpop.permute.xlu2 %1145 }
 0x217   : > { %5028 = vst [vmem:[#allocation53_spill] sm:$0xff] %v4028_v12  ;;  %v4030_v21 = vpop.permute.xlu1 %1045 }
 0x219   : > { %1618 = vrot.lane.b32.xlu0 %v3605_v1, %s5001_s18 }
 0x21b   : > { %v4034_v39 = vpop.permute.xlu0 %1141 }
 0x21c   : > { %1338 = vrot.lane.b32.xlu2 %v3591_v4, %s2935_s29 }
 0x21d   : > { %1237 = vrot.lane.b32.xlu1 %v3571_v47, %s2934_s23 }
 0x21e   : > { %v4040_v45 = vpop.permute.xlu2 %1053 }
 0x21f   : > { %5029 = vst [vmem:[#allocation54_spill] sm:$0xff] %v4040_v45  ;;  %v4042_v33 = vpop.permute.xlu1 %876 }
 0x221   : > { %1434 = vrot.lane.b32.xlu0 %v3600_v3, %s2936_s8 }
 0x223   : > { %v4046_v40 = vpop.permute.xlu0 %1049 }
 0x224   : > { %5030 = vst [vmem:[#allocation55_spill] sm:$0xff] %v4046_v40  ;;  %1620 = vrot.lane.b32.xlu2 %v3674_v34, %s5001_s18 }
 0x225   : > { %1527 = vrot.lane.b32.xlu1 %v3644_v51, %s2938_s11 }
 0x226   : > { %v2087_v36 = vpop.f32.mrf.mxu1  ;;  %v885_v4 = vpop.permute.xlu2 %884 }
 0x227   : > { %v2088_v12 = vadd.f32 %v3832_v26, %v2087_v36  ;;  %v4053_v47 = vpop.permute.xlu1 %1143 }
 0x229   : > { %v2179_v45 = vmax.f32 %v2088_v12, 0.0  ;;  %1239 = vrot.lane.b32.xlu0 %v3564_v20, %s2934_s23 }
 0x22b   : > { %2683 = vmatmul.msk.f32.gmra.mxu2 %vm1693_vm4, %v2179_v45  ;;  %v4058_v27 = vpop.permute.xlu0 %880 }
 0x22c   : > { %5031 = vst [vmem:[#allocation56_spill] sm:$0xff] %v4058_v27  ;;  %1436 = vrot.lane.b32.xlu2 %v3610_v14, %s2936_s8 }
 0x22d   : > { %1340 = vrot.lane.b32.xlu1 %v3605_v1, %s2935_s29 }
 0x22e   : > { %v2090_v40 = vpop.f32.mrf.mxu1  ;;  %v1152_v29 = vpop.permute.xlu2 %1151 }
 0x22f   : > { %v2091_v36 = vadd.f32 %v3832_v26, %v2090_v40  ;;  %v4065_v30 = vpop.permute.xlu1 %882 }
 0x230   : > { %5032 = vst [vmem:[#allocation57_spill] sm:$0xff] %v4065_v30 }
 0x231   : > { %v2180_v12 = vmax.f32 %v2091_v36, 0.0  ;;  %1529 = vrot.lane.b32.xlu0 %v3639_v9, %s2938_s11 }
 0x233   : > { %2684 = vmatmul.msk.f32.gmra.mxu2 %vm1693_vm4, %v2180_v12  ;;  %v4070_v20 = vpop.permute.xlu0 %1147 }
 0x234   : > { %5033 = vst [vmem:[#allocation58_spill] sm:$0xff] %v4070_v20  ;;  %1241 = vrot.lane.b32.xlu2 %v3644_v51, %s2934_s23  ;;  %v1711_v51 = vsel %vm1693_vm4, %v3699_v13, %v885_v4 }
 0x235   : > { %1622 = vrot.lane.b32.xlu1 %v3658_v59, %s5001_s18 }
 0x236   : > { %v891_v1 = vpop.permute.xlu2 %890 }
 0x237   : > { %v4076_v45 = vpop.permute.xlu1 %1051 }
 0x238   : > { %5034 = vst [vmem:[#allocation59_spill] sm:$0xff] %v4076_v45 }
 0x239   : > { %1342 = vrot.lane.b32.xlu0 %v3674_v34, %s2935_s29 }
 0x23b   : > { %v887_v40 = vpop.permute.xlu0 %886 }
 0x23c   : > { %1531 = vrot.lane.b32.xlu2 %v3687_v53, %s2938_s11 }
 0x23d   : > { %1438 = vrot.lane.b32.xlu1 %v3661_v42, %s2936_s8 }
 0x23e   : > { %v1060_v36 = vpop.permute.xlu2 %1059 }
 0x23f   : > { %v4084_v12 = vpop.permute.xlu1 %1149 }
 0x240   : > { %5035 = vst [vmem:[#allocation60_spill] sm:$0xff] %v4084_v12 }
 0x241   : > { %1624 = vrot.lane.b32.xlu0 %v3727_v46, %s5001_s18 }
 0x243   : > { %v1056_v30 = vpop.permute.xlu0 %1055 }
 0x244   : > { %v1743_v20 = vsel %vm1725_vm5, %v1711_v51, %v1056_v30  ;;  %1344 = vrot.lane.b32.xlu2 %v3658_v59, %s2935_s29  ;;  %v1712_v30 = vsel %vm1693_vm4, %v3711_v18, %v887_v40  ;;  %v1714_v40 = vsel %vm1693_vm4, %v3795_v22, %v891_v1 }
 0x245   : > { %1243 = vrot.lane.b32.xlu1 %v3639_v9, %s2934_s23  ;;  %v4096_v34 = vsel %vm1757_vm6, %v1743_v20, %v1152_v29 }
 0x246   : > { %v4098_v12 = vpop.permute.xlu2 %1235 }
 0x247   : > { %v1058_v45 = vpop.permute.xlu1 %1057  ;;  %v2093_v42 = vpop.f32.mrf.mxu1 }
 0x248   : > { %v2094_v27 = vadd.f32 %v3832_v26, %v2093_v42  ;;  %v1744_v4 = vsel %vm1725_vm5, %v1712_v30, %v1058_v45  ;;  %v329_v42 = vld [vmem:[%s3072_s16 + $0xf0] sm:$0xff] }
 0x249   : > { %1440 = vrot.lane.b32.xlu0 %v3664_v54, %s2936_s8  ;;  %2647 = vmatmul.msk.f32.gmra.mxu3 %vm339_vm0, %v329_v42  ;;  %v330_v42 = vld [vmem:[%s3072_s16 + $0xf8] sm:$0xff] }
 0x24a   : > { %v2181_v59 = vmax.f32 %v2094_v27, 0.0 }
 0x24b   : > { %v1154_v51 = vpop.permute.xlu0 %1153 }
 0x24c   : > { %2685 = vmatmul.msk.f32.gmra.mxu2 %vm1693_vm4, %v2181_v59  ;;  %v4108_v9 = vsel %vm1757_vm6, %v1744_v4, %v1154_v51  ;;  %1626 = vrot.lane.b32.xlu2 %v3724_v2, %s5001_s18 }
 0x24d   : > { %1533 = vrot.lane.b32.xlu1 %v3692_v19, %s2938_s11 }
 0x24e   : > { %v1066_v29 = vpop.permute.xlu2 %1065 }
 0x24f   : > { %v889_v27 = vpop.permute.xlu1 %888 }
 0x250   : > { %v1713_v20 = vsel %vm1693_vm4, %v3783_v41, %v889_v27 }
 0x251   : > { %1245 = vrot.lane.b32.xlu0 %v3687_v53, %s2934_s23  ;;  %v1745_v45 = vsel %vm1725_vm5, %v1713_v20, %v1060_v36  ;;  %2648 = vmatmul.msk.f32.gmra.mxu3 %vm339_vm0, %v330_v42 }
 0x253   : > { %v2096_v30 = vpop.f32.mrf.mxu1  ;;  %v1062_v59 = vpop.permute.xlu0 %1061 }
 0x254   : > { %v2097_v4 = vadd.f32 %v3832_v26, %v2096_v30  ;;  %v4125_v51 = vsel %vm1725_vm5, %v1714_v40, %v1062_v59  ;;  %1442 = vrot.lane.b32.xlu2 %v3699_v13, %s2936_s8 }
 0x255   : > { %1346 = vrot.lane.b32.xlu1 %v3727_v46, %s2935_s29 }
 0x256   : > { %v2182_v53 = vmax.f32 %v2097_v4, 0.0  ;;  %v897_v27 = vpop.permute.xlu2 %896 }
 0x257   : > { %v1156_v36 = vpop.permute.xlu1 %1155 }
 0x258   : > { %v4134_v1 = vsel %vm1757_vm6, %v1745_v45, %v1156_v36  ;;  %2686 = vmatmul.msk.f32.gmra.mxu2 %vm1693_vm4, %v2182_v53 }
 0x259   : > { %1535 = vrot.lane.b32.xlu0 %v3756_v8, %s2938_s11 }
 0x25b   : > { %v1524_v20 = vpop.permute.xlu0 %1523 }
 0x25c   : > { %1247 = vrot.lane.b32.xlu2 %v3692_v19, %s2934_s23  ;;  %v1701_v19 = vsel %vm1693_vm4, %v3362_v56, %v3703_v11 }
 0x25d   : > { %1628 = vrot.lane.b32.xlu1 %v3778_v43, %s5001_s18  ;;  %v1733_v53 = vsel %vm1725_vm5, %v1701_v19, %v3651_v62 }
 0x25e   : > { %v903_v13 = vpop.permute.xlu2 %902  ;;  %v1766_v11 = vsel %vm1757_vm6, %v1733_v53, %v3827_v28 }
 0x25f   : > { %v895_v46 = vpop.permute.xlu1 %894  ;;  %v1798_v56 = vsel %vm339_vm0, %v1766_v11, %v3944_v5 }
 0x260   : > { %v1716_v40 = vsel %vm1693_vm4, %v3853_v52, %v895_v46  ;;  %v1831_v46 = vsel %vm1822_vm8, %v1798_v56, %v3995_v15 }
 0x261   : > { %1161 = vrot.lane.b32.xlu0 %v3900_v55, %s2933_s21  ;;  %v4148_v45 = vsel %vm1725_vm5, %v1716_v40, %v1066_v29  ;;  %v4162_v29 = vld [vmem:[%s4918_s6] ss:$0 sm:$0xff] }
 0x263   : > { %v893_v30 = vpop.permute.xlu0 %892 }
 0x264   : > { %1263 = vrot.lane.b32.xlu2 %v3934_v31, %s2934_s23  ;;  %v1715_v4 = vsel %vm1693_vm4, %v3848_v60, %v893_v30  ;;  %v2796_v30 = vld [vmem:[%s3072_s16] sm:$0xff] }
 0x265   : > { %1348 = vrot.lane.b32.xlu1 %v3724_v2, %s2935_s29 }
 0x266   : > { %v1072_v59 = vpop.permute.xlu2 %1071 }
 0x267   : > { %v1064_v42 = vpop.permute.xlu1 %1063 }
 0x268   : > { %v4167_v36 = vsel %vm1725_vm5, %v1715_v4, %v1064_v42 }
 0x269   : > { %5036 = vst [vmem:[#allocation61_spill] sm:$0xff] %v4167_v36  ;;  %1444 = vrot.lane.b32.xlu0 %v3711_v18, %s2936_s8  ;;  %v1864_v18 = vsel %vm1855_vm7, %v1831_v46, %v3884_v16  ;;  %v1717_v16 = vsel %vm1693_vm4, %v3907_v57, %v897_v27  ;;  %v5038_v46 = vld [vmem:[#allocation39_spill] sm:$0xff]  ;;  %v5041_v36 = vld [vmem:[#allocation37_spill] sm:$0xff] }
 0x26a   : > { %v2327_v2 = vpop.f32.mrf.mxu2  ;;  %v1897_v5 = vsel %vm1888_vm9, %v1864_v18, %v1524_v20  ;;  %v1720_v18 = vsel %vm1693_vm4, %v3950_v48, %v903_v13 }
 0x26b   : > { %v2328_v40 = vadd.f32 %v4162_v29, %v2327_v2  ;;  %v899_v62 = vpop.permute.xlu0 %898 }
 0x26c   : > { %1537 = vrot.lane.b32.xlu2 %v3747_v17, %s2938_s11 }
 0x26d   : > { %v2423_v19 = vadd.f32 %v2796_v30, %v2328_v40  ;;  %1364 = vrot.lane.b32.xlu1 %v3986_v37, %s2935_s29  ;;  %v1718_v30 = vsel %vm1693_vm4, %v3900_v55, %v899_v62 }
 0x26e   : > { %v1526_v28 = vpop.permute.xlu2 %1525 }
 0x26f   : > { %v2455_v4 = vmax.f32 %v2423_v19, 0.0  ;;  %v1617_v42 = vpop.permute.xlu1 %1616 }
 0x270   : > { %v1930_v15 = vsel %vm1921_vm10, %v1897_v5, %v1617_v42 }
 0x271   : > { %2487 = vst.msk [vmem:[%s4189_s17] sm:$0xff] %vm339_vm0, %v2455_v4  ;;  %2657 = vmatmul.msk.f32.gmra.mxu1 %vm1967_vm11, %v1930_v15  ;;  %1460 = vrot.lane.b32.xlu0 %v3950_v48, %s2936_s8 }
 0x272   : > { %v2099_v53 = vpop.f32.mrf.mxu1 }
 0x273   : > { %v2100_v20 = vadd.f32 %v3832_v26, %v2099_v53  ;;  %v1068_v11 = vpop.permute.xlu0 %1067 }
 0x274   : > { %v4200_v56 = vsel %vm1725_vm5, %v1717_v16, %v1068_v11  ;;  %1553 = vrot.lane.b32.xlu2 %v3980_v7, %s2938_s11 }
 0x275   : > { %v2183_v2 = vmax.f32 %v2100_v20, 0.0  ;;  %1630 = vrot.lane.b32.xlu1 %v5038_v46, %s5001_s18 }
 0x276   : > { %v1339_v40 = vpop.permute.xlu2 %1338 }
 0x277   : > { %v1070_v19 = vpop.permute.xlu1 %1069  ;;  %2687 = vmatmul.msk.f32.gmra.mxu2 %vm1693_vm4, %v2183_v2 }
 0x278   : > { %v4210_v27 = vsel %vm1725_vm5, %v1718_v30, %v1070_v19  ;;  %v5040_v30 = vld [vmem:[#allocation24_spill] sm:$0xff] }
 0x279   : > { %1646 = vrot.lane.b32.xlu0 %v3999_v10, %s5001_s18 }
 0x27b   : > { %v1074_v5 = vpop.permute.xlu0 %1073 }
 0x27c   : > { %v4217_v4 = vsel %vm1725_vm5, %v1720_v18, %v1074_v5  ;;  %1163 = vrot.lane.b32.xlu2 %v3983_v6, %s2933_s21  ;;  %v2797_v18 = vld [vmem:[%s3072_s16 + $0x8] sm:$0xff] }
 0x27d   : > { %1249 = vrot.lane.b32.xlu1 %v3756_v8, %s2934_s23  ;;  %v5039_v8 = vld [vmem:[#allocation35_spill] sm:$0xff] }
 0x27e   : > { %v1621_v62 = vpop.permute.xlu2 %1620  ;;  %v1702_v19 = vsel %vm1693_vm4, %v5040_v30, %v5039_v8  ;;  %v5043_v30 = vld [vmem:[#allocation12_spill] sm:$0xff] }
 0x27f   : > { %v901_v42 = vpop.permute.xlu1 %900  ;;  %v2102_v15 = vpop.f32.mrf.mxu1 }
 0x280   : > { %v1719_v53 = vsel %vm1693_vm4, %v3983_v6, %v901_v42  ;;  %v2103_v16 = vadd.f32 %v3832_v26, %v2102_v15  ;;  %v2330_v13 = vpop.f32.mrf.mxu2  ;;  %v1734_v15 = vsel %vm1725_vm5, %v1702_v19, %v5041_v36 }
 0x281   : > { %v2331_v20 = vadd.f32 %v4162_v29, %v2330_v13  ;;  %1350 = vrot.lane.b32.xlu0 %v3778_v43, %s2935_s29  ;;  %v4230_v11 = vsel %vm1725_vm5, %v1719_v53, %v1072_v59  ;;  %v5042_v43 = vld [vmem:[#allocation38_spill] sm:$0xff] }
 0x282   : > { %v2184_v2 = vmax.f32 %v2103_v16, 0.0  ;;  %v1767_v59 = vsel %vm1757_vm6, %v1734_v15, %v5042_v43 }
 0x283   : > { %v2424_v5 = vadd.f32 %v2797_v18, %v2331_v20  ;;  %v1337_v42 = vpop.permute.xlu0 %1336  ;;  %v1799_v16 = vsel %vm339_vm0, %v1767_v59, %v4098_v12  ;;  %v5044_v12 = vld [vmem:[#allocation43_spill] sm:$0xff] }
 0x284   : > { %2688 = vmatmul.msk.f32.gmra.mxu2 %vm1693_vm4, %v2184_v2  ;;  %1446 = vrot.lane.b32.xlu2 %v3783_v41, %s2936_s8  ;;  %v1832_v36 = vsel %vm1822_vm8, %v1799_v16, %v1337_v42  ;;  %v5045_v42 = vld [vmem:[#allocation28_spill] sm:$0xff] }
 0x285   : > { %v2456_v53 = vmax.f32 %v2424_v5, 0.0  ;;  %1265 = vrot.lane.b32.xlu1 %v4010_v0, %s2934_s23  ;;  %v1703_v15 = vsel %vm1693_vm4, %v5045_v42, %v3870_v25 }
 0x286   : > { %v1437_v13 = vpop.permute.xlu2 %1436  ;;  %v1735_v43 = vsel %vm1725_vm5, %v1703_v15, %v3926_v23 }
 0x287   : > { %2488 = vst.msk [vmem:[%s4189_s17 + $0x8] sm:$0xff] %vm339_vm0, %v2456_v53  ;;  %v1433_v20 = vpop.permute.xlu1 %1432  ;;  %v1768_v59 = vsel %vm1757_vm6, %v1735_v43, %v3977_v24  ;;  %v5050_v43 = vld [vmem:[#allocation40_spill] sm:$0xff] }
 0x288   : > { %v1865_v2 = vsel %vm1855_vm7, %v1832_v36, %v1433_v20  ;;  %v5047_v36 = vld [vmem:[#allocation16_spill] sm:$0xff]  ;;  %v5048_v20 = vld [vmem:[#allocation15_spill] sm:$0xff] }
 0x289   : > { %1366 = vrot.lane.b32.xlu0 %v4007_v35, %s2935_s29  ;;  %v1898_v8 = vsel %vm1888_vm9, %v1865_v2, %v1526_v28  ;;  %v5046_v28 = vld [vmem:[#allocation45_spill] sm:$0xff] }
 0x28b   : > { %v1619_v41 = vpop.permute.xlu0 %1618 }
 0x28c   : > { %1462 = vrot.lane.b32.xlu2 %v5043_v30, %s2936_s8  ;;  %v1931_v19 = vsel %vm1921_vm10, %v1898_v8, %v1619_v41 }
 0x28d   : > { %1539 = vrot.lane.b32.xlu1 %v5044_v12, %s2938_s11  ;;  %2658 = vmatmul.msk.f32.gmra.mxu1 %vm1967_vm11, %v1931_v19 }
 0x28e   : > { %v1242_v18 = vpop.permute.xlu2 %1241 }
 0x28f   : > { %v1238_v5 = vpop.permute.xlu1 %1237 }
 0x290   : > { %v1800_v53 = vsel %vm339_vm0, %v1768_v59, %v1238_v5  ;;  %v5049_v5 = vld [vmem:[#allocation29_spill] sm:$0xff] }
 0x291   : > { %1632 = vrot.lane.b32.xlu0 %v5046_v28, %s5001_s18  ;;  %v1833_v25 = vsel %vm1822_vm8, %v1800_v53, %v1339_v40  ;;  %v1704_v40 = vsel %vm1693_vm4, %v5049_v5, %v3890_v58 }
 0x293   : > { %v1435_v16 = vpop.permute.xlu0 %1434 }
 0x294   : > { %1648 = vrot.lane.b32.xlu2 %v5047_v36, %s5001_s18  ;;  %v1866_v23 = vsel %vm1855_vm7, %v1833_v25, %v1435_v16 }
 0x295   : > { %1555 = vrot.lane.b32.xlu1 %v5048_v20, %s2938_s11 }
 0x296   : > { %v1532_v2 = vpop.permute.xlu2 %1531 }
 0x297   : > { %v1528_v41 = vpop.permute.xlu1 %1527 }
 0x298   : > { %v1899_v8 = vsel %vm1888_vm9, %v1866_v23, %v1528_v41  ;;  %v5053_v41 = vld [vmem:[#allocation44_spill] sm:$0xff] }
 0x299   : > { %1251 = vrot.lane.b32.xlu0 %v3747_v17, %s2934_s23  ;;  %v1932_v24 = vsel %vm1921_vm10, %v1899_v8, %v1621_v62  ;;  %v1736_v17 = vsel %vm1725_vm5, %v1704_v40, %v5050_v43 }
 0x29a   : > { %2659 = vmatmul.msk.f32.gmra.mxu1 %vm1967_vm11, %v1932_v24  ;;  %v1769_v62 = vsel %vm1757_vm6, %v1736_v17, %v4018_v44  ;;  %v5054_v24 = vld [vmem:[#allocation11_spill] sm:$0xff] }
 0x29b   : > { %v1240_v19 = vpop.permute.xlu0 %1239  ;;  %v2798_v17 = vld [vmem:[%s3072_s16 + $0x10] sm:$0xff] }
 0x29c   : > { %1352 = vrot.lane.b32.xlu2 %v5038_v46, %s2935_s29  ;;  %v1801_v46 = vsel %vm339_vm0, %v1769_v62, %v1240_v19 }
 0x29d   : > { %1165 = vrot.lane.b32.xlu1 %v3950_v48, %s2933_s21 }
 0x29e   : > { %v1345_v42 = vpop.permute.xlu2 %1344 }
 0x29f   : > { %v1341_v15 = vpop.permute.xlu1 %1340 }
 0x2a0   : > { %v1834_v59 = vsel %vm1822_vm8, %v1801_v46, %v1341_v15  ;;  %v5055_v46 = vld [vmem:[#allocation14_spill] sm:$0xff] }
 0x2a1   : > { %1267 = vrot.lane.b32.xlu0 %v3980_v7, %s2934_s23  ;;  %v1867_v58 = vsel %vm1855_vm7, %v1834_v59, %v1437_v13  ;;  %v5051_v7 = vld [vmem:[#allocation33_spill] sm:$0xff] }
 0x2a2   : > { %v1705_v23 = vsel %vm1693_vm4, %v5051_v7, %v3924_v50 }
 0x2a3   : > { %v1530_v53 = vpop.permute.xlu0 %1529 }
 0x2a4   : > { %1368 = vrot.lane.b32.xlu2 %v3999_v10, %s2935_s29  ;;  %v1900_v16 = vsel %vm1888_vm9, %v1867_v58, %v1530_v53  ;;  %v5052_v10 = vld [vmem:[#allocation42_spill] sm:$0xff]  ;;  %v5056_v58 = vld [vmem:[#allocation13_spill] sm:$0xff] }
 0x2a5   : > { %1448 = vrot.lane.b32.xlu1 %v3795_v22, %s2936_s8  ;;  %v1737_v22 = vsel %vm1725_vm5, %v1705_v23, %v4022_v38  ;;  %v2799_v23 = vld [vmem:[%s3072_s16 + $0x18] sm:$0xff] }
 0x2a6   : > { %v1627_v48 = vpop.permute.xlu2 %1626  ;;  %v1770_v8 = vsel %vm1757_vm6, %v1737_v22, %v3962_v63 }
 0x2a7   : > { %v1623_v44 = vpop.permute.xlu1 %1622  ;;  %v1802_v50 = vsel %vm339_vm0, %v1770_v8, %v1242_v18 }
 0x2a8   : > { %v1933_v25 = vsel %vm1921_vm10, %v1900_v16, %v1623_v44 }
 0x2a9   : > { %2660 = vmatmul.msk.f32.gmra.mxu1 %vm1967_vm11, %v1933_v25  ;;  %1541 = vrot.lane.b32.xlu0 %v5052_v10, %s2938_s11 }
 0x2ab   : > { %v1343_v13 = vpop.permute.xlu0 %1342 }
 0x2ac   : > { %1634 = vrot.lane.b32.xlu2 %v5053_v41, %s5001_s18  ;;  %v1835_v40 = vsel %vm1822_vm8, %v1802_v50, %v1343_v13 }
 0x2ad   : > { %1464 = vrot.lane.b32.xlu1 %v5054_v24, %s2936_s8 }
 0x2ae   : > { %v2333_v19 = vpop.f32.mrf.mxu2  ;;  %v1443_v5 = vpop.permute.xlu2 %1442 }
 0x2af   : > { %v2334_v15 = vadd.f32 %v4162_v29, %v2333_v19  ;;  %v1439_v38 = vpop.permute.xlu1 %1438 }
 0x2b0   : > { %v1868_v43 = vsel %vm1855_vm7, %v1835_v40, %v1439_v38 }
 0x2b1   : > { %v2425_v62 = vadd.f32 %v2798_v17, %v2334_v15  ;;  %1557 = vrot.lane.b32.xlu0 %v5055_v46, %s2938_s11  ;;  %v1901_v53 = vsel %vm1888_vm9, %v1868_v43, %v1532_v2  ;;  %v5057_v43 = vld [vmem:[#allocation52_spill] sm:$0xff]  ;;  %v5058_v17 = vld [vmem:[#allocation19_spill] sm:$0xff] }
 0x2b3   : > { %v2457_v63 = vmax.f32 %v2425_v62, 0.0  ;;  %v1625_v59 = vpop.permute.xlu0 %1624 }
 0x2b4   : > { %1253 = vrot.lane.b32.xlu2 %v5044_v12, %s2934_s23  ;;  %v1934_v18 = vsel %vm1921_vm10, %v1901_v53, %v1625_v59  ;;  %v1706_v12 = vsel %vm1693_vm4, %v3545_v49, %v4004_v61 }
 0x2b5   : > { %2489 = vst.msk [vmem:[%s4189_s17 + $0x10] sm:$0xff] %vm339_vm0, %v2457_v63  ;;  %1650 = vrot.lane.b32.xlu1 %v5056_v58, %s5001_s18  ;;  %2661 = vmatmul.msk.f32.gmra.mxu1 %vm1967_vm11, %v1934_v18  ;;  %v1738_v2 = vsel %vm1725_vm5, %v1706_v12, %v4030_v21  ;;  %v5061_v12 = vld [vmem:[#allocation20_spill] sm:$0xff] }
 0x2b6   : > { %v2336_v16 = vpop.f32.mrf.mxu2  ;;  %v4333_v44 = vpop.permute.xlu2 %1247  ;;  %v1771_v13 = vsel %vm1757_vm6, %v1738_v2, %v4034_v39  ;;  %v2800_v2 = vld [vmem:[%s3072_s16 + $0x20] sm:$0xff] }
 0x2b7   : > { %v2337_v25 = vadd.f32 %v4162_v29, %v2336_v16  ;;  %v1244_v7 = vpop.permute.xlu1 %1243 }
 0x2b8   : > { %v1803_v50 = vsel %vm339_vm0, %v1771_v13, %v1244_v7 }
 0x2b9   : > { %v2426_v22 = vadd.f32 %v2799_v23, %v2337_v25  ;;  %1167 = vrot.lane.b32.xlu0 %v5043_v30, %s2933_s21  ;;  %v1836_v49 = vsel %vm1822_vm8, %v1803_v50, %v1345_v42 }
 0x2bb   : > { %v2458_v8 = vmax.f32 %v2426_v22, 0.0  ;;  %v1441_v19 = vpop.permute.xlu0 %1440 }
 0x2bc   : > { %1269 = vrot.lane.b32.xlu2 %v5048_v20, %s2934_s23  ;;  %v1869_v21 = vsel %vm1855_vm7, %v1836_v49, %v1441_v19 }
 0x2bd   : > { %2490 = vst.msk [vmem:[%s4189_s17 + $0x18] sm:$0xff] %vm339_vm0, %v2458_v8  ;;  %1354 = vrot.lane.b32.xlu1 %v5046_v28, %s2935_s29  ;;  %v1707_v28 = vsel %vm1693_vm4, %v3600_v3, %v4042_v33  ;;  %v5059_v33 = vld [vmem:[#allocation21_spill] sm:$0xff] }
 0x2be   : > { %v4354_v61 = vpop.permute.xlu2 %1263 }
 0x2bf   : > { %v1534_v40 = vpop.permute.xlu1 %1533 }
 0x2c0   : > { %v1902_v39 = vsel %vm1888_vm9, %v1869_v21, %v1534_v40  ;;  %v5062_v21 = vld [vmem:[#allocation51_spill] sm:$0xff] }
 0x2c1   : > { %1450 = vrot.lane.b32.xlu0 %v3848_v60, %s2936_s8  ;;  %v1935_v15 = vsel %vm1921_vm10, %v1902_v39, %v1627_v48  ;;  %v1739_v60 = vsel %vm1725_vm5, %v1707_v28, %v5057_v43  ;;  %v5063_v40 = vld [vmem:[#allocation55_spill] sm:$0xff]  ;;  %v5064_v43 = vld [vmem:[#allocation53_spill] sm:$0xff] }
 0x2c2   : > { %2662 = vmatmul.msk.f32.gmra.mxu1 %vm1967_vm11, %v1935_v15  ;;  %v1772_v48 = vsel %vm1757_vm6, %v1739_v60, %v4053_v47  ;;  %v2801_v15 = vld [vmem:[%s3072_s16 + $0x28] sm:$0xff] }
 0x2c3   : > { %v1246_v20 = vpop.permute.xlu0 %1245 }
 0x2c4   : > { %1543 = vrot.lane.b32.xlu2 %v3896_v32, %s2938_s11  ;;  %v1804_v62 = vsel %vm339_vm0, %v1772_v48, %v1246_v20 }
 0x2c5   : > { %1370 = vrot.lane.b32.xlu1 %v5047_v36, %s2935_s29  ;;  %v5060_v36 = vld [vmem:[#allocation48_spill] sm:$0xff] }
 0x2c6   : > { %v1538_v42 = vpop.permute.xlu2 %1537 }
 0x2c7   : > { %v1347_v38 = vpop.permute.xlu1 %1346 }
 0x2c8   : > { %v1837_v63 = vsel %vm1822_vm8, %v1804_v62, %v1347_v38 }
 0x2c9   : > { %1466 = vrot.lane.b32.xlu0 %v5058_v17, %s2936_s8  ;;  %v1870_v59 = vsel %vm1855_vm7, %v1837_v63, %v1443_v5 }
 0x2cb   : > { %v1536_v3 = vpop.permute.xlu0 %1535 }
 0x2cc   : > { %1559 = vrot.lane.b32.xlu2 %v5059_v33, %s2938_s11  ;;  %v1903_v47 = vsel %vm1888_vm9, %v1870_v59, %v1536_v3  ;;  %v5065_v3 = vld [vmem:[#allocation17_spill] sm:$0xff]  ;;  %v5066_v59 = vld [vmem:[#allocation46_spill] sm:$0xff] }
 0x2cd   : > { %1636 = vrot.lane.b32.xlu1 %v5060_v36, %s5001_s18 }
 0x2ce   : > { %v1554_v53 = vpop.permute.xlu2 %1553 }
 0x2cf   : > { %v1629_v18 = vpop.permute.xlu1 %1628  ;;  %v2339_v16 = vpop.f32.mrf.mxu2 }
 0x2d0   : > { %v2340_v25 = vadd.f32 %v4162_v29, %v2339_v16  ;;  %v1936_v7 = vsel %vm1921_vm10, %v1903_v47, %v1629_v18 }
 0x2d1   : > { %2663 = vmatmul.msk.f32.gmra.mxu1 %vm1967_vm11, %v1936_v7  ;;  %1652 = vrot.lane.b32.xlu0 %v5061_v12, %s5001_s18  ;;  %v543_v7 = vpop.f32.mrf.mxu3 }
 0x2d2   : > { %v2427_v23 = vadd.f32 %v2800_v2, %v2340_v25  ;;  %v5067_v2 = vld [vmem:[#allocation47_spill] sm:$0xff] }
 0x2d3   : > { %v1162_v22 = vpop.permute.xlu0 %1161 }
 0x2d4   : > { %v2459_v13 = vmax.f32 %v2427_v23, 0.0  ;;  %1169 = vrot.lane.b32.xlu2 %v5054_v24, %s2933_s21 }
 0x2d5   : > { %1255 = vrot.lane.b32.xlu1 %v5052_v10, %s2934_s23  ;;  %v1708_v10 = vsel %vm1693_vm4, %v3610_v14, %v5062_v21 }
 0x2d6   : > { %2491 = vst.msk [vmem:[%s4189_s17 + $0x20] sm:$0xff] %vm339_vm0, %v2459_v13  ;;  %v4395_v5 = vpop.permute.xlu2 %1163  ;;  %v1740_v39 = vsel %vm1725_vm5, %v1708_v10, %v5063_v40  ;;  %v5068_v13 = vld [vmem:[#allocation22_spill] sm:$0xff]  ;;  %v5070_v40 = vld [vmem:[#allocation41_spill] sm:$0xff] }
 0x2d7   : > { %v1349_v8 = vpop.permute.xlu1 %1348  ;;  %v1773_v60 = vsel %vm1757_vm6, %v1740_v39, %v5064_v43  ;;  %v544_v39 = vadd.f32 %v5070_v40, %v543_v7 }
 0x2d8   : > { %v1805_v14 = vsel %vm339_vm0, %v1773_v60, %v4333_v44 }
 0x2d9   : > { %1356 = vrot.lane.b32.xlu0 %v5053_v41, %s2935_s29  ;;  %v1838_v48 = vsel %vm1822_vm8, %v1805_v14, %v1349_v8  ;;  %v579_v43 = vmax.f32 %v544_v39, 0.0 }
 0x2db   : > { %v2342_v50 = vpop.f32.mrf.mxu2  ;;  %v1445_v19 = vpop.permute.xlu0 %1444 }
 0x2dc   : > { %v2343_v49 = vadd.f32 %v4162_v29, %v2342_v50  ;;  %1452 = vrot.lane.b32.xlu2 %v3853_v52, %s2936_s8  ;;  %v1871_v63 = vsel %vm1855_vm7, %v1838_v48, %v1445_v19 }
 0x2dd   : > { %1271 = vrot.lane.b32.xlu1 %v5055_v46, %s2934_s23  ;;  %v1781_v46 = vsel %vm1757_vm6, %v4148_v45, %v1162_v22  ;;  %v1904_v45 = vsel %vm1888_vm9, %v1871_v63, %v1538_v42  ;;  %v5069_v42 = vld [vmem:[#allocation18_spill] sm:$0xff] }
 0x2de   : > { %v2428_v41 = vadd.f32 %v2801_v15, %v2343_v49  ;;  %v4410_v20 = vpop.permute.xlu2 %1446  ;;  %v5074_v63 = vld [vmem:[#allocation58_spill] sm:$0xff] }
 0x2df   : > { %v1365_v28 = vpop.permute.xlu1 %1364 }
 0x2e0   : > { %v2460_v38 = vmax.f32 %v2428_v41, 0.0 }
 0x2e1   : > { %1372 = vrot.lane.b32.xlu0 %v5056_v58, %s2935_s29  ;;  %v1813_v58 = vsel %vm339_vm0, %v1781_v46, %v4354_v61 }
 0x2e2   : > { %2492 = vst.msk [vmem:[%s4189_s17 + $0x28] sm:$0xff] %vm339_vm0, %v2460_v38  ;;  %v1846_v47 = vsel %vm1822_vm8, %v1813_v58, %v1365_v28  ;;  %v5071_v28 = vld [vmem:[#allocation56_spill] sm:$0xff] }
 0x2e3   : > { %v1461_v62 = vpop.permute.xlu0 %1460 }
 0x2e4   : > { %1468 = vrot.lane.b32.xlu2 %v5065_v3, %s2936_s8  ;;  %v1879_v16 = vsel %vm1855_vm7, %v1846_v47, %v1461_v62  ;;  %v659_v47 = vrot.slane %v579_v43, 7 }
 0x2e5   : > { %1545 = vrot.lane.b32.xlu1 %v5066_v59, %s2938_s11  ;;  %v1912_v23 = vsel %vm1888_vm9, %v1879_v16, %v1554_v53  ;;  %v546_v53 = vpop.f32.mrf.mxu3 }
 0x2e6   : > { %v4430_v44 = vpop.permute.xlu2 %1462 }
 0x2e7   : > { %v1631_v18 = vpop.permute.xlu1 %1630 }
 0x2e8   : > { %v1937_v25 = vsel %vm1921_vm10, %v1904_v45, %v1631_v18  ;;  %v2802_v45 = vld [vmem:[%s3072_s16 + $0x30] sm:$0xff] }
 0x2e9   : > { %2664 = vmatmul.msk.f32.gmra.mxu1 %vm1967_vm11, %v1937_v25  ;;  %1638 = vrot.lane.b32.xlu0 %v5067_v2, %s5001_s18 }
 0x2eb   : > { %v1647_v61 = vpop.permute.xlu0 %1646 }
 0x2ec   : > { %v1945_v22 = vsel %vm1921_vm10, %v1912_v23, %v1647_v61  ;;  %1654 = vrot.lane.b32.xlu2 %v5068_v13, %s5001_s18 }
 0x2ed   : > { %1561 = vrot.lane.b32.xlu1 %v5069_v42, %s2938_s11  ;;  %2672 = vmatmul.msk.f32.vlgmr.msrb.gmra.mxu3 %vm1967_vm11, %v1945_v22  ;;  %v5075_v22 = vld [vmem:[#allocation49_spill] sm:$0xff] }
 0x2ee   : > { %v2105_v8 = vpop.f32.mrf.mxu1  ;;  %v1649_v50 = vpop.permute.xlu2 %1648 }
 0x2ef   : > { %v2106_v19 = vadd.f32 %v3832_v26, %v2105_v8  ;;  %v1250_v49 = vpop.permute.xlu1 %1249  ;;  %v547_v26 = vadd.f32 %v5070_v40, %v546_v53  ;;  %v4488_v8 = vsel %vm613_vm1, 0.0, %v659_v47 }
 0x2f0   : > { %v1212_v39 = vrot.slane %v4488_v8, 1 }
 0x2f1   : > { %v2185_v21 = vmax.f32 %v2106_v19, 0.0  ;;  %1257 = vrot.lane.b32.xlu0 %v3896_v32, %s2934_s23  ;;  %v5072_v32 = vld [vmem:[#allocation36_spill] sm:$0xff]  ;;  %v580_v60 = vmax.f32 %v547_v26, 0.0  ;;  %v1782_v19 = vsel %vm1757_vm6, %v4200_v56, %v4395_v5  ;;  %v5076_v26 = vld [vmem:[#allocation50_spill] sm:$0xff] }
 0x2f2   : > { %v1709_v38 = vsel %vm1693_vm4, %v5072_v32, %v5071_v28 }
 0x2f3   : > { %2689 = vmatmul.msk.f32.gmra.mxu2 %vm1693_vm4, %v2185_v21  ;;  %v1351_v10 = vpop.permute.xlu0 %1350  ;;  %v4470_v18 = vrot.slane %v580_v60, 7 }
 0x2f4   : > { %1358 = vrot.lane.b32.xlu2 %v5060_v36, %s2935_s29  ;;  %v5073_v36 = vld [vmem:[#allocation59_spill] sm:$0xff] }
 0x2f5   : > { %1171 = vrot.lane.b32.xlu1 %v5058_v17, %s2933_s21  ;;  %v1741_v14 = vsel %vm1725_vm5, %v1709_v38, %v5073_v36 }
 0x2f6   : > { %v4456_v15 = vpop.permute.xlu2 %1352  ;;  %v1774_v58 = vsel %vm1757_vm6, %v1741_v14, %v5074_v63  ;;  %v4525_v63 = vld [vmem:[%s4916_s4] ss:$0 sm:$0xff] }
 0x2f7   : > { %v1266_v41 = vpop.permute.xlu1 %1265 }
 0x2f8   : > { %v1814_v21 = vsel %vm339_vm0, %v1782_v19, %v1266_v41 }
 0x2f9   : > { %1273 = vrot.lane.b32.xlu0 %v5059_v33, %s2934_s23  ;;  %v1806_v33 = vsel %vm339_vm0, %v1774_v58, %v1250_v49 }
 0x2fa   : > { %v2345_v46 = vpop.f32.mrf.mxu2  ;;  %v1839_v7 = vsel %vm1822_vm8, %v1806_v33, %v1351_v10 }
 0x2fb   : > { %v2346_v48 = vadd.f32 %v4162_v29, %v2345_v46  ;;  %v1367_v62 = vpop.permute.xlu0 %1366  ;;  %v1872_v49 = vsel %vm1855_vm7, %v1839_v7, %v4410_v20  ;;  %v1313_v20 = vrot.slane %v4488_v8, 2 }
 0x2fc   : > { %1374 = vrot.lane.b32.xlu2 %v5061_v12, %s2935_s29  ;;  %v4481_v12 = vsel %vm613_vm1, %v659_v47, %v4470_v18  ;;  %v1847_v40 = vsel %vm1822_vm8, %v1814_v21, %v1367_v62  ;;  %v5079_v21 = vld [vmem:[#allocation60_spill] sm:$0xff] }
 0x2fd   : > { %v2429_v16 = vadd.f32 %v2802_v45, %v2346_v48  ;;  %1454 = vrot.lane.b32.xlu1 %v3907_v57, %s2936_s8  ;;  %v1213_v56 = vrot.slane %v4481_v12, 1  ;;  %v1880_v32 = vsel %vm1855_vm7, %v1847_v40, %v4430_v44  ;;  %v1314_v14 = vrot.slane %v4481_v12, 2  ;;  %v2803_v48 = vld [vmem:[%s3072_s16 + $0x38] sm:$0xff] }
 0x2fe   : > { %v4476_v25 = vpop.permute.xlu2 %1368 }
 0x2ff   : > { %v2461_v23 = vmax.f32 %v2429_v16, 0.0  ;;  %v1540_v61 = vpop.permute.xlu1 %1539  ;;  %v4514_v36 = vsel %vm772_vm3, %v1212_v39, %v1213_v56  ;;  %v4531_v16 = vsel %vm943_vm2, %v1313_v20, %v1314_v14 }
 0x300   : > { %v1905_v53 = vsel %vm1888_vm9, %v1872_v49, %v1540_v61 }
 0x301   : > { %2493 = vst.msk [vmem:[%s4189_s17 + $0x30] sm:$0xff] %vm339_vm0, %v2461_v23  ;;  %1547 = vrot.lane.b32.xlu0 %v5075_v22, %s2938_s11  ;;  %v5077_v23 = vld [vmem:[#allocation57_spill] sm:$0xff] }
 0x302   : > { %v1710_v61 = vsel %vm1693_vm4, %v3664_v54, %v5077_v23 }
 0x303   : > { %v1633_v10 = vpop.permute.xlu0 %1632 }
 0x304   : > { %1640 = vrot.lane.b32.xlu2 %v5076_v26, %s5001_s18  ;;  %v1938_v28 = vsel %vm1921_vm10, %v1905_v53, %v1633_v10 }
 0x305   : > { %1470 = vrot.lane.b32.xlu1 %v4488_v8, %s2936_s8  ;;  %2665 = vmatmul.msk.f32.gmra.mxu1 %vm1967_vm11, %v1938_v28 }
 0x306   : > { %v1635_v5 = vpop.permute.xlu2 %1634 }
 0x307   : > { %v1556_v41 = vpop.permute.xlu1 %1555  ;;  %v2348_v38 = vpop.f32.mrf.mxu2 }
 0x308   : > { %v1913_v43 = vsel %vm1888_vm9, %v1880_v32, %v1556_v41  ;;  %v2349_v60 = vadd.f32 %v4162_v29, %v2348_v38 }
 0x309   : > { %1563 = vrot.lane.b32.xlu0 %v4514_v36, %s2938_s11  ;;  %v1946_v46 = vsel %vm1921_vm10, %v1913_v43, %v1649_v50  ;;  %v740_v43 = vsel %vm613_vm1, %v4470_v18, 0.0 }
 0x30a   : > { %v2430_v44 = vadd.f32 %v2803_v48, %v2349_v60  ;;  %2673 = vmatmul.msk.f32.gmra.mxu3 %vm1967_vm11, %v1946_v46  ;;  %v2108_v62 = vpop.f32.mrf.mxu1  ;;  %v1215_v48 = vrot.slane %v740_v43, 1 }
 0x30b   : > { %v2109_v58 = vadd.f32 %v4525_v63, %v2108_v62  ;;  %v1252_v47 = vpop.permute.xlu0 %1251 }
 0x30c   : > { %v2462_v45 = vmax.f32 %v2430_v44, 0.0  ;;  %1157 = vrot.lane.b32.xlu2 %v3853_v52, %s2933_s21  ;;  %v5078_v52 = vld [vmem:[#allocation54_spill] sm:$0xff] }
 0x30d   : > { %v2186_v50 = vmax.f32 %v2109_v58, 0.0  ;;  %1656 = vrot.lane.b32.xlu1 %v4531_v16, %s5001_s18  ;;  %v1742_v49 = vsel %vm1725_vm5, %v1710_v61, %v5078_v52  ;;  %v1316_v58 = vrot.slane %v740_v43, 2 }
 0x30e   : > { %2494 = vst.msk [vmem:[%s4189_s17 + $0x38] sm:$0xff] %vm339_vm0, %v2462_v45  ;;  %v4539_v33 = vpop.permute.xlu2 %1253  ;;  %v1775_v53 = vsel %vm1757_vm6, %v1742_v49, %v5079_v21 }
 0x30f   : > { %v1166_v7 = vpop.permute.xlu1 %1165  ;;  %2690 = vmatmul.msk.f32.gmra.mxu2 %vm1693_vm4, %v2186_v50  ;;  %v1317_v50 = vsel %vm943_vm2, %v1314_v14, %v1316_v58 }
 0x310   : > { %v1783_v60 = vsel %vm1757_vm6, %v4210_v27, %v1166_v7 }
 0x311   : > { %1259 = vrot.lane.b32.xlu0 %v5066_v59, %s2934_s23  ;;  %v1807_v59 = vsel %vm339_vm0, %v1775_v53, %v1252_v47 }
 0x313   : > { %v1268_v19 = vpop.permute.xlu0 %1267 }
 0x314   : > { %1360 = vrot.lane.b32.xlu2 %v5067_v2, %s2935_s29  ;;  %v1840_v2 = vsel %vm1822_vm8, %v1807_v59, %v4456_v15 }
 0x315   : > { %1173 = vrot.lane.b32.xlu1 %v5065_v3, %s2933_s21 }
 0x316   : > { %v4555_v10 = vpop.permute.xlu2 %1269 }
 0x317   : > { %v1449_v40 = vpop.permute.xlu1 %1448  ;;  %v2111_v39 = vpop.f32.mrf.mxu1 }
 0x318   : > { %v2112_v54 = vadd.f32 %v4525_v63, %v2111_v39  ;;  %v1873_v20 = vsel %vm1855_vm7, %v1840_v2, %v1449_v40 }
 0x319   : > { %1275 = vrot.lane.b32.xlu0 %v5069_v42, %s2934_s23 }
 0x31a   : > { %v2187_v28 = vmax.f32 %v2112_v54, 0.0 }
 0x31b   : > { %v1542_v41 = vpop.permute.xlu0 %1541 }
 0x31c   : > { %2691 = vmatmul.msk.f32.gmra.mxu2 %vm1693_vm4, %v2187_v28  ;;  %v1906_v32 = vsel %vm1888_vm9, %v1873_v20, %v1542_v41  ;;  %1376 = vrot.lane.b32.xlu2 %v5068_v13, %s2935_s29  ;;  %v1815_v13 = vsel %vm339_vm0, %v1783_v60, %v1268_v19  ;;  %v5080_v28 = vmov 0.0  }
 0x31d   : > { %1456 = vrot.lane.b32.xlu1 %v3900_v55, %s2936_s8  ;;  %v1939_v38 = vsel %vm1921_vm10, %v1906_v32, %v1635_v5  ;;  %v1848_v55 = vsel %vm1822_vm8, %v1815_v13, %v4476_v25 }
 0x31e   : > { %v1544_v42 = vpop.permute.xlu2 %1543  ;;  %2666 = vmatmul.msk.f32.gmra.mxu1 %vm1967_vm11, %v1939_v38  ;;  %v5082_v38 = vld [vmem:[#allocation10_spill] sm:$0xff] }
 0x31f   : > { %v1465_v15 = vpop.permute.xlu1 %1464 }
 0x320   : > { %v1881_v18 = vsel %vm1855_vm7, %v1848_v55, %v1465_v15 }
 0x321   : > { %1549 = vrot.lane.b32.xlu0 %v3934_v31, %s2938_s11 }
 0x323   : > { %v1558_v46 = vpop.permute.xlu0 %1557 }
 0x324   : > { %1642 = vrot.lane.b32.xlu2 %v3986_v37, %s5001_s18  ;;  %v1914_v44 = vsel %vm1888_vm9, %v1881_v18, %v1558_v46  ;;  %v1216_v37 = vsel %vm772_vm3, %v1213_v56, %v1215_v48 }
 0x325   : > { %1472 = vrot.lane.b32.xlu1 %v4481_v12, %s2936_s8 }
 0x326   : > { %v2114_v5 = vpop.f32.mrf.mxu1  ;;  %v1560_v27 = vpop.permute.xlu2 %1559 }
 0x327   : > { %v2115_v31 = vadd.f32 %v4525_v63, %v2114_v5  ;;  %v1651_v62 = vpop.permute.xlu1 %1650 }
 0x328   : > { %v1947_v47 = vsel %vm1921_vm10, %v1914_v44, %v1651_v62 }
 0x329   : > { %v2188_v25 = vmax.f32 %v2115_v31, 0.0  ;;  %2674 = vmatmul.msk.f32.gmra.mxu3 %vm1967_vm11, %v1947_v47  ;;  %1565 = vrot.lane.b32.xlu0 %v1216_v37, %s2938_s11 }
 0x32b   : > { %2692 = vmatmul.msk.f32.gmra.mxu2 %vm1693_vm4, %v2188_v25  ;;  %v1168_v45 = vpop.permute.xlu0 %1167 }
 0x32c   : > { %1159 = vrot.lane.b32.xlu2 %v3907_v57, %s2933_s21  ;;  %v1784_v49 = vsel %vm1757_vm6, %v4230_v11, %v1168_v45 }
 0x32d   : > { %1658 = vrot.lane.b32.xlu1 %v1317_v50, %s5001_s18 }
 0x32e   : > { %v1170_v7 = vpop.permute.xlu2 %1169 }
 0x32f   : > { %v1355_v23 = vpop.permute.xlu1 %1354  ;;  %v1785_v55 = vsel %vm1757_vm6, %v4217_v4, %v1170_v7 }
 0x331   : > { %1261 = vrot.lane.b32.xlu0 %v5075_v22, %s2934_s23  ;;  %v1808_v22 = vsel %vm339_vm0, %v4096_v34, %v4539_v33 }
 0x332   : > { %v2117_v56 = vpop.f32.mrf.mxu1 }
 0x333   : > { %v2118_v61 = vadd.f32 %v4525_v63, %v2117_v56  ;;  %v1451_v19 = vpop.permute.xlu0 %1450 }
 0x334   : > { %1362 = vrot.lane.b32.xlu2 %v5076_v26, %s2935_s29  ;;  %v1841_v26 = vsel %vm1822_vm8, %v1808_v22, %v1355_v23 }
 0x335   : > { %v2189_v52 = vmax.f32 %v2118_v61, 0.0  ;;  %1175 = vrot.lane.b32.xlu1 %v4488_v8, %s2933_s21  ;;  %v1874_v53 = vsel %vm1855_vm7, %v1841_v26, %v1451_v19  ;;  %v1816_v8 = vsel %vm339_vm0, %v1784_v49, %v4555_v10 }
 0x336   : > { %v1453_v14 = vpop.permute.xlu2 %1452  ;;  %v1907_v11 = vsel %vm1888_vm9, %v1874_v53, %v1544_v42 }
 0x337   : > { %v1371_v57 = vpop.permute.xlu1 %1370  ;;  %2693 = vmatmul.msk.f32.gmra.mxu2 %vm1693_vm4, %v2189_v52 }
 0x338   : > { %v1849_v34 = vsel %vm1822_vm8, %v1816_v8, %v1371_v57  ;;  %v5083_v8 = vld [vmem:[#allocation26_spill] sm:$0xff] }
 0x339   : > { %1277 = vrot.lane.b32.xlu0 %v4514_v36, %s2934_s23 }
 0x33b   : > { %v1467_v21 = vpop.permute.xlu0 %1466 }
 0x33c   : > { %1378 = vrot.lane.b32.xlu2 %v4531_v16, %s2935_s29  ;;  %v1882_v40 = vsel %vm1855_vm7, %v1849_v34, %v1467_v21 }
 0x33d   : > { %1458 = vrot.lane.b32.xlu1 %v3983_v6, %s2936_s8  ;;  %v1915_v10 = vsel %vm1888_vm9, %v1882_v40, %v1560_v27 }
 0x33e   : > { %v1469_v36 = vpop.permute.xlu2 %1468 }
 0x33f   : > { %v1637_v33 = vpop.permute.xlu1 %1636  ;;  %v2120_v59 = vpop.f32.mrf.mxu1 }
 0x340   : > { %v2121_v39 = vadd.f32 %v4525_v63, %v2120_v59  ;;  %v1940_v54 = vsel %vm1921_vm10, %v1907_v11, %v1637_v33  ;;  %v5084_v33 = vld [vmem:[#allocation27_spill] sm:$0xff] }
 0x341   : > { %2667 = vmatmul.msk.f32.gmra.mxu1 %vm1967_vm11, %v1940_v54  ;;  %1551 = vrot.lane.b32.xlu0 %v4010_v0, %s2938_s11  ;;  %v5081_v0 = vld [vmem:[#allocation9_spill] sm:$0xff] }
 0x342   : > { %v2190_v6 = vmax.f32 %v2121_v39, 0.0  ;;  %v2805_v39 = vld [vmem:[%s3072_s16 + $0x40] sm:$0xff] }
 0x343   : > { %v1653_v16 = vpop.permute.xlu0 %1652 }
 0x344   : > { %2694 = vmatmul.msk.f32.gmra.mxu2 %vm1693_vm4, %v2190_v6  ;;  %1644 = vrot.lane.b32.xlu2 %v4007_v35, %s5001_s18  ;;  %v1948_v2 = vsel %vm1921_vm10, %v1915_v10, %v1653_v16 }
 0x345   : > { %1474 = vrot.lane.b32.xlu1 %v5080_v28, %s2936_s8  ;;  %2675 = vmatmul.msk.f32.gmra.mxu3 %vm1967_vm11, %v1948_v2 }
 0x346   : > { %v1655_v20 = vpop.permute.xlu2 %1654 }
 0x347   : > { %v1256_v41 = vpop.permute.xlu1 %1255 }
 0x348   : > { %v1809_v46 = vsel %vm339_vm0, %v4108_v9, %v1256_v41 }
 0x349   : > { %1567 = vrot.lane.b32.xlu0 %v5081_v0, %s2938_s11 }
 0x34b   : > { %v1357_v32 = vpop.permute.xlu0 %1356 }
 0x34c   : > { %1177 = vrot.lane.b32.xlu2 %v4481_v12, %s2933_s21  ;;  %v1842_v12 = vsel %vm1822_vm8, %v1809_v46, %v1357_v32 }
 0x34d   : > { %1660 = vrot.lane.b32.xlu1 %v5082_v38, %s5001_s18  ;;  %v1875_v18 = vsel %vm1855_vm7, %v1842_v12, %v1453_v14 }
 0x34e   : > { %v2123_v35 = vpop.f32.mrf.mxu1  ;;  %v1359_v43 = vpop.permute.xlu2 %1358 }
 0x34f   : > { %v2124_v42 = vadd.f32 %v4525_v63, %v2123_v35  ;;  %v1272_v15 = vpop.permute.xlu1 %1271 }
 0x350   : > { %v1817_v27 = vsel %vm339_vm0, %v1785_v55, %v1272_v15 }
 0x351   : > { %v2191_v60 = vmax.f32 %v2124_v42, 0.0  ;;  %1279 = vrot.lane.b32.xlu0 %v1216_v37, %s2934_s23  ;;  %s2880_s23 = scalar_lea.hbm %s4919_s7, 512 }
 0x353   : > { %2695 = vmatmul.msk.f32.gmra.mxu2 %vm1693_vm4, %v2191_v60  ;;  %v1373_v13 = vpop.permute.xlu0 %1372 }
 0x354   : > { %v1850_v62 = vsel %vm1822_vm8, %v1817_v27, %v1373_v13 }
 0x355   : > { %1380 = vrot.lane.b32.xlu1 %v1317_v50, %s2935_s29  ;;  %v1883_v47 = vsel %vm1855_vm7, %v1850_v62, %v1469_v36  ;;  %v1721_v36 = vsel %vm1693_vm4, %v5043_v30, %v5083_v8  ;;  %s2719_s29 = sshll.u32 %s3001_s28, 8 }
 0x356   : > { %v1375_v5 = vpop.permute.xlu2 %1374  ;;  %v1753_v59 = vsel %vm1725_vm5, %v1721_v36, %v5084_v33  ;;  %s2531_s18 = scalar_lea.hbm %s4919_s7, %s2719_s29 }
 0x357   : > { %v1546_v48 = vpop.permute.xlu1 %1545  ;;  %s2534_s10 = sshll.u32 %s2531_s18, 4  ;;  %s2535_s10 = int_to_ptr.hbm [resolvable:$true] %s2534_s10 }
 0x358   : > { %v1908_v44 = vsel %vm1888_vm9, %v1875_v18, %v1546_v48  ;;  %s2874_s12 = sshra.s32 %s2535_s10, 4  ;;  %s2875_s12 = int_to_ptr.hbm [resolvable:$true] %s2874_s12 }
 0x359   : > { %s2876_s28 = scalar_lea.hbm %s2875_s12, 256  ;;  %p2881_p0 = scmp.lt.s32.totalorder %s2875_s12, %s4919_s7 }
 0x35a   : > { %p2877_p6 = scmp.ne.s32.totalorder %s2875_s12, %s2876_s28  ;;  %p2882_p1 = scmp.lt.s32.totalorder %s2880_s23, %s2876_s28 }
 0x35b   : > { %v1639_v31 = vpop.permute.xlu0 %1638 }
 0x35c   : > { %v1941_v58 = vsel %vm1921_vm10, %v1908_v44, %v1639_v31  ;;  %v5085_v31 = vld [vmem:[#allocation25_spill] sm:$0xff]  ;;  %p2878_p9 = pnand %p2877_p6, %p3030_p11  ;;  %p2883_p3 = por %p2882_p1, %p2881_p0 }
 0x35d   : > { %2668 = vmatmul.msk.f32.gmra.mxu1 %vm1967_vm11, %v1941_v58  ;;  %v1722_v62 = vsel %vm1693_vm4, %v5054_v24, %v5085_v31  ;;  %v2806_v58 = vld [vmem:[%s3072_s16 + $0x48] sm:$0xff] }
 0x35e   : > { %v1641_v45 = vpop.permute.xlu2 %1640  ;;  %p2879_p13 = pneg %p2878_p9 }
 0x35f   : > { %v1562_v9 = vpop.permute.xlu1 %1561 }
 0x360   : > { %v1916_v37 = vsel %vm1888_vm9, %v1883_v47, %v1562_v9  ;;  %p2884_p4 = pnand %p2883_p3, %p2879_p13 }
 0x361   : > { %v1949_v4 = vsel %vm1921_vm10, %v1916_v37, %v1655_v20 }
 0x362   : > { %2676 = vmatmul.msk.f32.gmra.mxu3 %vm1967_vm11, %v1949_v4 }
 0x363   : > { %v1258_v25 = vpop.permute.xlu0 %1257 }
 0x364   : > { %v1810_v52 = vsel %vm339_vm0, %v4134_v1, %v1258_v25  ;;  %v5086_v25 = vld [vmem:[#allocation23_spill] sm:$0xff] }
 0x365   : > { %v1843_v57 = vsel %vm1822_vm8, %v1810_v52, %v1359_v43 }
 0x366   : > { %v2126_v50 = vpop.f32.mrf.mxu1  ;;  %v1158_v19 = vpop.permute.xlu2 %1157 }
 0x367   : > { %v2127_v7 = vadd.f32 %v4525_v63, %v2126_v50  ;;  %v1172_v23 = vpop.permute.xlu1 %1171  ;;  %v1779_v13 = vsel %vm1757_vm6, %v4125_v51, %v1158_v19 }
 0x368   : > { %v1786_v40 = vsel %vm1757_vm6, %v1753_v59, %v1172_v23 }
 0x369   : > { %v2192_v56 = vmax.f32 %v2127_v7, 0.0 }
 0x36b   : > { %2696 = vmatmul.msk.f32.gmra.mxu2 %vm1693_vm4, %v2192_v56  ;;  %v1274_v61 = vpop.permute.xlu0 %1273 }
 0x36c   : > { %v1818_v6 = vsel %vm339_vm0, %v1786_v40, %v1274_v61 }
 0x36d   : > { %v1851_v2 = vsel %vm1822_vm8, %v1818_v6, %v1375_v5 }
 0x36e   : > { %v1361_v11 = vpop.permute.xlu2 %1360 }
 0x36f   : > { %v1455_v14 = vpop.permute.xlu1 %1454 }
 0x370   : > { %v1876_v22 = vsel %vm1855_vm7, %v1843_v57, %v1455_v14 }
 0x373   : > { %v1548_v49 = vpop.permute.xlu0 %1547 }
 0x374   : > { %v1909_v26 = vsel %vm1888_vm9, %v1876_v22, %v1548_v49 }
 0x375   : > { %v1942_v21 = vsel %vm1921_vm10, %v1909_v26, %v1641_v45  ;;  %v1754_v45 = vsel %vm1725_vm5, %v1722_v62, %v5086_v25 }
 0x376   : > { %v2351_v53 = vpop.f32.mrf.mxu2  ;;  %2669 = vmatmul.msk.f32.gmra.mxu1 %vm1967_vm11, %v1942_v21  ;;  %v1377_v0 = vpop.permute.xlu2 %1376 }
 0x377   : > { %v2352_v1 = vadd.f32 %v4162_v29, %v2351_v53  ;;  %v1471_v34 = vpop.permute.xlu1 %1470  ;;  %v2807_v53 = vld [vmem:[%s3072_s16 + $0x50] sm:$0xff] }
 0x378   : > { %v1884_v30 = vsel %vm1855_vm7, %v1851_v2, %v1471_v34 }
 0x379   : > { %v2431_v54 = vadd.f32 %v2805_v39, %v2352_v1 }
 0x37b   : > { %v2463_v16 = vmax.f32 %v2431_v54, 0.0  ;;  %v1564_v10 = vpop.permute.xlu0 %1563  ;;  %v4728_v54 = vld [vmem:[%s4918_s6] ss:$0 sm:$0xff] }
 0x37c   : > { %v1917_v28 = vsel %vm1888_vm9, %v1884_v30, %v1564_v10  ;;  %v2809_v10 = vld [vmem:[%s3072_s16 + $0x58] sm:$0xff] }
 0x37d   : > { %2495 = vst.msk [vmem:[%s4189_s17 + $0x40] sm:$0xff] %vm339_vm0, %v2463_v16 }
 0x37e   : > { %v1643_v60 = vpop.permute.xlu2 %1642 }
 0x37f   : > { %v1657_v20 = vpop.permute.xlu1 %1656 }
 0x380   : > { %v1950_v41 = vsel %vm1921_vm10, %v1917_v28, %v1657_v20 }
 0x381   : > { %2677 = vmatmul.msk.f32.gmra.mxu3 %vm1967_vm11, %v1950_v41 }
 0x382   : > { %v2129_v32 = vpop.f32.mrf.mxu1 }
 0x383   : > { %v2130_v38 = vadd.f32 %v4525_v63, %v2129_v32  ;;  %v1260_v35 = vpop.permute.xlu0 %1259 }
 0x384   : > { %v1811_v46 = vsel %vm339_vm0, %v1779_v13, %v1260_v35  ;;  %v5088_v35 = vld [vmem:[#allocation30_spill] sm:$0xff] }
 0x385   : > { %v2193_v42 = vmax.f32 %v2130_v38, 0.0  ;;  %v1844_v48 = vsel %vm1822_vm8, %v1811_v46, %v1361_v11  ;;  %v5087_v11 = vld [vmem:[#allocation61_spill] sm:$0xff] }
 0x386   : > { %v1160_v47 = vpop.permute.xlu2 %1159 }
 0x387   : > { %v1174_v15 = vpop.permute.xlu1 %1173  ;;  %2697 = vmatmul.msk.f32.gmra.mxu2 %vm1693_vm4, %v2193_v42  ;;  %v1723_v42 = vsel %vm1693_vm4, %v5058_v17, %v5088_v35 }
 0x388   : > { %v1787_v50 = vsel %vm1757_vm6, %v1754_v45, %v1174_v15  ;;  %v5090_v45 = vld [vmem:[#allocation31_spill] sm:$0xff] }
 0x38b   : > { %v1276_v43 = vpop.permute.xlu0 %1275 }
 0x38c   : > { %v1819_v7 = vsel %vm339_vm0, %v1787_v50, %v1276_v43  ;;  %v5089_v43 = vld [vmem:[#allocation32_spill] sm:$0xff]  ;;  %v1724_v50 = vsel %vm1693_vm4, %v5065_v3, %v5090_v45 }
 0x38d   : > { %v1852_v61 = vsel %vm1822_vm8, %v1819_v7, %v1377_v0 }
 0x38e   : > { %v1363_v49 = vpop.permute.xlu2 %1362 }
 0x38f   : > { %v1457_v12 = vpop.permute.xlu1 %1456 }
 0x390   : > { %v1877_v18 = vsel %vm1855_vm7, %v1844_v48, %v1457_v12  ;;  %v4746_v48 = vpop.f32.mrf.mxu3 }
 0x392   : > { %v2354_v55 = vpop.f32.mrf.mxu2 }
 0x393   : > { %v2355_v5 = vadd.f32 %v4162_v29, %v2354_v55  ;;  %v1550_v27 = vpop.permute.xlu0 %1549 }
 0x394   : > { %v1910_v44 = vsel %vm1888_vm9, %v1877_v18, %v1550_v27  ;;  %v2810_v27 = vld [vmem:[%s3072_s16 + $0x60] sm:$0xff] }
 0x395   : > { %v2432_v51 = vadd.f32 %v2806_v58, %v2355_v5  ;;  %v1943_v9 = vsel %vm1921_vm10, %v1910_v44, %v1643_v60  ;;  %v1755_v60 = vsel %vm1725_vm5, %v1723_v42, %v5089_v43 }
 0x396   : > { %2670 = vmatmul.msk.f32.gmra.mxu1 %vm1967_vm11, %v1943_v9  ;;  %v1379_v33 = vpop.permute.xlu2 %1378 }
 0x397   : > { %v2464_v37 = vmax.f32 %v2432_v51, 0.0  ;;  %v1473_v4 = vpop.permute.xlu1 %1472 }
 0x398   : > { %v1885_v19 = vsel %vm1855_vm7, %v1852_v61, %v1473_v4  ;;  %v4758_v4 = vpop.f32.mrf.mxu3 }
 0x399   : > { %2496 = vst.msk [vmem:[%s4189_s17 + $0x48] sm:$0xff] %vm339_vm0, %v2464_v37 }
 0x39b   : > { %v2132_v24 = vpop.f32.mrf.mxu1  ;;  %v1566_v23 = vpop.permute.xlu0 %1565 }
 0x39c   : > { %v2133_v56 = vadd.f32 %v4525_v63, %v2132_v24  ;;  %v1918_v14 = vsel %vm1888_vm9, %v1885_v19, %v1566_v23  ;;  %v5091_v24 = vld [vmem:[#allocation34_spill] sm:$0xff] }
 0x39d   : > { %v1756_v23 = vsel %vm1725_vm5, %v1724_v50, %v5091_v24 }
 0x39e   : > { %v2194_v52 = vmax.f32 %v2133_v56, 0.0  ;;  %v1645_v0 = vpop.permute.xlu2 %1644 }
 0x39f   : > { %v1659_v57 = vpop.permute.xlu1 %1658  ;;  %v2357_v22 = vpop.f32.mrf.mxu2 }
 0x3a0   : > { %v2358_v26 = vadd.f32 %v4162_v29, %v2357_v22  ;;  %v1951_v21 = vsel %vm1921_vm10, %v1918_v14, %v1659_v57  ;;  %2698 = vmatmul.msk.f32.gmra.mxu2 %vm1693_vm4, %v2194_v52  ;;  %v1780_v29 = vsel %vm1757_vm6, %v5087_v11, %v1160_v47 }
 0x3a1   : > { %2678 = vmatmul.msk.f32.gmra.mxu3 %vm1967_vm11, %v1951_v21 }
 0x3a2   : > { %v2433_v8 = vadd.f32 %v2807_v53, %v2358_v26 }
 0x3a3   : > { %v1262_v36 = vpop.permute.xlu0 %1261 }
 0x3a4   : > { %v2465_v1 = vmax.f32 %v2433_v8, 0.0  ;;  %v1812_v39 = vsel %vm339_vm0, %v1780_v29, %v1262_v36  ;;  %v2812_v29 = vld [vmem:[%s3072_s16 + $0x70] sm:$0xff] }
 0x3a5   : > { %v1845_v30 = vsel %vm1822_vm8, %v1812_v39, %v1363_v49  ;;  %v2811_v49 = vld [vmem:[%s3072_s16 + $0x68] sm:$0xff] }
 0x3a6   : > { %2497 = vst.msk [vmem:[%s4189_s17 + $0x50] sm:$0xff] %vm339_vm0, %v2465_v1  ;;  %v1178_v25 = vpop.permute.xlu2 %1177 }
 0x3a7   : > { %v1176_v34 = vpop.permute.xlu1 %1175  ;;  %v1789_v56 = vsel %vm1757_vm6, %v1756_v23, %v1178_v25  ;;  %v2151_v23 = vadd.f32 %v4525_v63, %v4746_v48 }
 0x3a8   : > { %v1788_v13 = vsel %vm1757_vm6, %v1755_v60, %v1176_v34 }
 0x3ab   : > { %v1278_v59 = vpop.permute.xlu0 %1277 }
 0x3ac   : > { %v1820_v46 = vsel %vm339_vm0, %v1788_v13, %v1278_v59  ;;  %v2156_v21 = vpop.f32.mrf.mxu3 }
 0x3ad   : > { %v1853_v5 = vsel %vm1822_vm8, %v1820_v46, %v1379_v33  ;;  %v2157_v36 = vadd.f32 %v4525_v63, %v2156_v21 }
 0x3ae   : > { %v2360_v40 = vpop.f32.mrf.mxu2 }
 0x3af   : > { %v2361_v6 = vadd.f32 %v4728_v54, %v2360_v40  ;;  %v1459_v16 = vpop.permute.xlu1 %1458  ;;  %v2202_v1 = vmax.f32 %v2157_v36, 0.0 }
 0x3b0   : > { %v1878_v20 = vsel %vm1855_vm7, %v1845_v30, %v1459_v16 }
 0x3b1   : > { %v2434_v2 = vadd.f32 %v2809_v10, %v2361_v6 }
 0x3b3   : > { %v2466_v28 = vmax.f32 %v2434_v2, 0.0  ;;  %v1552_v41 = vpop.permute.xlu0 %1551 }
 0x3b4   : > { %v1911_v32 = vsel %vm1888_vm9, %v1878_v20, %v1552_v41 }
 0x3b5   : > { %2498 = vst.msk [vmem:[%s4189_s17 + $0x58] sm:$0xff] %vm339_vm0, %v2466_v28  ;;  %v1944_v38 = vsel %vm1921_vm10, %v1911_v32, %v1645_v0  ;;  %v2813_v32 = vld [vmem:[%s3072_s16 + $0x78] sm:$0xff] }
 0x3b6   : > { %2671 = vmatmul.msk.f32.gmra.mxu1 %vm1967_vm11, %v1944_v38 }
 0x3b7   : > { %v1475_v15 = vpop.permute.xlu1 %1474 }
 0x3b8   : > { %v1886_v17 = vsel %vm1855_vm7, %v1853_v5, %v1475_v15 }
 0x3ba   : > { %v2363_v12 = vpop.f32.mrf.mxu2 }
 0x3bb   : > { %v2364_v55 = vadd.f32 %v4728_v54, %v2363_v12  ;;  %v1568_v18 = vpop.permute.xlu0 %1567 }
 0x3bc   : > { %v1919_v58 = vsel %vm1888_vm9, %v1886_v17, %v1568_v18 }
 0x3bd   : > { %v2435_v44 = vadd.f32 %v2810_v27, %v2364_v55 }
 0x3be   : > { %v2135_v31 = vpop.f32.mrf.mxu1 }
 0x3bf   : > { %v2467_v62 = vmax.f32 %v2435_v44, 0.0  ;;  %v2136_v51 = vadd.f32 %v4525_v63, %v2135_v31  ;;  %v1661_v9 = vpop.permute.xlu1 %1660 }
 0x3c0   : > { %v1952_v47 = vsel %vm1921_vm10, %v1919_v58, %v1661_v9 }
 0x3c1   : > { %2499 = vst.msk [vmem:[%s4189_s17 + $0x60] sm:$0xff] %vm339_vm0, %v2467_v62  ;;  %v2195_v37 = vmax.f32 %v2136_v51, 0.0  ;;  %2679 = vmatmul.msk.f32.gmra.mxu3 %vm1967_vm11, %v1952_v47  ;;  %v2815_v47 = vld [vmem:[%s3072_s16 + $0x88] sm:$0xff] }
 0x3c3   : > { %2699 = vmatmul.msk.f32.gmra.mxu2 %vm1693_vm4, %v2195_v37  ;;  %v1280_v7 = vpop.permute.xlu0 %1279 }
 0x3c4   : > { %v1821_v61 = vsel %vm339_vm0, %v1789_v56, %v1280_v7  ;;  %v2200_v56 = vmax.f32 %v2151_v23, 0.0 }
 0x3c7   : > { %v1381_v19 = vpop.permute.xlu1 %1380  ;;  %v2366_v52 = vpop.f32.mrf.mxu2 }
 0x3c8   : > { %v1854_v14 = vsel %vm1822_vm8, %v1821_v61, %v1381_v19  ;;  %v2367_v57 = vadd.f32 %v4728_v54, %v2366_v52  ;;  %v2159_v34 = vpop.f32.mrf.mxu3  ;;  %v2154_v61 = vadd.f32 %v4525_v63, %v4758_v4 }
 0x3c9   : > { %v1887_v22 = vsel %vm1855_vm7, %v1854_v14, %v1475_v15  ;;  %v2160_v33 = vadd.f32 %v4525_v63, %v2159_v34 }
 0x3ca   : > { %v2436_v3 = vadd.f32 %v2811_v49, %v2367_v57  ;;  %v1920_v26 = vsel %vm1888_vm9, %v1887_v22, %v1568_v18  ;;  %v2814_v18 = vld [vmem:[%s3072_s16 + $0x80] sm:$0xff]  ;;  %v2201_v14 = vmax.f32 %v2154_v61, 0.0 }
 0x3cb   : > { %v1953_v53 = vsel %vm1921_vm10, %v1920_v26, %v1661_v9  ;;  %v2203_v39 = vmax.f32 %v2160_v33, 0.0 }
 0x3cc   : > { %v2468_v8 = vmax.f32 %v2436_v3, 0.0  ;;  %2680 = vmatmul.msk.f32.gmra.mxu3 %vm1967_vm11, %v1953_v53  ;;  %v2816_v3 = vld [vmem:[%s3072_s16 + $0x90] sm:$0xff] }
 0x3ce   : > { %2500 = vst.msk [vmem:[%s4189_s17 + $0x68] sm:$0xff] %vm339_vm0, %v2468_v8 }
 0x3d4   : > { %2706 = vmatmul.msk.f32.vlgmr.msra.gmra.mxu3 %vm1693_vm4, %v2202_v1  ;;  %v2817_v1 = vld [vmem:[%s3072_s16 + $0xc8] sm:$0xff] }
 0x3d6   : > { %v2369_v59 = vpop.f32.mrf.mxu2 }
 0x3d7   : > { %v2370_v11 = vadd.f32 %v4728_v54, %v2369_v59 }
 0x3d9   : > { %v2437_v40 = vadd.f32 %v2812_v29, %v2370_v11 }
 0x3da   : > { %v2138_v6 = vpop.f32.mrf.mxu1 }
 0x3db   : > { %v2469_v16 = vmax.f32 %v2437_v40, 0.0  ;;  %v2139_v10 = vadd.f32 %v4525_v63, %v2138_v6 }
 0x3dc   : > { %2707 = vmatmul.msk.f32.gmra.mxu3 %vm1693_vm4, %v2203_v39 }
 0x3dd   : > { %2501 = vst.msk [vmem:[%s4189_s17 + $0x70] sm:$0xff] %vm339_vm0, %v2469_v16  ;;  %v2196_v2 = vmax.f32 %v2139_v10, 0.0  ;;  %v2819_v16 = vld [vmem:[%s3072_s16 + $0x98] sm:$0xff] }
 0x3df   : > { %2700 = vmatmul.msk.f32.gmra.mxu2 %vm1693_vm4, %v2196_v2 }
 0x3e5   : > { %v2162_v30 = vpop.f32.mrf.mxu3 }
 0x3e6   : > { %v2163_v28 = vadd.f32 %v4525_v63, %v2162_v30 }
 0x3e8   : > { %v2204_v20 = vmax.f32 %v2163_v28, 0.0 }
 0x3ea   : > { %2708 = vmatmul.msk.f32.gmra.mxu3 %vm1693_vm4, %v2204_v20  ;;  %v2820_v20 = vld [vmem:[%s3072_s16 + $0xd8] sm:$0xff] }
 0x3ee   : > { %v2372_v41 = vpop.f32.mrf.mxu2 }
 0x3ef   : > { %v2373_v0 = vadd.f32 %v4728_v54, %v2372_v41 }
 0x3f1   : > { %v2438_v38 = vadd.f32 %v2813_v32, %v2373_v0 }
 0x3f3   : > { %v2470_v35 = vmax.f32 %v2438_v38, 0.0  ;;  %v2141_v42 = vpop.f32.mrf.mxu1 }
 0x3f4   : > { %v2142_v15 = vadd.f32 %v4525_v63, %v2141_v42 }
 0x3f5   : > { %2502 = vst.msk [vmem:[%s4189_s17 + $0x78] sm:$0xff] %vm339_vm0, %v2470_v35  ;;  %v2821_v35 = vld [vmem:[%s3072_s16 + $0xa0] sm:$0xff] }
 0x3f6   : > { %v2197_v43 = vmax.f32 %v2142_v15, 0.0 }
 0x3f8   : > { %2701 = vmatmul.msk.f32.gmra.mxu2 %vm1693_vm4, %v2197_v43 }
 0x404   : > { %v2165_v60 = vpop.f32.mrf.mxu3 }
 0x405   : > { %v2166_v13 = vadd.f32 %v4525_v63, %v2165_v60 }
 0x407   : > { %v2205_v46 = vmax.f32 %v2166_v13, 0.0  ;;  %v2822_v13 = vld [vmem:[%s3072_s16 + $0xe0] sm:$0xff] }
 0x409   : > { %2709 = vmatmul.msk.f32.gmra.mxu3 %vm1693_vm4, %v2205_v46 }
 0x40a   : > { %v2375_v12 = vpop.f32.mrf.mxu2 }
 0x40b   : > { %v2376_v55 = vadd.f32 %v4728_v54, %v2375_v12 }
 0x40d   : > { %v2439_v5 = vadd.f32 %v2814_v18, %v2376_v55 }
 0x40f   : > { %v2471_v27 = vmax.f32 %v2439_v5, 0.0  ;;  %v2823_v5 = vld [vmem:[%s3072_s16 + $0xa8] sm:$0xff] }
 0x411   : > { %2503 = vst.msk [vmem:[%s4189_s17 + $0x80] sm:$0xff] %vm339_vm0, %v2471_v27 }
 0x413   : > { %v2144_v44 = vpop.f32.mrf.mxu1 }
 0x414   : > { %v2145_v17 = vadd.f32 %v4525_v63, %v2144_v44 }
 0x416   : > { %v2198_v31 = vmax.f32 %v2145_v17, 0.0 }
 0x418   : > { %2702 = vmatmul.msk.f32.gmra.mxu2 %vm1693_vm4, %v2198_v31 }
 0x423   : > { %v2378_v62 = vpop.f32.mrf.mxu2 }
 0x424   : > { %v2168_v58 = vpop.f32.mrf.mxu3  ;;  %v2379_v51 = vadd.f32 %v4728_v54, %v2378_v62  ;;  %v2824_v62 = vld [vmem:[%s3072_s16 + $0xe8] sm:$0xff] }
 0x425   : > { %v2169_v9 = vadd.f32 %v4525_v63, %v2168_v58 }
 0x426   : > { %v2440_v37 = vadd.f32 %v2815_v47, %v2379_v51 }
 0x427   : > { %v2206_v25 = vmax.f32 %v2169_v9, 0.0 }
 0x428   : > { %v2472_v45 = vmax.f32 %v2440_v37, 0.0  ;;  %v2825_v37 = vld [vmem:[%s3072_s16 + $0xb0] sm:$0xff] }
 0x429   : > { %2710 = vmatmul.msk.f32.gmra.mxu3 %vm1693_vm4, %v2206_v25 }
 0x42a   : > { %2504 = vst.msk [vmem:[%s4189_s17 + $0x88] sm:$0xff] %vm339_vm0, %v2472_v45 }
 0x433   : > { %v2147_v50 = vpop.f32.mrf.mxu1 }
 0x434   : > { %v2148_v7 = vadd.f32 %v4525_v63, %v2147_v50 }
 0x436   : > { %v2199_v24 = vmax.f32 %v2148_v7, 0.0 }
 0x438   : > { %2703 = vmatmul.msk.f32.gmra.mxu2 %vm1693_vm4, %v2199_v24  ;;  %v2826_v24 = vld [vmem:[%s3072_s16 + $0xb8] sm:$0xff] }
 0x440   : > { %2704 = vmatmul.msk.f32.gmra.mxu2 %vm1693_vm4, %v2200_v56 }
 0x444   : > { %v2171_v19 = vpop.f32.mrf.mxu3 }
 0x445   : > { %v2172_v52 = vadd.f32 %v4525_v63, %v2171_v19 }
 0x446   : > { %v2381_v57 = vpop.f32.mrf.mxu2 }
 0x447   : > { %v2207_v22 = vmax.f32 %v2172_v52, 0.0  ;;  %v2382_v49 = vadd.f32 %v4728_v54, %v2381_v57  ;;  %v2827_v57 = vld [vmem:[%s3072_s16 + $0xc0] sm:$0xff] }
 0x448   : > { %2705 = vmatmul.msk.f32.gmra.mxu2 %vm1693_vm4, %v2201_v14 }
 0x449   : > { %v2441_v48 = vadd.f32 %v2816_v3, %v2382_v49  ;;  %2711 = vmatmul.msk.f32.gmra.mxu3 %vm1693_vm4, %v2207_v22  ;;  %v2828_v49 = vld [vmem:[%s3072_s16 + $0xf0] sm:$0xff] }
 0x44b   : > { %v2473_v26 = vmax.f32 %v2441_v48, 0.0 }
 0x44d   : > { %2505 = vst.msk [vmem:[%s4189_s17 + $0x90] sm:$0xff] %vm339_vm0, %v2473_v26 }
 0x44f   : > { %v2174_v4 = vpop.f32.mrf.mxu3 }
 0x450   : > { %v2175_v21 = vadd.f32 %v4525_v63, %v2174_v4  ;;  %v2818_v63 = vld [vmem:[%s3072_s16 + $0xd0] sm:$0xff] }
 0x452   : > { %v2208_v53 = vmax.f32 %v2175_v21, 0.0 }
 0x454   : > { %2712 = vmatmul.msk.f32.gmra.mxu3 %vm1693_vm4, %v2208_v53  ;;  %v2829_v53 = vld [vmem:[%s3072_s16 + $0xf8] sm:$0xff] }
 0x457   : > { %v2402_v8 = vpop.f32.mrf.mxu3 }
 0x458   : > { %v2403_v36 = vadd.f32 %v4728_v54, %v2402_v8 }
 0x45a   : > { %v2448_v34 = vadd.f32 %v2817_v1, %v2403_v36 }
 0x45c   : > { %v2480_v33 = vmax.f32 %v2448_v34, 0.0 }
 0x45e   : > { %2512 = vst.msk [vmem:[%s4189_s17 + $0xc8] sm:$0xff] %vm339_vm0, %v2480_v33 }
 0x45f   : > { %v2405_v59 = vpop.f32.mrf.mxu3 }
 0x460   : > { %v2406_v11 = vadd.f32 %v4728_v54, %v2405_v59 }
 0x462   : > { %v2449_v29 = vadd.f32 %v2818_v63, %v2406_v11  ;;  %v2384_v40 = vpop.f32.mrf.mxu2 }
 0x463   : > { %v2385_v39 = vadd.f32 %v4728_v54, %v2384_v40 }
 0x464   : > { %v2481_v6 = vmax.f32 %v2449_v29, 0.0 }
 0x465   : > { %v2442_v10 = vadd.f32 %v2819_v16, %v2385_v39 }
 0x466   : > { %2513 = vst.msk [vmem:[%s4189_s17 + $0xd0] sm:$0xff] %vm339_vm0, %v2481_v6 }
 0x467   : > { %v2474_v2 = vmax.f32 %v2442_v10, 0.0 }
 0x469   : > { %2506 = vst.msk [vmem:[%s4189_s17 + $0x98] sm:$0xff] %vm339_vm0, %v2474_v2 }
 0x46d   : > { %v2408_v30 = vpop.f32.mrf.mxu3 }
 0x46e   : > { %v2409_v28 = vadd.f32 %v4728_v54, %v2408_v30 }
 0x470   : > { %v2450_v41 = vadd.f32 %v2820_v20, %v2409_v28 }
 0x472   : > { %v2482_v0 = vmax.f32 %v2450_v41, 0.0 }
 0x474   : > { %2514 = vst.msk [vmem:[%s4189_s17 + $0xd8] sm:$0xff] %vm339_vm0, %v2482_v0 }
 0x47b   : > { %v2387_v32 = vpop.f32.mrf.mxu2 }
 0x47c   : > { %v2388_v38 = vadd.f32 %v4728_v54, %v2387_v32 }
 0x47e   : > { %v2443_v42 = vadd.f32 %v2821_v35, %v2388_v38 }
 0x480   : > { %v2475_v15 = vmax.f32 %v2443_v42, 0.0 }
 0x482   : > { %2507 = vst.msk [vmem:[%s4189_s17 + $0xa0] sm:$0xff] %vm339_vm0, %v2475_v15 }
 0x48c   : > { %v2411_v43 = vpop.f32.mrf.mxu3 }
 0x48d   : > { %v2412_v60 = vadd.f32 %v4728_v54, %v2411_v43 }
 0x48f   : > { %v2451_v46 = vadd.f32 %v2822_v13, %v2412_v60 }
 0x491   : > { %v2483_v12 = vmax.f32 %v2451_v46, 0.0 }
 0x493   : > { %2515 = vst.msk [vmem:[%s4189_s17 + $0xe0] sm:$0xff] %vm339_vm0, %v2483_v12 }
 0x49b   : > { %v2390_v55 = vpop.f32.mrf.mxu2 }
 0x49c   : > { %v2391_v18 = vadd.f32 %v4728_v54, %v2390_v55 }
 0x49e   : > { %v2444_v27 = vadd.f32 %v2823_v5, %v2391_v18 }
 0x4a0   : > { %v2476_v44 = vmax.f32 %v2444_v27, 0.0 }
 0x4a2   : > { %2508 = vst.msk [vmem:[%s4189_s17 + $0xa8] sm:$0xff] %vm339_vm0, %v2476_v44 }
 0x4ac   : > { %v2414_v17 = vpop.f32.mrf.mxu3 }
 0x4ad   : > { %v2415_v31 = vadd.f32 %v4728_v54, %v2414_v17 }
 0x4af   : > { %v2452_v58 = vadd.f32 %v2824_v62, %v2415_v31 }
 0x4b1   : > { %v2484_v51 = vmax.f32 %v2452_v58, 0.0 }
 0x4b3   : > { %2516 = vst.msk [vmem:[%s4189_s17 + $0xe8] sm:$0xff] %vm339_vm0, %v2484_v51 }
 0x4bb   : > { %v2393_v9 = vpop.f32.mrf.mxu2 }
 0x4bc   : > { %v2394_v47 = vadd.f32 %v4728_v54, %v2393_v9 }
 0x4be   : > { %v2445_v25 = vadd.f32 %v2825_v37, %v2394_v47 }
 0x4c0   : > { %v2477_v45 = vmax.f32 %v2445_v25, 0.0 }
 0x4c2   : > { %2509 = vst.msk [vmem:[%s4189_s17 + $0xb0] sm:$0xff] %vm339_vm0, %v2477_v45 }
 0x4c3   : > { %v2396_v50 = vpop.f32.mrf.mxu2 }
 0x4c4   : > { %v2397_v7 = vadd.f32 %v4728_v54, %v2396_v50 }
 0x4c6   : > { %v2446_v23 = vadd.f32 %v2826_v24, %v2397_v7 }
 0x4c8   : > { %v2478_v56 = vmax.f32 %v2446_v23, 0.0 }
 0x4ca   : > { %2510 = vst.msk [vmem:[%s4189_s17 + $0xb8] sm:$0xff] %vm339_vm0, %v2478_v56 }
 0x4cb   : > { %v2399_v61 = vpop.f32.mrf.mxu2 }
 0x4cc   : > { %v2400_v19 = vadd.f32 %v4728_v54, %v2399_v61  ;;  %v2417_v52 = vpop.f32.mrf.mxu3 }
 0x4cd   : > { %v2418_v14 = vadd.f32 %v4728_v54, %v2417_v52 }
 0x4ce   : > { %v2447_v22 = vadd.f32 %v2827_v57, %v2400_v19 }
 0x4cf   : > { %v2453_v3 = vadd.f32 %v2828_v49, %v2418_v14 }
 0x4d0   : > { %v2479_v48 = vmax.f32 %v2447_v22, 0.0 }
 0x4d1   : > { %v2485_v26 = vmax.f32 %v2453_v3, 0.0 }
 0x4d2   : > { %2511 = vst.msk [vmem:[%s4189_s17 + $0xc0] sm:$0xff] %vm339_vm0, %v2479_v48 }
 0x4d3   : > { %2517 = vst.msk [vmem:[%s4189_s17 + $0xf0] sm:$0xff] %vm339_vm0, %v2485_v26 }
 0x4d7   : > { %v2420_v4 = vpop.f32.mrf.mxu3 }
 0x4d8   : > { %v2421_v21 = vadd.f32 %v4728_v54, %v2420_v4 }
 0x4da   : > { %v2454_v8 = vadd.f32 %v2829_v53, %v2421_v21 }
 0x4dc   : > { %v2486_v36 = vmax.f32 %v2454_v8, 0.0 }
 0x4de   : > { %2518 = vst.msk [vmem:[%s4189_s17 + $0xf8] sm:$0xff] %vm339_vm0, %v2486_v36 }
 0x4df   : > { %2887 = shalt.err (!%p2884_p4)
}
 0x4e0   : > { %s2939_s22 = smov 128  }
 0x4e1   : > { %2736 = dma.vmem_to_hbm [thread:$0]  (%p3030_p11), %s2533_s15, 4096, %s2535_s10, %s2520_s9, %s2939_s22, %s2939_s22, %s2931_s19  }
 0x4e2 PF: > { %s2549_s17 = sand.u32 1, %s2914_s24   ;;  %p5092_p7 = scmp.ge.s32.totalorder %s2926_s27, 2 }
 0x4e3   : > { %s2550_s8 = scalar_lea.sflag [#allocation4], %s2549_s17 }
 0x4e4   : > { %p2743_p5 = pnand %p5092_p7, %p3034_p12 }
 0x4e6   : > { %p2744_p8 = pneg %p2743_p5 }
 0x4e8   : > { %2909 = dma.done.wait (%p2744_p8), %s2550_s8, 4096  }
 0x4e9   : > { %2911 = vsyncadd (%p2744_p8), %s2550_s8, 4294963200  ;;  %s5093_s11 = sld [smem:[#allocation8_spill]]  ;;  %p20_p10 = scmp.ge.s32.totalorder %s3005_s30, 4  }
 0x4ea   : > { %s5094_s24 = smov %s2918_s25  ;;  %s5095_s25 = smov %s2922_s26 }
 0x4eb   : > { %s5097_s27 = smov %s3005_s30  ;;  %22 = sbr.rel (!%p20_p10) target bundleno = 5 (0x5), region = 93 }
 0x4ef   : > { %s5096_s26 = smov %s5093_s11 }
 0x4f0   :  { %2556 = vsyncpa [#allocation3], 1 }
 0x4f1   :  { %2558 = vsyncpa [#allocation3 + $0x1], 1 }
 0x4f2   :  { %2559 = vsyncpa [#allocation4], 1 }
 0x4f3   :  { %2561 = vsyncpa [#allocation4 + $0x1], 1 }

// kernel: tpu_custom_call.1
= control target key start
LH: loop header
LB: loop body
LE: loop exit
PB: predicated region body
PF: predicated region fallthrough
CT: control target
= control target key end

     0   :  { %12 = vsyncpa [#allocation3], 0  ;;  %s4912_s0 = inlined_call_operand.hbm [shape: f32[2,16,16,32], index: 0, kind: input, shape index: {}]   ;;  %s4913_s1 = inlined_call_operand.vmem [shape: f32[32,8], index: 1, kind: input, shape index: {}]   ;;  %s4914_s2 = inlined_call_operand.vmem [shape: f32[1,8], index: 2, kind: input, shape index: {}]   ;;  %s4915_s3 = inlined_call_operand.vmem [shape: f32[72,8], index: 3, kind: input, shape index: {}]   ;;  %s4916_s4 = inlined_call_operand.vmem [shape: f32[1,8], index: 4, kind: input, shape index: {}]   ;;  %s4917_s5 = inlined_call_operand.vmem [shape: f32[8,32], index: 5, kind: input, shape index: {}]   ;;  %s4918_s6 = inlined_call_operand.vmem [shape: f32[1,32], index: 6, kind: input, shape index: {}]   ;;  %s4919_s7 = inlined_call_operand.hbm [shape: f32[2,16,16,32], index: 7, kind: output, shape index: {}]  }
   0x1   :  { %14 = vsyncpa [#allocation3 + $0x1], 0 }
   0x2   :  { %15 = vsyncpa [#allocation4], 0 }
   0x3   :  { %17 = vsyncpa [#allocation4 + $0x1], 0  ;;  %s2980_s24 = smov 0   ;;  %s2982_s25 = smov 0  }
   0x4   :  { %s2984_s26 = smov 0   ;;  %s2986_s27 = smov 0  }
   0x5 LB: > { %s3001_s28 = sadd.s32 4294967295, %s2926_s27   ;;  %s2608_s29 = sadd.s32 4294967294, %s2926_s27   ;;  %s2926_s27 = sphi %s2986_s27, %s5097_s27   ;;  %s2922_s26 = sphi %s2984_s26, %s5096_s26   ;;  %s2918_s25 = sphi %s2982_s25, %s5095_s25   ;;  %s2914_s24 = sphi %s2980_s24, %s5094_s24  }
   0x6   : > { %s3005_s30 = sadd.s32 1, %s2926_s27   ;;  %s30_s8 = sadd.s32 1, %s2922_s26 }
   0x7   : > { %s27_s9 = ssub.s32 %s2926_s27, %s3005_s30  ;;  %p37_p0 = scmp.ne.s32.totalorder %s2922_s26, %s2918_s25 }
   0x8   : > { %p28_p1 = scmp.eq.s32.totalorder %s27_s9, 0  ;;  %p38_p2 = scmp.eq.s32.totalorder %s2926_s27, 0 }
   0x9   : > { %p43_p3 = scmp.ne.s32.totalorder %s2918_s25, %s2914_s24  ;;  %p44_p4 = scmp.eq.s32.totalorder %s3001_s28, 0 }
   0xa   : > { %s3017_s10 = scalar_select %p28_p1, %s2922_s26, %s30_s8  }
   0xb   : > { %p3019_p5 = por %p38_p2, %p37_p0  ;;  %p3023_p6 = por %p44_p4, %p43_p3 }
   0xc   : > { %4977 = sst [smem:[#allocation8_spill]] %s3017_s10  ;;  %p193_p7 = scmp.eq.s32.totalorder %s3001_s28, 1 }
   0xd   : > { %p199_p8 = scmp.eq.s32.totalorder %s2608_s29, 1  ;;  %p2746_p10 = scmp.lt.s32.totalorder %s2926_s27, 2 }
   0xe   : > { %p3030_p11 = por %p193_p7, %p37_p0  ;;  %s237_s15 = sand.u32 1, %s2922_s26  }
   0xf   : > { %p3034_p12 = por %p199_p8, %p43_p3  ;;  %s2718_s16 = sshll.u32 %s2926_s27, 8 }
  0x10   : > { %s2611_s17 = sshll.u32 %s237_s15, 8  ;;  %s246_s20 = scalar_lea.hbm %s4912_s0, %s2718_s16 }
  0x11   : > { %s247_s21 = sshll.u32 %s246_s20, 4  ;;  %s241_s22 = scalar_lea.vmem [#allocation2], %s2611_s17  ;;  %s248_s21 = int_to_ptr.hbm [resolvable:$true] %s247_s21 }
  0x12   : > { %s249_s23 = sshll.u32 %s241_s22, 4  ;;  %p3045_p13 = pnand %p2746_p10, %p3019_p5  ;;  %s250_s23 = int_to_ptr.vmem [resolvable:$true] %s249_s23 }
  0x13   : > { %p2614_p0 = scmp.ge.s32.totalorder %s2926_s27, 1  ;;  %p257_p1 = scmp.lt.s32.totalorder %s2926_s27, 3 }
  0x14   : > { %s238_s8 = scalar_lea.sflag [#allocation3], %s237_s15  ;;  %s2830_s9 = sshra.s32 %s248_s21, 4  ;;  %s2831_s9 = int_to_ptr.hbm [resolvable:$true] %s2830_s9 }
  0x15   : > { %s2832_s10 = scalar_lea.hbm %s2831_s9, 256  ;;  %p2834_p3 = pneg %p3045_p13 }
  0x16   : > { %p2833_p2 = scmp.ne.s32.totalorder %s2831_s9, %s2832_s10  ;;  %s2837_s11 = scalar_lea.hbm %s4912_s0, 512 }
  0x17   : > { %p2838_p5 = scmp.lt.s32.totalorder %s2831_s9, %s4912_s0  ;;  %p2839_p8 = scmp.lt.s32.totalorder %s2837_s11, %s2832_s10 }
  0x18   : > { %p2835_p4 = pnand %p2834_p3, %p2833_p2 }
  0x19   : > { %p2840_p10 = por %p2839_p8, %p2838_p5 }
  0x1a   : > { %p2836_p7 = pneg %p2835_p4 }
  0x1c   : > { %p2841_p9 = pnand %p2840_p10, %p2836_p7 }
  0x1e   : > { %2844 = shalt.err (!%p2841_p9)
}
  0x1f   : > { %s2928_s15 = smov 128   ;;  %s2929_s20 = smov 8  }
  0x20   : > { %2741 = dma.hbm_to_vmem [thread:$0]  (!%p3045_p13), %s248_s21, 4096, %s250_s23, %s238_s8, %s2928_s15, %s2928_s15, %s2929_s20  }
  0x21   : > { %p258_p2 = pnand %p2614_p0, %p257_p1 }
  0x23   : > { %261 = sbr.rel (%p258_p2) target bundleno = 1250 (0x4e2), region = 48 }
  0x28   : > { %s3066_s22 = sand.u32 1, %s2918_s25  }
  0x29   : > { %s4920_s10 = sshll.u32 %s3066_s22, 8  ;;  %s264_s9 = scalar_lea.sflag [#allocation3], %s3066_s22 }
  0x2a   : > { %s3072_s16 = scalar_lea.vmem [#allocation2], %s4920_s10 }
  0x2b   : > { %2905 = dma.done.wait (%p3023_p6), %s264_s9, 4096  }
  0x2c   : > { %2907 = vsyncadd (%p3023_p6), %s264_s9, 4294963200  ;;  %v334_v0 = vld [vmem:[%s4913_s1 + $0x18] sm:$0xff]  ;;  %v333_v1 = vld [vmem:[%s4913_s1 + $0x10] sm:$0xff]  ;;  %vm339_vm0 = vcmask 261120   ;;  %v4923_v19 = vmov 0.0   ;;  %s2931_s19 = smov 8  }
  0x2d   : > { %448 = vmatpush.msra.mxu0 %v334_v0  ;;  %2720 = vmatpush.msra.mxu3 %v334_v0  ;;  %v332_v2 = vld [vmem:[%s4913_s1 + $0x8] sm:$0xff]  ;;  %v331_v3 = vld [vmem:[%s4913_s1] sm:$0xff]  ;;  %v325_v7 = vld [vmem:[%s3072_s16 + $0xd0] sm:$0xff]  ;;  %v3121_v20 = vrot.slane %v4923_v19, 1  ;;  %v3124_v21 = vrot.slane %v4923_v19, 2  ;;  %s2932_s15 = smov 16  }
  0x2e   : > { %v299_v4 = vld [vmem:[%s3072_s16] sm:$0xff]  ;;  %v324_v5 = vld [vmem:[%s3072_s16 + $0xc8] sm:$0xff]  ;;  %v301_v8 = vld [vmem:[%s3072_s16 + $0x10] sm:$0xff]  ;;  %vm613_vm1 = vcmask 1040384   ;;  %s2933_s21 = smov 24   ;;  %vm943_vm2 = vcmask 1045504  }
  0x2f   : > { %449 = vmatpush.msra.mxu0 %v333_v1  ;;  %2721 = vmatpush.msra.mxu3 %v333_v1  ;;  %v300_v6 = vld [vmem:[%s3072_s16 + $0x8] sm:$0xff]  ;;  %v326_v9 = vld [vmem:[%s3072_s16 + $0xd8] sm:$0xff]  ;;  %v303_v11 = vld [vmem:[%s3072_s16 + $0x20] sm:$0xff]  ;;  %4983 = vst [vmem:[#allocation9_spill] sm:$0xff] %v3121_v20  ;;  %vm772_vm3 = vcmask 1046528   ;;  %s2934_s23 = smov 32  }
  0x30   : > { %v302_v10 = vld [vmem:[%s3072_s16 + $0x18] sm:$0xff]  ;;  %v327_v12 = vld [vmem:[%s3072_s16 + $0xe0] sm:$0xff]  ;;  %v304_v13 = vld [vmem:[%s3072_s16 + $0x28] sm:$0xff]  ;;  %4984 = vst [vmem:[#allocation10_spill] sm:$0xff] %v3124_v21  ;;  %850 = vrot.lane.b32.xlu0 %v3121_v20, %s2931_s19  ;;  %s2935_s29 = smov 40   ;;  %s2936_s8 = smov 48  }
  0x31   : > { %450 = vmatpush.msra.mxu0 %v332_v2  ;;  %2722 = vmatpush.msra.mxu3 %v332_v2  ;;  %v328_v14 = vld [vmem:[%s3072_s16 + $0xe8] sm:$0xff]  ;;  %v305_v15 = vld [vmem:[%s3072_s16 + $0x30] sm:$0xff]  ;;  %v306_v16 = vld [vmem:[%s3072_s16 + $0x38] sm:$0xff]  ;;  %s4921_s17 = smov 64   ;;  %s2938_s11 = smov 56   ;;  %vm1693_vm4 = vcmask 64512  }
  0x32   : > { %v307_v17 = vld [vmem:[%s3072_s16 + $0x40] sm:$0xff]  ;;  %v308_v18 = vld [vmem:[%s3072_s16 + $0x48] sm:$0xff]  ;;  %1021 = vrot.lane.b32.xlu1 %v3124_v21, %s2932_s15  ;;  %v309_v22 = vld [vmem:[%s3072_s16 + $0x50] sm:$0xff]  ;;  %vm1725_vm5 = vcmask 130048   ;;  %vm1757_vm6 = vcmask 195584   ;;  %s5001_s18 = smov 64  }
  0x33   : > { %451 = vmatpush.msra.mxu0 %v331_v3  ;;  %2723 = vmatpush.msra.mxu3 %v331_v3  ;;  %v310_v23 = vld [vmem:[%s3072_s16 + $0x58] sm:$0xff]  ;;  %v311_v24 = vld [vmem:[%s3072_s16 + $0x60] sm:$0xff]  ;;  %v312_v25 = vld [vmem:[%s3072_s16 + $0x68] sm:$0xff]  ;;  %vm1855_vm7 = vcmask 392192   ;;  %vm1822_vm8 = vcmask 326656   ;;  %vm1888_vm9 = vcmask 457728  }
  0x34   : > { %2617 = vmatmul.msk.f32.vlgmr.msra.gmra.mxu0 %vm339_vm0, %v299_v4  ;;  %2642 = vmatmul.msk.f32.vlgmr.msra.gmra.mxu3 %vm339_vm0, %v324_v5  ;;  %v313_v26 = vld [vmem:[%s3072_s16 + $0x70] sm:$0xff]  ;;  %v314_v27 = vld [vmem:[%s3072_s16 + $0x78] sm:$0xff]  ;;  %v3145_v28 = vld [vmem:[%s4914_s2] ss:$0 sm:$0xff]  ;;  %vm1921_vm10 = vcmask 523264   ;;  %vm1967_vm11 = vcmask 588800  }
  0x35   : > { %v315_v30 = vld [vmem:[%s3072_s16 + $0x80] sm:$0xff]  ;;  %v316_v36 = vld [vmem:[%s3072_s16 + $0x88] sm:$0xff]  ;;  %v317_v44 = vld [vmem:[%s3072_s16 + $0x90] sm:$0xff]  ;;  %s5037_s9 = sshll.u32 %s3066_s22, 8 }
  0x36   : > { %v318_v55 = vld [vmem:[%s3072_s16 + $0x98] sm:$0xff]  ;;  %v319_v1 = vld [vmem:[%s3072_s16 + $0xa0] sm:$0xff] }
  0x3c   : > { %2618 = vmatmul.msk.f32.gmra.mxu0 %vm339_vm0, %v300_v6  ;;  %2643 = vmatmul.msk.f32.gmra.mxu3 %vm339_vm0, %v325_v7 }
  0x44   : > { %2619 = vmatmul.msk.f32.gmra.mxu0 %vm339_vm0, %v301_v8  ;;  %2644 = vmatmul.msk.f32.gmra.mxu3 %vm339_vm0, %v326_v9  ;;  %v320_v9 = vld [vmem:[%s3072_s16 + $0xa8] sm:$0xff] }
  0x4c   : > { %2620 = vmatmul.msk.f32.gmra.mxu0 %vm339_vm0, %v302_v10  ;;  %2645 = vmatmul.msk.f32.gmra.mxu3 %vm339_vm0, %v327_v12 }
  0x54   : > { %2621 = vmatmul.msk.f32.gmra.mxu0 %vm339_vm0, %v303_v11  ;;  %2646 = vmatmul.msk.f32.gmra.mxu3 %vm339_vm0, %v328_v14 }
  0x5c   : > { %2622 = vmatmul.msk.f32.gmra.mxu0 %vm339_vm0, %v304_v13 }
  0x64   : > { %2623 = vmatmul.msk.f32.gmra.mxu0 %vm339_vm0, %v305_v15 }
  0x6c   : > { %2624 = vmatmul.msk.f32.gmra.mxu0 %vm339_vm0, %v306_v16 }
  0x74   : > { %2625 = vmatmul.msk.f32.gmra.mxu0 %vm339_vm0, %v307_v17 }
  0x7c   : > { %2626 = vmatmul.msk.f32.gmra.mxu0 %vm339_vm0, %v308_v18  ;;  %v321_v18 = vld [vmem:[%s3072_s16 + $0xb0] sm:$0xff] }
  0x84   : > { %2627 = vmatmul.msk.f32.gmra.mxu0 %vm339_vm0, %v309_v22 }
  0x8c   : > { %2628 = vmatmul.msk.f32.gmra.mxu0 %vm339_vm0, %v310_v23 }
  0x94   : > { %2629 = vmatmul.msk.f32.gmra.mxu0 %vm339_vm0, %v311_v24 }
  0x9c   : > { %2630 = vmatmul.msk.f32.gmra.mxu0 %vm339_vm0, %v312_v25 }
  0xa4   : > { %2631 = vmatmul.msk.f32.gmra.mxu0 %vm339_vm0, %v313_v26 }
  0xac   : > { %2632 = vmatmul.msk.f32.gmra.mxu0 %vm339_vm0, %v314_v27 }
  0xb1   : > { %v453_v29 = vpop.f32.mrf.mxu0 }
  0xb2   : > { %v454_v31 = vadd.f32 %v3145_v28, %v453_v29 }
  0xb4   : > { %v549_v32 = vmax.f32 %v454_v31, 0.0  ;;  %2633 = vmatmul.msk.f32.gmra.mxu0 %vm339_vm0, %v315_v30  ;;  %v322_v31 = vld [vmem:[%s3072_s16 + $0xb8] sm:$0xff] }
  0xb6   : > { %v614_v33 = vrot.slane %v549_v32, 7 }
  0xb7   : > { %v3156_v37 = vpop.f32.mrf.mxu3 }
  0xb8   : > { %v3151_v34 = vsel %vm613_vm1, 0.0, %v614_v33 }
  0xb9   : > { %v456_v35 = vpop.f32.mrf.mxu0  ;;  %1115 = vrot.lane.b32.xlu2 %v3151_v34, %s2933_s21  ;;  %v946_v45 = vrot.slane %v3151_v34, 2  ;;  %v775_v53 = vrot.slane %v3151_v34, 1 }
  0xba   : > { %v457_v38 = vadd.f32 %v3145_v28, %v456_v35 }
  0xbc   : > { %v550_v39 = vmax.f32 %v457_v38, 0.0  ;;  %2634 = vmatmul.msk.f32.gmra.mxu0 %vm339_vm0, %v316_v36 }
  0xbe   : > { %v615_v40 = vrot.slane %v550_v39, 7 }
  0xbf   : > { %v531_v50 = vpop.f32.mrf.mxu3 }
  0xc0   : > { %v725_v41 = vsel %vm613_vm1, %v615_v40, 0.0  ;;  %v3162_v42 = vsel %vm613_vm1, %v614_v33, %v615_v40  ;;  %v532_v62 = vadd.f32 %v3145_v28, %v531_v50 }
  0xc1   : > { %v778_v43 = vrot.slane %v725_v41, 1  ;;  %1117 = vrot.lane.b32.xlu0 %v3162_v42, %s2933_s21  ;;  %v947_v46 = vrot.slane %v3162_v42, 2  ;;  %v776_v47 = vrot.slane %v3162_v42, 1  ;;  %v459_v51 = vpop.f32.mrf.mxu0  ;;  %v949_v57 = vrot.slane %v725_v41, 2 }
  0xc2   : > { %v460_v52 = vadd.f32 %v3145_v28, %v459_v51  ;;  %v575_v4 = vmax.f32 %v532_v62, 0.0 }
  0xc3   : > { %v948_v48 = vsel %vm943_vm2, %v946_v45, %v947_v46  ;;  %v779_v49 = vsel %vm772_vm3, %v776_v47, %v778_v43  ;;  %v777_v54 = vsel %vm772_vm3, %v775_v53, %v776_v47  ;;  %v950_v0 = vsel %vm943_vm2, %v947_v46, %v949_v57  ;;  %v323_v43 = vld [vmem:[%s3072_s16 + $0xc0] sm:$0xff] }
  0xc4   : > { %2635 = vmatmul.msk.f32.gmra.mxu0 %vm339_vm0, %v317_v44  ;;  %1023 = vrot.lane.b32.xlu2 %v948_v48, %s2932_s15  ;;  %v551_v56 = vmax.f32 %v460_v52, 0.0  ;;  %v653_v7 = vrot.slane %v575_v4, 7 }
  0xc5   : > { %854 = vrot.lane.b32.xlu1 %v779_v49, %s2931_s19 }
  0xc6   : > { %v617_v59 = vrot.slane %v551_v56, 7  ;;  %v3213_v17 = vsel %vm613_vm1, 0.0, %v653_v7 }
  0xc7   : > { %v534_v58 = vpop.f32.mrf.mxu3  ;;  %4986 = vst [vmem:[#allocation12_spill] sm:$0xff] %v3213_v17  ;;  %v840_v25 = vrot.slane %v3213_v17, 1  ;;  %v1011_v30 = vrot.slane %v3213_v17, 2 }
  0xc8   : > { %v535_v63 = vadd.f32 %v3145_v28, %v534_v58  ;;  %v3190_v2 = vsel %vm613_vm1, 0.0, %v617_v59 }
  0xc9   : > { %852 = vrot.lane.b32.xlu0 %v777_v54, %s2931_s19  ;;  %v462_v60 = vpop.f32.mrf.mxu0  ;;  %v951_v35 = vrot.slane %v3190_v2, 2  ;;  %v780_v40 = vrot.slane %v3190_v2, 1 }
  0xca   : > { %v463_v61 = vadd.f32 %v3145_v28, %v462_v60  ;;  %v576_v5 = vmax.f32 %v535_v63, 0.0 }
  0xcc   : > { %2636 = vmatmul.msk.f32.gmra.mxu0 %vm339_vm0, %v318_v55  ;;  %1217 = vrot.lane.b32.xlu2 %v777_v54, %s2934_s23  ;;  %v552_v3 = vmax.f32 %v463_v61, 0.0  ;;  %v654_v8 = vrot.slane %v576_v5, 7 }
  0xcd   : > { %1219 = vrot.lane.b32.xlu1 %v779_v49, %s2934_s23 }
  0xce   : > { %v618_v6 = vrot.slane %v552_v3, 7  ;;  %v3202_v11 = vsel %vm613_vm1, %v653_v7, %v654_v8  ;;  %v738_v12 = vsel %vm613_vm1, %v654_v8, 0.0 }
  0xcf   : > { %4985 = vst [vmem:[#allocation11_spill] sm:$0xff] %v3202_v11  ;;  %v1014_v13 = vrot.slane %v738_v12, 2  ;;  %v1012_v14 = vrot.slane %v3202_v11, 2  ;;  %v843_v15 = vrot.slane %v738_v12, 1  ;;  %v841_v16 = vrot.slane %v3202_v11, 1  ;;  %v537_v41 = vpop.f32.mrf.mxu3 }
  0xd0   : > { %v3199_v10 = vsel %vm613_vm1, %v617_v59, %v618_v6  ;;  %v726_v23 = vsel %vm613_vm1, %v618_v6, 0.0  ;;  %v538_v49 = vadd.f32 %v3145_v28, %v537_v41 }
  0xd1   : > { %1025 = vrot.lane.b32.xlu0 %v950_v0, %s2932_s15  ;;  %v3219_v22 = vsel %vm943_vm2, %v1012_v14, %v1014_v13  ;;  %v3224_v24 = vsel %vm772_vm3, %v841_v16, %v843_v15  ;;  %v783_v26 = vrot.slane %v726_v23, 1  ;;  %v781_v27 = vrot.slane %v3199_v10, 1  ;;  %v465_v46 = vpop.f32.mrf.mxu0 }
  0xd2   : > { %4987 = vst [vmem:[#allocation13_spill] sm:$0xff] %v3219_v22  ;;  %v3233_v29 = vsel %vm772_vm3, %v840_v25, %v841_v16  ;;  %v3242_v33 = vsel %vm943_vm2, %v1011_v30, %v1012_v14  ;;  %v952_v36 = vrot.slane %v3199_v10, 2  ;;  %v954_v38 = vrot.slane %v726_v23, 2 }
  0xd3   : > { %4988 = vst [vmem:[#allocation14_spill] sm:$0xff] %v3224_v24  ;;  %v784_v32 = vsel %vm772_vm3, %v781_v27, %v783_v26  ;;  %v782_v45 = vsel %vm772_vm3, %v780_v40, %v781_v27  ;;  %v466_v47 = vadd.f32 %v3145_v28, %v465_v46  ;;  %v577_v52 = vmax.f32 %v538_v49, 0.0 }
  0xd4   : > { %2637 = vmatmul.msk.f32.gmra.mxu0 %vm339_vm0, %v319_v1  ;;  %1320 = vrot.lane.b32.xlu2 %v950_v0, %s2935_s29  ;;  %4989 = vst [vmem:[#allocation15_spill] sm:$0xff] %v3233_v29  ;;  %v953_v39 = vsel %vm943_vm2, %v951_v35, %v952_v36  ;;  %v955_v44 = vsel %vm943_vm2, %v952_v36, %v954_v38 }
  0xd5   : > { %1119 = vrot.lane.b32.xlu1 %v3190_v2, %s2933_s21  ;;  %4990 = vst [vmem:[#allocation16_spill] sm:$0xff] %v3242_v33  ;;  %v553_v51 = vmax.f32 %v466_v47, 0.0  ;;  %v656_v55 = vrot.slane %v577_v52, 7  ;;  %v1961_v52 = vld [vmem:[%s4915_s3 + $0x38] sm:$0xff] }
  0xd7   : > { %v620_v54 = vrot.slane %v553_v51, 7  ;;  %v3284_v4 = vsel %vm613_vm1, 0.0, %v656_v55 }
  0xd8   : > { %4993 = vst [vmem:[#allocation19_spill] sm:$0xff] %v3284_v4  ;;  %v1016_v6 = vrot.slane %v3284_v4, 2 }
  0xd9   : > { %1318 = vrot.lane.b32.xlu0 %v948_v48, %s2935_s29  ;;  %v540_v48 = vpop.f32.mrf.mxu3  ;;  %v3268_v57 = vsel %vm613_vm1, 0.0, %v620_v54  ;;  %v468_v58 = vpop.f32.mrf.mxu0 }
  0xda   : > { %v541_v50 = vadd.f32 %v3145_v28, %v540_v48  ;;  %v469_v59 = vadd.f32 %v3145_v28, %v468_v58  ;;  %v785_v23 = vrot.slane %v3268_v57, 1  ;;  %v1962_v48 = vld [vmem:[%s4915_s3 + $0x40] sm:$0xff]  ;;  %v1959_v58 = vld [vmem:[%s4915_s3 + $0x28] sm:$0xff] }
  0xdb   : > { %2071 = vmatpush.msra.mxu1 %v1962_v48  ;;  %2724 = vmatpush.msrb.mxu3 %v1962_v48 }
  0xdc   : > { %2638 = vmatmul.msk.f32.gmra.mxu0 %vm339_vm0, %v320_v9  ;;  %1121 = vrot.lane.b32.xlu2 %v3199_v10, %s2933_s21  ;;  %v578_v53 = vmax.f32 %v541_v50, 0.0  ;;  %v554_v62 = vmax.f32 %v469_v59, 0.0  ;;  %v845_v9 = vrot.slane %v3284_v4, 1 }
  0xdd   : > { %1414 = vrot.lane.b32.xlu1 %v3190_v2, %s2936_s8  ;;  %2072 = vmatpush.msra.mxu1 %v1961_v52 }
  0xde   : > { %v657_v56 = vrot.slane %v578_v53, 7  ;;  %v621_v1 = vrot.slane %v554_v62, 7  ;;  %2725 = vmatpush.msrb.mxu3 %v1961_v52  ;;  %v1958_v62 = vld [vmem:[%s4915_s3 + $0x20] sm:$0xff] }
  0xe0   : > { %v3272_v60 = vsel %vm613_vm1, %v656_v55, %v657_v56  ;;  %v739_v61 = vsel %vm613_vm1, %v657_v56, 0.0  ;;  %v3289_v5 = vsel %vm613_vm1, %v620_v54, %v621_v1  ;;  %v727_v13 = vsel %vm613_vm1, %v621_v1, 0.0  ;;  %v1960_v55 = vld [vmem:[%s4915_s3 + $0x30] sm:$0xff] }
  0xe1   : > { %1416 = vrot.lane.b32.xlu0 %v3199_v10, %s2936_s8  ;;  %4991 = vst [vmem:[#allocation17_spill] sm:$0xff] %v3272_v60  ;;  %v848_v63 = vrot.slane %v739_v61, 1  ;;  %v846_v0 = vrot.slane %v3272_v60, 1  ;;  %v1017_v7 = vrot.slane %v3272_v60, 2  ;;  %v788_v15 = vrot.slane %v727_v13, 1  ;;  %v471_v40 = vpop.f32.mrf.mxu0  ;;  %2073 = vmatpush.msra.mxu1 %v1960_v55 }
  0xe2   : > { %v786_v16 = vrot.slane %v3289_v5, 1  ;;  %v1019_v25 = vrot.slane %v739_v61, 2  ;;  %v959_v36 = vrot.slane %v727_v13, 2  ;;  %2726 = vmatpush.msrb.mxu3 %v1960_v55 }
  0xe3   : > { %v3281_v3 = vsel %vm772_vm3, %v846_v0, %v848_v63  ;;  %v3301_v12 = vsel %vm943_vm2, %v1016_v6, %v1017_v7  ;;  %v3307_v14 = vsel %vm772_vm3, %v845_v9, %v846_v0  ;;  %2074 = vmatpush.msra.mxu1 %v1959_v58  ;;  %v1957_v0 = vld [vmem:[%s4915_s3 + $0x18] sm:$0xff]  ;;  %v1955_v9 = vld [vmem:[%s4915_s3 + $0x8] sm:$0xff] }
  0xe4   : > { %2639 = vmatmul.msk.f32.gmra.mxu0 %vm339_vm0, %v321_v18  ;;  %1077 = vrot.lane.b32.xlu2 %v3219_v22, %s2932_s15  ;;  %4992 = vst [vmem:[#allocation18_spill] sm:$0xff] %v3281_v3  ;;  %v789_v26 = vsel %vm772_vm3, %v786_v16, %v788_v15  ;;  %v787_v27 = vsel %vm772_vm3, %v785_v23, %v786_v16  ;;  %v1954_v23 = vld [vmem:[%s4915_s3] sm:$0xff] }
  0xe5   : > { %906 = vrot.lane.b32.xlu1 %v3224_v24, %s2931_s19  ;;  %4994 = vst [vmem:[#allocation20_spill] sm:$0xff] %v3301_v12  ;;  %v3321_v30 = vsel %vm943_vm2, %v1017_v7, %v1019_v25  ;;  %2727 = vmatpush.msrb.mxu3 %v1959_v58  ;;  %v1956_v7 = vld [vmem:[%s4915_s3 + $0x10] sm:$0xff] }
  0xe6   : > { %4995 = vst [vmem:[#allocation21_spill] sm:$0xff] %v3307_v14  ;;  %2075 = vmatpush.msra.mxu1 %v1958_v62 }
  0xe7   : > { %4996 = vst [vmem:[#allocation22_spill] sm:$0xff] %v3321_v30  ;;  %2728 = vmatpush.msrb.mxu3 %v1958_v62 }
  0xe8   : > { %2076 = vmatpush.msra.mxu1 %v1957_v0 }
  0xe9   : > { %904 = vrot.lane.b32.xlu0 %v3233_v29, %s2931_s19  ;;  %v474_v50 = vpop.f32.mrf.mxu0  ;;  %2729 = vmatpush.msrb.mxu3 %v1957_v0 }
  0xea   : > { %v475_v53 = vadd.f32 %v3145_v28, %v474_v50  ;;  %2077 = vmatpush.msra.mxu1 %v1956_v7 }
  0xeb   : > { %2730 = vmatpush.msrb.mxu3 %v1956_v7 }
  0xec   : > { %2640 = vmatmul.msk.f32.gmra.mxu0 %vm339_vm0, %v322_v31  ;;  %858 = vrot.lane.b32.xlu2 %v784_v32, %s2931_s19  ;;  %v956_v31 = vrot.slane %v3268_v57, 2  ;;  %v556_v59 = vmax.f32 %v475_v53, 0.0 }
  0xed   : > { %1075 = vrot.lane.b32.xlu1 %v3242_v33, %s2932_s15  ;;  %2078 = vmatpush.msra.mxu1 %v1955_v9 }
  0xee   : > { %v624_v1 = vrot.slane %v556_v59, 7  ;;  %2731 = vmatpush.msrb.mxu3 %v1955_v9 }
  0xef   : > { %2079 = vmatpush.msra.mxu1 %v1954_v23 }
  0xf0   : > { %v728_v16 = vsel %vm613_vm1, %v624_v1, 0.0  ;;  %2732 = vmatpush.msrb.mxu3 %v1954_v23 }
  0xf1   : > { %1600 = vrot.lane.b32.xlu0 %v953_v39, %s4921_s17  ;;  %v964_v53 = vrot.slane %v728_v16, 2 }
  0xf4   : > { %2641 = vmatmul.msk.f32.gmra.mxu0 %vm339_vm0, %v323_v43  ;;  %1029 = vrot.lane.b32.xlu2 %v955_v44, %s2932_s15  ;;  %v472_v43 = vadd.f32 %v3145_v28, %v471_v40  ;;  %v477_v40 = vpop.f32.mrf.mxu0 }
  0xf5   : > { %856 = vrot.lane.b32.xlu1 %v782_v45, %s2931_s19  ;;  %v478_v9 = vadd.f32 %v3145_v28, %v477_v40 }
  0xf6   : > { %v555_v46 = vmax.f32 %v472_v43, 0.0 }
  0xf8   : > { %v623_v49 = vrot.slane %v555_v46, 7 }
  0xf9   : > { %1221 = vrot.lane.b32.xlu0 %v782_v45, %s2934_s23 }
  0xfa   : > { %v3362_v56 = vsel %vm613_vm1, 0.0, %v623_v49  ;;  %v3393_v15 = vsel %vm613_vm1, %v623_v49, %v624_v1 }
  0xfb   : > { %4998 = vst [vmem:[#allocation24_spill] sm:$0xff] %v3393_v15  ;;  %v961_v48 = vrot.slane %v3362_v56, 2  ;;  %v962_v49 = vrot.slane %v3393_v15, 2 }
  0xfc   : > { %1507 = vrot.lane.b32.xlu2 %v782_v45, %s2938_s11  ;;  %v3340_v45 = vpop.permute.xlu1 %1021  ;;  %v480_v55 = vpop.f32.mrf.mxu0 }
  0xfd   : > { %1027 = vrot.lane.b32.xlu1 %v953_v39, %s2932_s15  ;;  %v963_v52 = vsel %vm943_vm2, %v961_v48, %v962_v49  ;;  %v965_v62 = vsel %vm943_vm2, %v962_v49, %v964_v53  ;;  %v481_v49 = vadd.f32 %v3145_v28, %v480_v55 }
 0x101   : > { %1324 = vrot.lane.b32.xlu0 %v955_v44, %s2935_s29 }
 0x104   : > { %1602 = vrot.lane.b32.xlu2 %v955_v44, %s4921_s17 }
 0x105   : > { %1509 = vrot.lane.b32.xlu1 %v784_v32, %s2938_s11 }
 0x109   : > { %1123 = vrot.lane.b32.xlu0 %v3268_v57, %s2933_s21 }
 0x10c   : > { %1223 = vrot.lane.b32.xlu2 %v784_v32, %s2934_s23  ;;  %v957_v32 = vrot.slane %v3289_v5, 2 }
 0x10d   : > { %1322 = vrot.lane.b32.xlu1 %v953_v39, %s2935_s29  ;;  %v3332_v39 = vpop.permute.xlu0 %850 }
 0x10e   : > { %v958_v38 = vsel %vm943_vm2, %v956_v31, %v957_v32  ;;  %v960_v41 = vsel %vm943_vm2, %v957_v32, %v959_v36  ;;  %v791_v31 = vrot.slane %v3393_v15, 1  ;;  %v790_v32 = vrot.slane %v3362_v56, 1 }
 0x10f   : > { %v1694_v0 = vsel %vm1693_vm4, 0.0, %v3332_v39 }
 0x110   : > { %v1726_v7 = vsel %vm1725_vm5, %v1694_v0, %v3340_v45 }
 0x111   : > { %910 = vrot.lane.b32.xlu0 %v3281_v3, %s2931_s19 }
 0x113   : > { %v3297_v8 = vpop.permute.xlu2 %1115 }
 0x114   : > { %1418 = vrot.lane.b32.xlu2 %v3268_v57, %s2936_s8  ;;  %v1758_v23 = vsel %vm1757_vm6, %v1726_v7, %v3297_v8 }
 0x115   : > { %1125 = vrot.lane.b32.xlu1 %v3289_v5, %s2933_s21 }
 0x119   : > { %1079 = vrot.lane.b32.xlu0 %v3301_v12, %s2932_s15 }
 0x11c   : > { %908 = vrot.lane.b32.xlu2 %v3307_v14, %s2931_s19 }
 0x11d   : > { %1420 = vrot.lane.b32.xlu1 %v3289_v5, %s2936_s8 }
 0x11e   : > { %v3314_v18 = vpop.permute.xlu2 %1023 }
 0x121   : > { %862 = vrot.lane.b32.xlu0 %v789_v26, %s2931_s19 }
 0x124   : > { %860 = vrot.lane.b32.xlu2 %v787_v27, %s2931_s19 }
 0x125   : > { %1081 = vrot.lane.b32.xlu1 %v3321_v30, %s2932_s15 }
 0x126   : > { %v3328_v35 = vpop.permute.xlu2 %1217 }
 0x129   : > { %1031 = vrot.lane.b32.xlu0 %v958_v38, %s2932_s15 }
 0x12c   : > { %1513 = vrot.lane.b32.xlu2 %v789_v26, %s2938_s11 }
 0x12d   : > { %1033 = vrot.lane.b32.xlu1 %v960_v41, %s2932_s15 }
 0x12e   : > { %v3338_v44 = vpop.permute.xlu2 %1320 }
 0x131   : > { %1511 = vrot.lane.b32.xlu0 %v787_v27, %s2938_s11 }
 0x133   : > { %v3343_v47 = vpop.permute.xlu0 %1117 }
 0x134   : > { %1326 = vrot.lane.b32.xlu2 %v958_v38, %s2935_s29 }
 0x135   : > { %1604 = vrot.lane.b32.xlu1 %v958_v38, %s4921_s17 }
 0x136   : > { %v3350_v51 = vpop.permute.xlu2 %1121 }
 0x137   : > { %v3356_v54 = vpop.permute.xlu1 %854 }
 0x139   : > { %1606 = vrot.lane.b32.xlu0 %v960_v41, %s4921_s17  ;;  %s4189_s17 = scalar_lea.vmem [#allocation5], %s5037_s9  ;;  %s2520_s9 = scalar_lea.sflag [#allocation4], %s3066_s22 }
 0x13b   : > { %v3368_v61 = vpop.permute.xlu0 %852 }
 0x13c   : > { %1127 = vrot.lane.b32.xlu2 %v3362_v56, %s2933_s21 }
 0x13d   : > { %1225 = vrot.lane.b32.xlu1 %v787_v27, %s2934_s23 }
 0x13e   : > { %v3376_v63 = vpop.permute.xlu2 %1077 }
 0x13f   : > { %4997 = vst [vmem:[#allocation23_spill] sm:$0xff] %v3376_v63  ;;  %v3381_v6 = vpop.permute.xlu1 %1219 }
 0x141   : > { %1227 = vrot.lane.b32.xlu0 %v789_v26, %s2934_s23  ;;  %v793_v26 = vrot.slane %v728_v16, 1 }
 0x143   : > { %v3390_v13 = vpop.permute.xlu0 %1025  ;;  %v794_v38 = vsel %vm772_vm3, %v791_v31, %v793_v26  ;;  %v3442_v26 = vpop.f32.mrf.mxu0 }
 0x144   : > { %1424 = vrot.lane.b32.xlu2 %v3393_v15, %s2936_s8 }
 0x145   : > { %1328 = vrot.lane.b32.xlu1 %v960_v41, %s2935_s29  ;;  %v792_v41 = vsel %vm772_vm3, %v790_v32, %v791_v31  ;;  %v1790_v31 = vsel %vm339_vm0, %v1758_v23, %v3328_v35  ;;  %v557_v32 = vmax.f32 %v478_v9, 0.0 }
 0x146   : > { %v3402_v25 = vpop.permute.xlu2 %858 }
 0x147   : > { %v3404_v27 = vpop.permute.xlu1 %1119 }
 0x149   : > { %1422 = vrot.lane.b32.xlu0 %v3362_v56, %s2936_s8 }
 0x14b   : > { %v1319_v36 = vpop.permute.xlu0 %1318  ;;  %v486_v55 = vpop.f32.mrf.mxu0 }
 0x14c   : > { %866 = vrot.lane.b32.xlu2 %v794_v38, %s2931_s19  ;;  %v1823_v45 = vsel %vm1822_vm8, %v1790_v31, %v1319_v36  ;;  %v626_v36 = vrot.slane %v557_v32, 7 }
 0x14d   : > { %864 = vrot.lane.b32.xlu1 %v792_v41, %s2931_s19 }
 0x14e   : > { %v3414_v43 = vpop.permute.xlu2 %1029 }
 0x14f   : > { %v1415_v46 = vpop.permute.xlu1 %1414 }
 0x150   : > { %v1856_v40 = vsel %vm1855_vm7, %v1823_v45, %v1415_v46  ;;  %v558_v46 = vmax.f32 %v481_v49, 0.0 }
 0x151   : > { %1129 = vrot.lane.b32.xlu0 %v3393_v15, %s2933_s21 }
 0x153   : > { %v3420_v50 = vpop.permute.xlu0 %1416 }
 0x154   : > { %1035 = vrot.lane.b32.xlu2 %v963_v52, %s2932_s15 }
 0x155   : > { %1515 = vrot.lane.b32.xlu1 %v792_v41, %s2938_s11 }
 0x156   : > { %v1508_v58 = vpop.permute.xlu2 %1507 }
 0x157   : > { %v3425_v59 = vpop.permute.xlu1 %906  ;;  %v1889_v8 = vsel %vm1888_vm9, %v1856_v40, %v1508_v58  ;;  %v3461_v58 = vsel %vm613_vm1, 0.0, %v626_v36  ;;  %v489_v40 = vpop.f32.mrf.mxu0 }
 0x158   : > { %4999 = vst [vmem:[#allocation25_spill] sm:$0xff] %v3425_v59 }
 0x159   : > { %1037 = vrot.lane.b32.xlu0 %v965_v62, %s2932_s15  ;;  %5003 = vst [vmem:[#allocation28_spill] sm:$0xff] %v3461_v58 }
 0x15b   : > { %v3431_v1 = vpop.permute.xlu0 %904 }
 0x15c   : > { %5000 = vst [vmem:[#allocation26_spill] sm:$0xff] %v3431_v1  ;;  %1608 = vrot.lane.b32.xlu2 %v963_v52, %s5001_s18 }
 0x15d   : > { %1610 = vrot.lane.b32.xlu1 %v965_v62, %s5001_s18 }
 0x15e   : > { %v1603_v16 = vpop.permute.xlu2 %1602 }
 0x15f   : > { %v3440_v39 = vpop.permute.xlu1 %1075 }
 0x160   : > { %5002 = vst [vmem:[#allocation27_spill] sm:$0xff] %v3440_v39 }
 0x161   : > { %1517 = vrot.lane.b32.xlu0 %v794_v38, %s2938_s11 }
 0x163   : > { %v1601_v48 = vpop.permute.xlu0 %1600 }
 0x164   : > { %1229 = vrot.lane.b32.xlu2 %v792_v41, %s2934_s23  ;;  %v1922_v35 = vsel %vm1921_vm10, %v1889_v8, %v1601_v48  ;;  %v627_v41 = vrot.slane %v558_v46, 7  ;;  %v795_v8 = vrot.slane %v3461_v58, 1 }
 0x165   : > { %1231 = vrot.lane.b32.xlu1 %v794_v38, %s2934_s23  ;;  %2649 = vmatmul.msk.f32.vlgmr.msra.gmra.mxu1 %vm1967_vm11, %v1922_v35 }
 0x166   : > { %v3455_v53 = vpop.permute.xlu2 %1223  ;;  %v3473_v31 = vsel %vm613_vm1, %v626_v36, %v627_v41  ;;  %v729_v32 = vsel %vm613_vm1, %v627_v41, 0.0 }
 0x167   : > { %v3457_v0 = vpop.permute.xlu1 %856  ;;  %5004 = vst [vmem:[#allocation29_spill] sm:$0xff] %v3473_v31  ;;  %v796_v48 = vrot.slane %v3473_v31, 1  ;;  %v967_v36 = vrot.slane %v3473_v31, 2  ;;  %v798_v46 = vrot.slane %v729_v32, 1 }
 0x169   : > { %1330 = vrot.lane.b32.xlu0 %v963_v52, %s2935_s29  ;;  %v1759_v52 = vsel %vm1757_vm6, %v1726_v7, %v3343_v47 }
 0x16a   : > { %v1791_v45 = vsel %vm339_vm0, %v1759_v52, %v3381_v6  ;;  %v969_v6 = vrot.slane %v729_v32, 2  ;;  %v797_v52 = vsel %vm772_vm3, %v795_v8, %v796_v48  ;;  %v966_v32 = vrot.slane %v3461_v58, 2  ;;  %v492_v8 = vpop.f32.mrf.mxu0 }
 0x16b   : > { %v3463_v9 = vpop.permute.xlu0 %1221  ;;  %v1824_v47 = vsel %vm1822_vm8, %v1791_v45, %v3338_v44  ;;  %v493_v21 = vadd.f32 %v3145_v28, %v492_v8 }
 0x16c   : > { %1332 = vrot.lane.b32.xlu2 %v965_v62, %s2935_s29  ;;  %v1857_v49 = vsel %vm1855_vm7, %v1824_v47, %v3420_v50  ;;  %v3505_v45 = vsel %vm943_vm2, %v967_v36, %v969_v6  ;;  %v3508_v50 = vsel %vm772_vm3, %v796_v48, %v798_v46  ;;  %v968_v47 = vsel %vm943_vm2, %v966_v32, %v967_v36 }
 0x16d   : > { %1131 = vrot.lane.b32.xlu1 %v3461_v58, %s2933_s21  ;;  %v484_v48 = vadd.f32 %v3145_v28, %v3442_v26  ;;  %v562_v60 = vmax.f32 %v493_v21, 0.0 }
 0x16e   : > { %v3468_v38 = vpop.permute.xlu2 %1418 }
 0x16f   : > { %v3470_v23 = vpop.permute.xlu1 %1027  ;;  %v633_v12 = vrot.slane %v562_v60, 7 }
 0x171   : > { %1428 = vrot.lane.b32.xlu0 %v3473_v31, %s2936_s8 }
 0x173   : > { %v3481_v62 = vpop.permute.xlu0 %1324 }
 0x174   : > { %1133 = vrot.lane.b32.xlu2 %v3473_v31, %s2933_s21 }
 0x175   : > { %1426 = vrot.lane.b32.xlu1 %v3461_v58, %s2936_s8 }
 0x176   : > { %v3492_v7 = vpop.permute.xlu2 %908 }
 0x177   : > { %5005 = vst [vmem:[#allocation30_spill] sm:$0xff] %v3492_v7  ;;  %v1510_v35 = vpop.permute.xlu1 %1509  ;;  %v495_v7 = vpop.f32.mrf.mxu0 }
 0x178   : > { %v1890_v41 = vsel %vm1888_vm9, %v1857_v49, %v1510_v35  ;;  %v487_v49 = vadd.f32 %v3145_v28, %v486_v55  ;;  %v559_v35 = vmax.f32 %v484_v48, 0.0 }
 0x179   : > { %868 = vrot.lane.b32.xlu0 %v797_v52, %s2931_s19  ;;  %v1923_v19 = vsel %vm1921_vm10, %v1890_v41, %v1603_v16 }
 0x17a   : > { %2650 = vmatmul.msk.f32.gmra.mxu1 %vm1967_vm11, %v1923_v19  ;;  %v560_v36 = vmax.f32 %v487_v49, 0.0  ;;  %v629_v32 = vrot.slane %v559_v35, 7 }
 0x17b   : > { %v3502_v44 = vpop.permute.xlu0 %1123 }
 0x17c   : > { %1041 = vrot.lane.b32.xlu2 %v3505_v45, %s2932_s15  ;;  %v630_v26 = vrot.slane %v560_v36, 7  ;;  %v3538_v55 = vsel %vm613_vm1, 0.0, %v629_v32 }
 0x17d   : > { %870 = vrot.lane.b32.xlu1 %v3508_v50, %s2931_s19  ;;  %5008 = vst [vmem:[#allocation33_spill] sm:$0xff] %v3538_v55  ;;  %v971_v8 = vrot.slane %v3538_v55, 2 }
 0x17e   : > { %v3515_v16 = vpop.permute.xlu2 %860  ;;  %v3545_v49 = vsel %vm613_vm1, %v629_v32, %v630_v26  ;;  %v490_v32 = vadd.f32 %v3145_v28, %v489_v40 }
 0x17f   : > { %v1323_v19 = vpop.permute.xlu1 %1322  ;;  %v498_v35 = vpop.f32.mrf.mxu0  ;;  %v801_v59 = vrot.slane %v3545_v49, 1 }
 0x180   : > { %v561_v3 = vmax.f32 %v490_v32, 0.0 }
 0x181   : > { %1612 = vrot.lane.b32.xlu0 %v968_v47, %s5001_s18 }
 0x183   : > { %v3521_v6 = vpop.permute.xlu0 %910 }
 0x184   : > { %5006 = vst [vmem:[#allocation31_spill] sm:$0xff] %v3521_v6  ;;  %1519 = vrot.lane.b32.xlu2 %v797_v52, %s2938_s11 }
 0x185   : > { %1039 = vrot.lane.b32.xlu1 %v968_v47, %s2932_s15 }
 0x186   : > { %v3526_v46 = vpop.permute.xlu2 %1513 }
 0x187   : > { %v3528_v41 = vpop.permute.xlu1 %1125  ;;  %v3573_v40 = vpop.f32.mrf.mxu0 }
 0x189   : > { %1233 = vrot.lane.b32.xlu0 %v797_v52, %s2934_s23  ;;  %v730_v52 = vsel %vm613_vm1, %v630_v26, 0.0  ;;  %v800_v26 = vrot.slane %v3538_v55, 1 }
 0x18b   : > { %v3531_v63 = vpop.permute.xlu0 %1079 }
 0x18c   : > { %5007 = vst [vmem:[#allocation32_spill] sm:$0xff] %v3531_v63  ;;  %1614 = vrot.lane.b32.xlu2 %v3505_v45, %s5001_s18  ;;  %v803_v63 = vrot.slane %v730_v52, 1 }
 0x18d   : > { %1521 = vrot.lane.b32.xlu1 %v3508_v50, %s2938_s11 }
 0x18e   : > { %v3540_v48 = vpop.permute.xlu2 %1326  ;;  %v3564_v20 = vsel %vm772_vm3, %v801_v59, %v803_v63  ;;  %v972_v63 = vrot.slane %v3545_v49, 2 }
 0x18f   : > { %v3542_v6 = vpop.permute.xlu1 %1420 }
 0x190   : > { %v3591_v4 = vsel %vm943_vm2, %v971_v8, %v972_v63 }
 0x191   : > { %1135 = vrot.lane.b32.xlu0 %v3538_v55, %s2933_s21 }
 0x193   : > { %v3550_v36 = vpop.permute.xlu0 %862 }
 0x194   : > { %1430 = vrot.lane.b32.xlu2 %v3538_v55, %s2936_s8 }
 0x195   : > { %1334 = vrot.lane.b32.xlu1 %v968_v47, %s2935_s29  ;;  %v3571_v47 = vsel %vm772_vm3, %v800_v26, %v801_v59  ;;  %v632_v59 = vrot.slane %v561_v3, 7  ;;  %v974_v26 = vrot.slane %v730_v52, 2 }
 0x196   : > { %v3556_v39 = vpop.permute.xlu2 %1127 }
 0x197   : > { %v3559_v1 = vpop.permute.xlu1 %1081  ;;  %v3600_v3 = vsel %vm613_vm1, 0.0, %v632_v59 }
 0x198   : > { %5009 = vst [vmem:[#allocation34_spill] sm:$0xff] %v3559_v1  ;;  %v1695_v1 = vsel %vm1693_vm4, %v3151_v34, %v3368_v61 }
 0x199   : > { %874 = vrot.lane.b32.xlu0 %v3564_v20, %s2931_s19  ;;  %v1727_v14 = vsel %vm1725_vm5, %v1695_v1, %v3314_v18  ;;  %v731_v18 = vsel %vm613_vm1, %v633_v12, 0.0  ;;  %v3605_v1 = vsel %vm943_vm2, %v972_v63, %v974_v26 }
 0x19a   : > { %v1760_v22 = vsel %vm1757_vm6, %v1727_v14, %v3404_v27  ;;  %v3610_v14 = vsel %vm613_vm1, %v632_v59, %v633_v12  ;;  %v496_v27 = vadd.f32 %v3145_v28, %v495_v7  ;;  %v808_v63 = vrot.slane %v731_v18, 1 }
 0x19b   : > { %v3568_v30 = vpop.permute.xlu0 %1031  ;;  %v1792_v34 = vsel %vm339_vm0, %v1760_v22, %v3463_v9  ;;  %v499_v22 = vadd.f32 %v3145_v28, %v498_v35  ;;  %v1696_v9 = vsel %vm1693_vm4, %v3162_v42, %v3356_v54  ;;  %v806_v59 = vrot.slane %v3610_v14, 1 }
 0x19c   : > { %872 = vrot.lane.b32.xlu2 %v3571_v47, %s2931_s19  ;;  %v1825_v60 = vsel %vm1822_vm8, %v1792_v34, %v1323_v19  ;;  %v504_v19 = vpop.f32.mrf.mxu0  ;;  %v1728_v52 = vsel %vm1725_vm5, %v1696_v9, %v3390_v13  ;;  %v805_v54 = vrot.slane %v3600_v3, 1  ;;  %v563_v26 = vmax.f32 %v496_v27, 0.0 }
 0x19d   : > { %1137 = vrot.lane.b32.xlu1 %v3545_v49, %s2933_s21  ;;  %v1858_v8 = vsel %vm1855_vm7, %v1825_v60, %v3468_v38  ;;  %v564_v34 = vmax.f32 %v499_v22, 0.0  ;;  %v1761_v13 = vsel %vm1757_vm6, %v1728_v52, %v3350_v51  ;;  %v3639_v9 = vsel %vm772_vm3, %v806_v59, %v808_v63 }
 0x19e   : > { %v3584_v32 = vpop.permute.xlu2 %1424  ;;  %v1793_v38 = vsel %vm339_vm0, %v1761_v13, %v3455_v53  ;;  %v979_v27 = vrot.slane %v731_v18, 2  ;;  %v3644_v51 = vsel %vm772_vm3, %v805_v54, %v806_v59  ;;  %v977_v52 = vrot.slane %v3610_v14, 2 }
 0x19f   : > { %v3586_v21 = vpop.permute.xlu1 %1033  ;;  %v1826_v60 = vsel %vm1822_vm8, %v1793_v38, %v3481_v62  ;;  %v635_v53 = vrot.slane %v563_v26, 7 }
 0x1a0   : > { %v1859_v22 = vsel %vm1855_vm7, %v1826_v60, %v3542_v6  ;;  %v976_v6 = vrot.slane %v3600_v3, 2  ;;  %v3658_v59 = vsel %vm943_vm2, %v977_v52, %v979_v27 }
 0x1a1   : > { %1043 = vrot.lane.b32.xlu0 %v3591_v4, %s2932_s15  ;;  %v1892_v18 = vsel %vm1888_vm9, %v1859_v22, %v3526_v46  ;;  %v502_v46 = vadd.f32 %v3145_v28, %v3573_v40 }
 0x1a3   : > { %v1512_v61 = vpop.permute.xlu0 %1511  ;;  %v565_v40 = vmax.f32 %v502_v46, 0.0 }
 0x1a4   : > { %1139 = vrot.lane.b32.xlu2 %v3600_v3, %s2933_s21  ;;  %v1891_v7 = vsel %vm1888_vm9, %v1858_v8, %v1512_v61  ;;  %v636_v8 = vrot.slane %v564_v34, 7  ;;  %v3674_v34 = vsel %vm943_vm2, %v976_v6, %v977_v52 }
 0x1a5   : > { %1045 = vrot.lane.b32.xlu1 %v3605_v1, %s2932_s15  ;;  %v638_v6 = vrot.slane %v565_v40, 7 }
 0x1a6   : > { %v3623_v12 = vpop.permute.xlu2 %866  ;;  %v3664_v54 = vsel %vm613_vm1, %v635_v53, %v636_v8  ;;  %v732_v60 = vsel %vm613_vm1, %v636_v8, 0.0 }
 0x1a7   : > { %5010 = vst [vmem:[#allocation35_spill] sm:$0xff] %v3623_v12  ;;  %v1605_v35 = vpop.permute.xlu1 %1604  ;;  %v811_v38 = vrot.slane %v3664_v54, 1  ;;  %v813_v52 = vrot.slane %v732_v60, 1  ;;  %v984_v24 = vrot.slane %v732_v60, 2  ;;  %v982_v40 = vrot.slane %v3664_v54, 2 }
 0x1a8   : > { %v1924_v42 = vsel %vm1921_vm10, %v1891_v7, %v1605_v35  ;;  %v507_v7 = vpop.f32.mrf.mxu0 }
 0x1a9   : > { %2651 = vmatmul.msk.f32.gmra.mxu1 %vm1967_vm11, %v1924_v42  ;;  %1141 = vrot.lane.b32.xlu0 %v3610_v14, %s2933_s21  ;;  %v3661_v42 = vsel %vm613_vm1, 0.0, %v635_v53 }
 0x1aa   : > { %5011 = vst [vmem:[#allocation36_spill] sm:$0xff] %v3661_v42  ;;  %v810_v13 = vrot.slane %v3661_v42, 1 }
 0x1ab   : > { %v1607_v61 = vpop.permute.xlu0 %1606 }
 0x1ac   : > { %878 = vrot.lane.b32.xlu2 %v3639_v9, %s2931_s19  ;;  %v1925_v35 = vsel %vm1921_vm10, %v1892_v18, %v1607_v61  ;;  %v505_v61 = vadd.f32 %v3145_v28, %v504_v19  ;;  %v3687_v53 = vsel %vm772_vm3, %v810_v13, %v811_v38  ;;  %v3692_v19 = vsel %vm772_vm3, %v811_v38, %v813_v52 }
 0x1ad   : > { %876 = vrot.lane.b32.xlu1 %v3644_v51, %s2931_s19  ;;  %v3699_v13 = vsel %vm613_vm1, 0.0, %v638_v6  ;;  %v1697_v38 = vsel %vm1693_vm4, %v3190_v2, %v3457_v0  ;;  %v981_v52 = vrot.slane %v3661_v42, 2  ;;  %v3724_v2 = vsel %vm943_vm2, %v982_v40, %v984_v24 }
 0x1ae   : > { %v3651_v62 = vpop.permute.xlu2 %1035  ;;  %v566_v18 = vmax.f32 %v505_v61, 0.0  ;;  %v1729_v31 = vsel %vm1725_vm5, %v1697_v38, %v3470_v23 }
 0x1af   : > { %v1226_v63 = vpop.permute.xlu1 %1225  ;;  %v1762_v60 = vsel %vm1757_vm6, %v1729_v31, %v3502_v44  ;;  %v2209_v31 = vld [vmem:[%s4917_s5] sm:$0xff] }
 0x1b0   : > { %v639_v46 = vrot.slane %v566_v18, 7  ;;  %v1794_v29 = vsel %vm339_vm0, %v1762_v60, %v1226_v63  ;;  %2325 = vmatpush.msra.mxu2 %v2209_v31  ;;  %2733 = vmatpush.msra.mxu3 %v2209_v31  ;;  %v508_v63 = vadd.f32 %v3145_v28, %v507_v7 }
 0x1b1   : > { %2652 = vmatmul.msk.f32.gmra.mxu1 %vm1967_vm11, %v1925_v35  ;;  %1049 = vrot.lane.b32.xlu0 %v3658_v59, %s2932_s15  ;;  %v510_v35 = vpop.f32.mrf.mxu0  ;;  %v1827_v24 = vsel %vm1822_vm8, %v1794_v29, %v3540_v48 }
 0x1b2   : > { %v3711_v18 = vsel %vm613_vm1, %v638_v6, %v639_v46  ;;  %v733_v55 = vsel %vm613_vm1, %v639_v46, 0.0  ;;  %v3727_v46 = vsel %vm943_vm2, %v981_v52, %v982_v40  ;;  %v815_v52 = vrot.slane %v3699_v13, 1 }
 0x1b3   : > { %v3671_v26 = vpop.permute.xlu0 %1227  ;;  %v818_v0 = vrot.slane %v733_v55, 1  ;;  %v816_v23 = vrot.slane %v3711_v18, 1  ;;  %v511_v60 = vadd.f32 %v3145_v28, %v510_v35  ;;  %v567_v48 = vmax.f32 %v508_v63, 0.0 }
 0x1b4   : > { %1047 = vrot.lane.b32.xlu2 %v3674_v34, %s2932_s15  ;;  %v1698_v28 = vsel %vm1693_vm4, %v3199_v10, %v3402_v25 }
 0x1b5   : > { %1143 = vrot.lane.b32.xlu1 %v3661_v42, %s2933_s21  ;;  %v3747_v17 = vsel %vm772_vm3, %v816_v23, %v818_v0  ;;  %v568_v35 = vmax.f32 %v511_v60, 0.0  ;;  %v986_v0 = vrot.slane %v3699_v13, 2  ;;  %v641_v10 = vrot.slane %v567_v48, 7 }
 0x1b6   : > { %v1609_v27 = vpop.permute.xlu2 %1608 }
 0x1b7   : > { %v3684_v22 = vpop.permute.xlu1 %1328 }
 0x1b9   : > { %880 = vrot.lane.b32.xlu0 %v3687_v53, %s2931_s19  ;;  %v513_v6 = vpop.f32.mrf.mxu0 }
 0x1bb   : > { %v1423_v8 = vpop.permute.xlu0 %1422 }
 0x1bc   : > { %1145 = vrot.lane.b32.xlu2 %v3664_v54, %s2933_s21  ;;  %v1860_v40 = vsel %vm1855_vm7, %v1827_v24, %v1423_v8  ;;  %v3756_v8 = vsel %vm772_vm3, %v815_v52, %v816_v23 }
 0x1bd   : > { %882 = vrot.lane.b32.xlu1 %v3692_v19, %s2931_s19 }
 0x1be   : > { %v3701_v61 = vpop.permute.xlu2 %1229 }
 0x1bf   : > { %v3703_v11 = vpop.permute.xlu1 %864 }
 0x1c1   : > { %1147 = vrot.lane.b32.xlu0 %v3699_v13, %s2933_s21  ;;  %v516_v23 = vpop.f32.mrf.mxu0 }
 0x1c3   : > { %v3721_v33 = vpop.permute.xlu0 %1129 }
 0x1c4   : > { %1053 = vrot.lane.b32.xlu2 %v3724_v2, %s2932_s15 }
 0x1c5   : > { %1051 = vrot.lane.b32.xlu1 %v3727_v46, %s2932_s15 }
 0x1c6   : > { %v3739_v44 = vpop.permute.xlu2 %1332 }
 0x1c7   : > { %v1516_v38 = vpop.permute.xlu1 %1515 }
 0x1c8   : > { %v1893_v58 = vsel %vm1888_vm9, %v1860_v40, %v1516_v38  ;;  %v989_v40 = vrot.slane %v733_v55, 2  ;;  %v642_v38 = vrot.slane %v568_v35, 7 }
 0x1c9   : > { %886 = vrot.lane.b32.xlu0 %v3747_v17, %s2931_s19  ;;  %v1926_v29 = vsel %vm1921_vm10, %v1893_v58, %v1609_v27  ;;  %v987_v58 = vrot.slane %v3711_v18, 2  ;;  %v1730_v27 = vsel %vm1725_vm5, %v1698_v28, %v3414_v43 }
 0x1ca   : > { %2653 = vmatmul.msk.f32.gmra.mxu1 %vm1967_vm11, %v1926_v29  ;;  %v1763_v31 = vsel %vm1757_vm6, %v1730_v27, %v3528_v41  ;;  %v3783_v41 = vsel %vm613_vm1, 0.0, %v641_v10  ;;  %v3809_v27 = vld [vmem:[%s4914_s2] ss:$0 sm:$0xff] }
 0x1cb   : > { %v3753_v7 = vpop.permute.xlu0 %1037  ;;  %v1795_v25 = vsel %vm339_vm0, %v1763_v31, %v3671_v26  ;;  %v3778_v43 = vsel %vm943_vm2, %v986_v0, %v987_v58  ;;  %v734_v26 = vsel %vm613_vm1, %v642_v38, 0.0  ;;  %v3790_v48 = vsel %vm943_vm2, %v987_v58, %v989_v40  ;;  %5016 = vst [vmem:[#allocation41_spill] sm:$0xff] %v3809_v27 }
 0x1cc   : > { %5012 = vst [vmem:[#allocation37_spill] sm:$0xff] %v3753_v7  ;;  %884 = vrot.lane.b32.xlu2 %v3756_v8, %s2931_s19  ;;  %v1828_v52 = vsel %vm1822_vm8, %v1795_v25, %v3684_v22  ;;  %v3795_v22 = vsel %vm613_vm1, %v641_v10, %v642_v38  ;;  %v823_v35 = vrot.slane %v734_v26, 1  ;;  %v514_v31 = vadd.f32 %v3809_v27, %v513_v6  ;;  %v519_v10 = vpop.f32.mrf.mxu0 }
 0x1cd   : > { %1149 = vrot.lane.b32.xlu1 %v3711_v18, %s2933_s21  ;;  %v1861_v60 = vsel %vm1855_vm7, %v1828_v52, %v3584_v32  ;;  %5014 = vst [vmem:[#allocation39_spill] sm:$0xff] %v3790_v48  ;;  %v821_v58 = vrot.slane %v3795_v22, 1  ;;  %v820_v25 = vrot.slane %v3783_v41, 1  ;;  %v994_v52 = vrot.slane %v734_v26, 2  ;;  %v3832_v26 = vld [vmem:[%s4916_s4] ss:$0 sm:$0xff] }
 0x1ce   : > { %v3771_v24 = vpop.permute.xlu2 %1133  ;;  %v992_v6 = vrot.slane %v3795_v22, 2 }
 0x1cf   : > { %5013 = vst [vmem:[#allocation38_spill] sm:$0xff] %v3771_v24  ;;  %v1611_v63 = vpop.permute.xlu1 %1610  ;;  %v3817_v38 = vsel %vm772_vm3, %v821_v58, %v823_v35  ;;  %v991_v35 = vrot.slane %v3783_v41, 2 }
 0x1d0   : > { %5017 = vst [vmem:[#allocation42_spill] sm:$0xff] %v3817_v38 }
 0x1d1   : > { %1055 = vrot.lane.b32.xlu0 %v3778_v43, %s2932_s15  ;;  %v3845_v7 = vsel %vm943_vm2, %v991_v35, %v992_v6 }
 0x1d2   : > { %5020 = vst [vmem:[#allocation45_spill] sm:$0xff] %v3845_v7 }
 0x1d3   : > { %v1518_v29 = vpop.permute.xlu0 %1517 }
 0x1d4   : > { %v1894_v55 = vsel %vm1888_vm9, %v1861_v60, %v1518_v29  ;;  %1151 = vrot.lane.b32.xlu2 %v3783_v41, %s2933_s21  ;;  %v569_v60 = vmax.f32 %v514_v31, 0.0  ;;  %v3820_v29 = vsel %vm772_vm3, %v820_v25, %v821_v58  ;;  %v3836_v31 = vsel %vm943_vm2, %v992_v6, %v994_v52 }
 0x1d5   : > { %1057 = vrot.lane.b32.xlu1 %v3790_v48, %s2932_s15  ;;  %v1927_v28 = vsel %vm1921_vm10, %v1894_v55, %v1611_v63  ;;  %v517_v63 = vadd.f32 %v3809_v27, %v516_v23  ;;  %5018 = vst [vmem:[#allocation43_spill] sm:$0xff] %v3820_v29 }
 0x1d6   : > { %v3800_v32 = vpop.permute.xlu2 %1041  ;;  %2654 = vmatmul.msk.f32.gmra.mxu1 %vm1967_vm11, %v1927_v28  ;;  %v644_v58 = vrot.slane %v569_v60, 7  ;;  %5019 = vst [vmem:[#allocation44_spill] sm:$0xff] %v3836_v31 }
 0x1d7   : > { %5015 = vst [vmem:[#allocation40_spill] sm:$0xff] %v3800_v32  ;;  %v3803_v0 = vpop.permute.xlu1 %1231  ;;  %v570_v55 = vmax.f32 %v517_v63, 0.0  ;;  %v522_v63 = vpop.f32.mrf.mxu0 }
 0x1d8   : > { %v523_v32 = vadd.f32 %v3809_v27, %v522_v63  ;;  %v3848_v60 = vsel %vm613_vm1, 0.0, %v644_v58  ;;  %v520_v63 = vadd.f32 %v3809_v27, %v519_v10 }
 0x1d9   : > { %1153 = vrot.lane.b32.xlu0 %v3795_v22, %s2933_s21  ;;  %v645_v25 = vrot.slane %v570_v55, 7 }
 0x1da   : > { %v572_v6 = vmax.f32 %v523_v32, 0.0  ;;  %v571_v12 = vmax.f32 %v520_v63, 0.0 }
 0x1db   : > { %v1331_v40 = vpop.permute.xlu0 %1330  ;;  %v3853_v52 = vsel %vm613_vm1, %v644_v58, %v645_v25  ;;  %v735_v55 = vsel %vm613_vm1, %v645_v25, 0.0  ;;  %v1699_v58 = vsel %vm1693_vm4, %v3268_v57, %v3515_v16 }
 0x1dc   : > { %890 = vrot.lane.b32.xlu2 %v3817_v38, %s2931_s19  ;;  %v828_v15 = vrot.slane %v735_v55, 1  ;;  %v1731_v10 = vsel %vm1725_vm5, %v1699_v58, %v3568_v30  ;;  %v647_v63 = vrot.slane %v571_v12, 7  ;;  %v997_v12 = vrot.slane %v3853_v52, 2 }
 0x1dd   : > { %888 = vrot.lane.b32.xlu1 %v3820_v29, %s2931_s19  ;;  %v1764_v57 = vsel %vm1757_vm6, %v1731_v10, %v3556_v39 }
 0x1de   : > { %v1520_v23 = vpop.permute.xlu2 %1519  ;;  %v1796_v30 = vsel %vm339_vm0, %v1764_v57, %v3701_v61  ;;  %v996_v61 = vrot.slane %v3848_v60, 2  ;;  %v3907_v57 = vsel %vm613_vm1, 0.0, %v647_v63 }
 0x1df   : > { %v3827_v28 = vpop.permute.xlu1 %1131  ;;  %v525_v48 = vpop.f32.mrf.mxu0 }
 0x1e0   : > { %v526_v39 = vadd.f32 %v3809_v27, %v525_v48 }
 0x1e1   : > { %1061 = vrot.lane.b32.xlu0 %v3836_v31, %s2932_s15 }
 0x1e2   : > { %v2081_v38 = vpop.f32.mrf.mxu1 }
 0x1e3   : > { %v2082_v29 = vadd.f32 %v3832_v26, %v2081_v38  ;;  %v3842_v24 = vpop.permute.xlu0 %1428 }
 0x1e4   : > { %1059 = vrot.lane.b32.xlu2 %v3845_v7, %s2932_s15  ;;  %v826_v7 = vrot.slane %v3853_v52, 1 }
 0x1e5   : > { %v2177_v31 = vmax.f32 %v2082_v29, 0.0  ;;  %1155 = vrot.lane.b32.xlu1 %v3848_v60, %s2933_s21  ;;  %v648_v29 = vrot.slane %v572_v6, 7 }
 0x1e6   : > { %v3859_v38 = vpop.permute.xlu2 %1614  ;;  %v3873_v32 = vsel %vm772_vm3, %v826_v7, %v828_v15  ;;  %v999_v15 = vrot.slane %v735_v55, 2 }
 0x1e7   : > { %v1427_v35 = vpop.permute.xlu1 %1426  ;;  %2681 = vmatmul.msk.f32.vlgmr.msra.gmra.mxu2 %vm1693_vm4, %v2177_v31  ;;  %5021 = vst [vmem:[#allocation46_spill] sm:$0xff] %v3873_v32  ;;  %v825_v31 = vrot.slane %v3848_v60, 1  ;;  %v3887_v6 = vsel %vm613_vm1, %v648_v29, 0.0  ;;  %v3900_v55 = vsel %vm613_vm1, %v647_v63, %v648_v29  ;;  %v3915_v29 = vsel %vm943_vm2, %v996_v61, %v997_v12 }
 0x1e8   : > { %v833_v48 = vrot.slane %v3887_v6, 1  ;;  %5023 = vst [vmem:[#allocation48_spill] sm:$0xff] %v3915_v29  ;;  %v831_v63 = vrot.slane %v3900_v55, 1  ;;  %v1700_v61 = vsel %vm1693_vm4, %v3289_v5, %v3550_v36 }
 0x1e9   : > { %1523 = vrot.lane.b32.xlu0 %v3571_v47, %s2938_s11 }
 0x1eb   : > { %v3870_v25 = vpop.permute.xlu0 %868 }
 0x1ec   : > { %1235 = vrot.lane.b32.xlu2 %v3508_v50, %s2934_s23  ;;  %v1829_v50 = vsel %vm1822_vm8, %v1796_v30, %v1331_v40  ;;  %v529_v40 = vadd.f32 %v3809_v27, %v3156_v37  ;;  %v573_v30 = vmax.f32 %v526_v39, 0.0 }
 0x1ed   : > { %894 = vrot.lane.b32.xlu1 %v3873_v32, %s2931_s19  ;;  %v1862_v10 = vsel %vm1855_vm7, %v1829_v50, %v1427_v35  ;;  %v3896_v32 = vsel %vm772_vm3, %v825_v31, %v826_v7  ;;  %v3911_v7 = vsel %vm943_vm2, %v997_v12, %v999_v15  ;;  %v830_v12 = vrot.slane %v3907_v57, 1 }
 0x1ee   : > { %v3884_v16 = vpop.permute.xlu2 %1430  ;;  %5022 = vst [vmem:[#allocation47_spill] sm:$0xff] %v3911_v7  ;;  %v1895_v31 = vsel %vm1888_vm9, %v1862_v10, %v1520_v23  ;;  %v574_v15 = vmax.f32 %v529_v40, 0.0  ;;  %v650_v10 = vrot.slane %v573_v30, 7  ;;  %v1732_v40 = vsel %vm1725_vm5, %v1700_v61, %v3586_v21 }
 0x1ef   : > { %v3890_v58 = vpop.permute.xlu1 %870  ;;  %v1765_v27 = vsel %vm1757_vm6, %v1732_v40, %v3721_v33  ;;  %v3947_v36 = vsel %vm772_vm3, %v830_v12, %v831_v63  ;;  %v1001_v21 = vrot.slane %v3907_v57, 2  ;;  %v1002_v33 = vrot.slane %v3900_v55, 2 }
 0x1f0   : > { %5024 = vst [vmem:[#allocation49_spill] sm:$0xff] %v3947_v36  ;;  %v1004_v61 = vrot.slane %v3887_v6, 2  ;;  %v3983_v6 = vsel %vm613_vm1, 0.0, %v650_v10 }
 0x1f1   : > { %892 = vrot.lane.b32.xlu0 %v3896_v32, %s2931_s19  ;;  %v3970_v40 = vsel %vm943_vm2, %v1001_v21, %v1002_v33 }
 0x1f2   : > { %5025 = vst [vmem:[#allocation50_spill] sm:$0xff] %v3970_v40 }
 0x1f3   : > { %v1613_v35 = vpop.permute.xlu0 %1612 }
 0x1f4   : > { %1065 = vrot.lane.b32.xlu2 %v3911_v7, %s2932_s15  ;;  %v1928_v37 = vsel %vm1921_vm10, %v1895_v31, %v1613_v35  ;;  %v3934_v31 = vsel %vm772_vm3, %v831_v63, %v833_v48  ;;  %v1797_v7 = vsel %vm339_vm0, %v1765_v27, %v3803_v0 }
 0x1f5   : > { %1063 = vrot.lane.b32.xlu1 %v3915_v29, %s2932_s15  ;;  %2655 = vmatmul.msk.f32.gmra.mxu1 %vm1967_vm11, %v1928_v37  ;;  %v651_v37 = vrot.slane %v574_v15, 7  ;;  %v1830_v27 = vsel %vm1822_vm8, %v1797_v7, %v3739_v44 }
 0x1f6   : > { %v3924_v50 = vpop.permute.xlu2 %872  ;;  %v1863_v15 = vsel %vm1855_vm7, %v1830_v27, %v3842_v24 }
 0x1f7   : > { %v3926_v23 = vpop.permute.xlu1 %1039  ;;  %v2084_v39 = vpop.f32.mrf.mxu1  ;;  %v3950_v48 = vsel %vm613_vm1, %v650_v10, %v651_v37  ;;  %v737_v0 = vsel %vm613_vm1, %v651_v37, 0.0  ;;  %v3986_v37 = vsel %vm943_vm2, %v1002_v33, %v1004_v61  ;;  %v835_v33 = vrot.slane %v3983_v6, 1 }
 0x1f8   : > { %v2085_v35 = vadd.f32 %v3832_v26, %v2084_v39  ;;  %v836_v12 = vrot.slane %v3950_v48, 1  ;;  %v1007_v21 = vrot.slane %v3950_v48, 2 }
 0x1f9   : > { %898 = vrot.lane.b32.xlu0 %v3934_v31, %s2931_s19 }
 0x1fa   : > { %v2178_v30 = vmax.f32 %v2085_v35, 0.0 }
 0x1fb   : > { %v3944_v5 = vpop.permute.xlu0 %1233 }
 0x1fc   : > { %2682 = vmatmul.msk.f32.gmra.mxu2 %vm1693_vm4, %v2178_v30  ;;  %896 = vrot.lane.b32.xlu2 %v3947_v36, %s2931_s19  ;;  %v838_v30 = vrot.slane %v737_v0, 1 }
 0x1fd   : > { %1616 = vrot.lane.b32.xlu1 %v3591_v4, %s5001_s18 }
 0x1fe   : > { %v3962_v63 = vpop.permute.xlu2 %1139  ;;  %v3980_v7 = vsel %vm772_vm3, %v836_v12, %v838_v30 }
 0x1ff   : > { %v1522_v39 = vpop.permute.xlu1 %1521 }
 0x200   : > { %v1896_v35 = vsel %vm1888_vm9, %v1863_v15, %v1522_v39  ;;  %v1006_v39 = vrot.slane %v3983_v6, 2 }
 0x201   : > { %1067 = vrot.lane.b32.xlu0 %v3970_v40, %s2932_s15  ;;  %v1929_v44 = vsel %vm1921_vm10, %v1896_v35, %v3859_v38  ;;  %v1009_v38 = vrot.slane %v737_v0, 2  ;;  %v4010_v0 = vsel %vm772_vm3, %v835_v33, %v836_v12 }
 0x202   : > { %2656 = vmatmul.msk.f32.gmra.mxu1 %vm1967_vm11, %v1929_v44  ;;  %v4007_v35 = vsel %vm943_vm2, %v1006_v39, %v1007_v21 }
 0x203   : > { %v3977_v24 = vpop.permute.xlu0 %1135  ;;  %v3999_v10 = vsel %vm943_vm2, %v1007_v21, %v1009_v38 }
 0x204   : > { %902 = vrot.lane.b32.xlu2 %v3980_v7, %s2931_s19 }
 0x205   : > { %1069 = vrot.lane.b32.xlu1 %v3986_v37, %s2932_s15 }
 0x206   : > { %v3993_v27 = vpop.permute.xlu2 %878 }
 0x207   : > { %5026 = vst [vmem:[#allocation51_spill] sm:$0xff] %v3993_v27  ;;  %v3995_v15 = vpop.permute.xlu1 %1334 }
 0x209   : > { %1073 = vrot.lane.b32.xlu0 %v3999_v10, %s2932_s15 }
 0x20b   : > { %v4004_v61 = vpop.permute.xlu0 %874 }
 0x20c   : > { %1071 = vrot.lane.b32.xlu2 %v4007_v35, %s2932_s15  ;;  %s2532_s15 = sshll.u32 %s4189_s17, 4  ;;  %s2533_s15 = int_to_ptr.vmem [resolvable:$true] %s2532_s15 }
 0x20d   : > { %900 = vrot.lane.b32.xlu1 %v4010_v0, %s2931_s19 }
 0x20e   : > { %v4016_v30 = vpop.permute.xlu2 %1047 }
 0x20f   : > { %5027 = vst [vmem:[#allocation52_spill] sm:$0xff] %v4016_v30  ;;  %v4018_v44 = vpop.permute.xlu1 %1137 }
 0x211   : > { %1336 = vrot.lane.b32.xlu0 %v3505_v45, %s2935_s29 }
 0x213   : > { %v4022_v38 = vpop.permute.xlu0 %1043 }
 0x214   : > { %1525 = vrot.lane.b32.xlu2 %v3564_v20, %s2938_s11 }
 0x215   : > { %1432 = vrot.lane.b32.xlu1 %v3545_v49, %s2936_s8 }
 0x216   : > { %v4028_v12 = vpop.permute.xlu2 %1145 }
 0x217   : > { %5028 = vst [vmem:[#allocation53_spill] sm:$0xff] %v4028_v12  ;;  %v4030_v21 = vpop.permute.xlu1 %1045 }
 0x219   : > { %1618 = vrot.lane.b32.xlu0 %v3605_v1, %s5001_s18 }
 0x21b   : > { %v4034_v39 = vpop.permute.xlu0 %1141 }
 0x21c   : > { %1338 = vrot.lane.b32.xlu2 %v3591_v4, %s2935_s29 }
 0x21d   : > { %1237 = vrot.lane.b32.xlu1 %v3571_v47, %s2934_s23 }
 0x21e   : > { %v4040_v45 = vpop.permute.xlu2 %1053 }
 0x21f   : > { %5029 = vst [vmem:[#allocation54_spill] sm:$0xff] %v4040_v45  ;;  %v4042_v33 = vpop.permute.xlu1 %876 }
 0x221   : > { %1434 = vrot.lane.b32.xlu0 %v3600_v3, %s2936_s8 }
 0x223   : > { %v4046_v40 = vpop.permute.xlu0 %1049 }
 0x224   : > { %5030 = vst [vmem:[#allocation55_spill] sm:$0xff] %v4046_v40  ;;  %1620 = vrot.lane.b32.xlu2 %v3674_v34, %s5001_s18 }
 0x225   : > { %1527 = vrot.lane.b32.xlu1 %v3644_v51, %s2938_s11 }
 0x226   : > { %v2087_v36 = vpop.f32.mrf.mxu1  ;;  %v885_v4 = vpop.permute.xlu2 %884 }
 0x227   : > { %v2088_v12 = vadd.f32 %v3832_v26, %v2087_v36  ;;  %v4053_v47 = vpop.permute.xlu1 %1143 }
 0x229   : > { %v2179_v45 = vmax.f32 %v2088_v12, 0.0  ;;  %1239 = vrot.lane.b32.xlu0 %v3564_v20, %s2934_s23 }
 0x22b   : > { %2683 = vmatmul.msk.f32.gmra.mxu2 %vm1693_vm4, %v2179_v45  ;;  %v4058_v27 = vpop.permute.xlu0 %880 }
 0x22c   : > { %5031 = vst [vmem:[#allocation56_spill] sm:$0xff] %v4058_v27  ;;  %1436 = vrot.lane.b32.xlu2 %v3610_v14, %s2936_s8 }
 0x22d   : > { %1340 = vrot.lane.b32.xlu1 %v3605_v1, %s2935_s29 }
 0x22e   : > { %v2090_v40 = vpop.f32.mrf.mxu1  ;;  %v1152_v29 = vpop.permute.xlu2 %1151 }
 0x22f   : > { %v2091_v36 = vadd.f32 %v3832_v26, %v2090_v40  ;;  %v4065_v30 = vpop.permute.xlu1 %882 }
 0x230   : > { %5032 = vst [vmem:[#allocation57_spill] sm:$0xff] %v4065_v30 }
 0x231   : > { %v2180_v12 = vmax.f32 %v2091_v36, 0.0  ;;  %1529 = vrot.lane.b32.xlu0 %v3639_v9, %s2938_s11 }
 0x233   : > { %2684 = vmatmul.msk.f32.gmra.mxu2 %vm1693_vm4, %v2180_v12  ;;  %v4070_v20 = vpop.permute.xlu0 %1147 }
 0x234   : > { %5033 = vst [vmem:[#allocation58_spill] sm:$0xff] %v4070_v20  ;;  %1241 = vrot.lane.b32.xlu2 %v3644_v51, %s2934_s23  ;;  %v1711_v51 = vsel %vm1693_vm4, %v3699_v13, %v885_v4 }
 0x235   : > { %1622 = vrot.lane.b32.xlu1 %v3658_v59, %s5001_s18 }
 0x236   : > { %v891_v1 = vpop.permute.xlu2 %890 }
 0x237   : > { %v4076_v45 = vpop.permute.xlu1 %1051 }
 0x238   : > { %5034 = vst [vmem:[#allocation59_spill] sm:$0xff] %v4076_v45 }
 0x239   : > { %1342 = vrot.lane.b32.xlu0 %v3674_v34, %s2935_s29 }
 0x23b   : > { %v887_v40 = vpop.permute.xlu0 %886 }
 0x23c   : > { %1531 = vrot.lane.b32.xlu2 %v3687_v53, %s2938_s11 }
 0x23d   : > { %1438 = vrot.lane.b32.xlu1 %v3661_v42, %s2936_s8 }
 0x23e   : > { %v1060_v36 = vpop.permute.xlu2 %1059 }
 0x23f   : > { %v4084_v12 = vpop.permute.xlu1 %1149 }
 0x240   : > { %5035 = vst [vmem:[#allocation60_spill] sm:$0xff] %v4084_v12 }
 0x241   : > { %1624 = vrot.lane.b32.xlu0 %v3727_v46, %s5001_s18 }
 0x243   : > { %v1056_v30 = vpop.permute.xlu0 %1055 }
 0x244   : > { %v1743_v20 = vsel %vm1725_vm5, %v1711_v51, %v1056_v30  ;;  %1344 = vrot.lane.b32.xlu2 %v3658_v59, %s2935_s29  ;;  %v1712_v30 = vsel %vm1693_vm4, %v3711_v18, %v887_v40  ;;  %v1714_v40 = vsel %vm1693_vm4, %v3795_v22, %v891_v1 }
 0x245   : > { %1243 = vrot.lane.b32.xlu1 %v3639_v9, %s2934_s23  ;;  %v4096_v34 = vsel %vm1757_vm6, %v1743_v20, %v1152_v29 }
 0x246   : > { %v4098_v12 = vpop.permute.xlu2 %1235 }
 0x247   : > { %v1058_v45 = vpop.permute.xlu1 %1057  ;;  %v2093_v42 = vpop.f32.mrf.mxu1 }
 0x248   : > { %v2094_v27 = vadd.f32 %v3832_v26, %v2093_v42  ;;  %v1744_v4 = vsel %vm1725_vm5, %v1712_v30, %v1058_v45  ;;  %v329_v42 = vld [vmem:[%s3072_s16 + $0xf0] sm:$0xff] }
 0x249   : > { %1440 = vrot.lane.b32.xlu0 %v3664_v54, %s2936_s8  ;;  %2647 = vmatmul.msk.f32.gmra.mxu3 %vm339_vm0, %v329_v42  ;;  %v330_v42 = vld [vmem:[%s3072_s16 + $0xf8] sm:$0xff] }
 0x24a   : > { %v2181_v59 = vmax.f32 %v2094_v27, 0.0 }
 0x24b   : > { %v1154_v51 = vpop.permute.xlu0 %1153 }
 0x24c   : > { %2685 = vmatmul.msk.f32.gmra.mxu2 %vm1693_vm4, %v2181_v59  ;;  %v4108_v9 = vsel %vm1757_vm6, %v1744_v4, %v1154_v51  ;;  %1626 = vrot.lane.b32.xlu2 %v3724_v2, %s5001_s18 }
 0x24d   : > { %1533 = vrot.lane.b32.xlu1 %v3692_v19, %s2938_s11 }
 0x24e   : > { %v1066_v29 = vpop.permute.xlu2 %1065 }
 0x24f   : > { %v889_v27 = vpop.permute.xlu1 %888 }
 0x250   : > { %v1713_v20 = vsel %vm1693_vm4, %v3783_v41, %v889_v27 }
 0x251   : > { %1245 = vrot.lane.b32.xlu0 %v3687_v53, %s2934_s23  ;;  %v1745_v45 = vsel %vm1725_vm5, %v1713_v20, %v1060_v36  ;;  %2648 = vmatmul.msk.f32.gmra.mxu3 %vm339_vm0, %v330_v42 }
 0x253   : > { %v2096_v30 = vpop.f32.mrf.mxu1  ;;  %v1062_v59 = vpop.permute.xlu0 %1061 }
 0x254   : > { %v2097_v4 = vadd.f32 %v3832_v26, %v2096_v30  ;;  %v4125_v51 = vsel %vm1725_vm5, %v1714_v40, %v1062_v59  ;;  %1442 = vrot.lane.b32.xlu2 %v3699_v13, %s2936_s8 }
 0x255   : > { %1346 = vrot.lane.b32.xlu1 %v3727_v46, %s2935_s29 }
 0x256   : > { %v2182_v53 = vmax.f32 %v2097_v4, 0.0  ;;  %v897_v27 = vpop.permute.xlu2 %896 }
 0x257   : > { %v1156_v36 = vpop.permute.xlu1 %1155 }
 0x258   : > { %v4134_v1 = vsel %vm1757_vm6, %v1745_v45, %v1156_v36  ;;  %2686 = vmatmul.msk.f32.gmra.mxu2 %vm1693_vm4, %v2182_v53 }
 0x259   : > { %1535 = vrot.lane.b32.xlu0 %v3756_v8, %s2938_s11 }
 0x25b   : > { %v1524_v20 = vpop.permute.xlu0 %1523 }
 0x25c   : > { %1247 = vrot.lane.b32.xlu2 %v3692_v19, %s2934_s23  ;;  %v1701_v19 = vsel %vm1693_vm4, %v3362_v56, %v3703_v11 }
 0x25d   : > { %1628 = vrot.lane.b32.xlu1 %v3778_v43, %s5001_s18  ;;  %v1733_v53 = vsel %vm1725_vm5, %v1701_v19, %v3651_v62 }
 0x25e   : > { %v903_v13 = vpop.permute.xlu2 %902  ;;  %v1766_v11 = vsel %vm1757_vm6, %v1733_v53, %v3827_v28 }
 0x25f   : > { %v895_v46 = vpop.permute.xlu1 %894  ;;  %v1798_v56 = vsel %vm339_vm0, %v1766_v11, %v3944_v5 }
 0x260   : > { %v1716_v40 = vsel %vm1693_vm4, %v3853_v52, %v895_v46  ;;  %v1831_v46 = vsel %vm1822_vm8, %v1798_v56, %v3995_v15 }
 0x261   : > { %1161 = vrot.lane.b32.xlu0 %v3900_v55, %s2933_s21  ;;  %v4148_v45 = vsel %vm1725_vm5, %v1716_v40, %v1066_v29  ;;  %v4162_v29 = vld [vmem:[%s4918_s6] ss:$0 sm:$0xff] }
 0x263   : > { %v893_v30 = vpop.permute.xlu0 %892 }
 0x264   : > { %1263 = vrot.lane.b32.xlu2 %v3934_v31, %s2934_s23  ;;  %v1715_v4 = vsel %vm1693_vm4, %v3848_v60, %v893_v30  ;;  %v2796_v30 = vld [vmem:[%s3072_s16] sm:$0xff] }
 0x265   : > { %1348 = vrot.lane.b32.xlu1 %v3724_v2, %s2935_s29 }
 0x266   : > { %v1072_v59 = vpop.permute.xlu2 %1071 }
 0x267   : > { %v1064_v42 = vpop.permute.xlu1 %1063 }
 0x268   : > { %v4167_v36 = vsel %vm1725_vm5, %v1715_v4, %v1064_v42 }
 0x269   : > { %5036 = vst [vmem:[#allocation61_spill] sm:$0xff] %v4167_v36  ;;  %1444 = vrot.lane.b32.xlu0 %v3711_v18, %s2936_s8  ;;  %v1864_v18 = vsel %vm1855_vm7, %v1831_v46, %v3884_v16  ;;  %v1717_v16 = vsel %vm1693_vm4, %v3907_v57, %v897_v27  ;;  %v5038_v46 = vld [vmem:[#allocation39_spill] sm:$0xff]  ;;  %v5041_v36 = vld [vmem:[#allocation37_spill] sm:$0xff] }
 0x26a   : > { %v2327_v2 = vpop.f32.mrf.mxu2  ;;  %v1897_v5 = vsel %vm1888_vm9, %v1864_v18, %v1524_v20  ;;  %v1720_v18 = vsel %vm1693_vm4, %v3950_v48, %v903_v13 }
 0x26b   : > { %v2328_v40 = vadd.f32 %v4162_v29, %v2327_v2  ;;  %v899_v62 = vpop.permute.xlu0 %898 }
 0x26c   : > { %1537 = vrot.lane.b32.xlu2 %v3747_v17, %s2938_s11 }
 0x26d   : > { %v2423_v19 = vadd.f32 %v2796_v30, %v2328_v40  ;;  %1364 = vrot.lane.b32.xlu1 %v3986_v37, %s2935_s29  ;;  %v1718_v30 = vsel %vm1693_vm4, %v3900_v55, %v899_v62 }
 0x26e   : > { %v1526_v28 = vpop.permute.xlu2 %1525 }
 0x26f   : > { %v2455_v4 = vmax.f32 %v2423_v19, 0.0  ;;  %v1617_v42 = vpop.permute.xlu1 %1616 }
 0x270   : > { %v1930_v15 = vsel %vm1921_vm10, %v1897_v5, %v1617_v42 }
 0x271   : > { %2487 = vst.msk [vmem:[%s4189_s17] sm:$0xff] %vm339_vm0, %v2455_v4  ;;  %2657 = vmatmul.msk.f32.gmra.mxu1 %vm1967_vm11, %v1930_v15  ;;  %1460 = vrot.lane.b32.xlu0 %v3950_v48, %s2936_s8 }
 0x272   : > { %v2099_v53 = vpop.f32.mrf.mxu1 }
 0x273   : > { %v2100_v20 = vadd.f32 %v3832_v26, %v2099_v53  ;;  %v1068_v11 = vpop.permute.xlu0 %1067 }
 0x274   : > { %v4200_v56 = vsel %vm1725_vm5, %v1717_v16, %v1068_v11  ;;  %1553 = vrot.lane.b32.xlu2 %v3980_v7, %s2938_s11 }
 0x275   : > { %v2183_v2 = vmax.f32 %v2100_v20, 0.0  ;;  %1630 = vrot.lane.b32.xlu1 %v5038_v46, %s5001_s18 }
 0x276   : > { %v1339_v40 = vpop.permute.xlu2 %1338 }
 0x277   : > { %v1070_v19 = vpop.permute.xlu1 %1069  ;;  %2687 = vmatmul.msk.f32.gmra.mxu2 %vm1693_vm4, %v2183_v2 }
 0x278   : > { %v4210_v27 = vsel %vm1725_vm5, %v1718_v30, %v1070_v19  ;;  %v5040_v30 = vld [vmem:[#allocation24_spill] sm:$0xff] }
 0x279   : > { %1646 = vrot.lane.b32.xlu0 %v3999_v10, %s5001_s18 }
 0x27b   : > { %v1074_v5 = vpop.permute.xlu0 %1073 }
 0x27c   : > { %v4217_v4 = vsel %vm1725_vm5, %v1720_v18, %v1074_v5  ;;  %1163 = vrot.lane.b32.xlu2 %v3983_v6, %s2933_s21  ;;  %v2797_v18 = vld [vmem:[%s3072_s16 + $0x8] sm:$0xff] }
 0x27d   : > { %1249 = vrot.lane.b32.xlu1 %v3756_v8, %s2934_s23  ;;  %v5039_v8 = vld [vmem:[#allocation35_spill] sm:$0xff] }
 0x27e   : > { %v1621_v62 = vpop.permute.xlu2 %1620  ;;  %v1702_v19 = vsel %vm1693_vm4, %v5040_v30, %v5039_v8  ;;  %v5043_v30 = vld [vmem:[#allocation12_spill] sm:$0xff] }
 0x27f   : > { %v901_v42 = vpop.permute.xlu1 %900  ;;  %v2102_v15 = vpop.f32.mrf.mxu1 }
 0x280   : > { %v1719_v53 = vsel %vm1693_vm4, %v3983_v6, %v901_v42  ;;  %v2103_v16 = vadd.f32 %v3832_v26, %v2102_v15  ;;  %v2330_v13 = vpop.f32.mrf.mxu2  ;;  %v1734_v15 = vsel %vm1725_vm5, %v1702_v19, %v5041_v36 }
 0x281   : > { %v2331_v20 = vadd.f32 %v4162_v29, %v2330_v13  ;;  %1350 = vrot.lane.b32.xlu0 %v3778_v43, %s2935_s29  ;;  %v4230_v11 = vsel %vm1725_vm5, %v1719_v53, %v1072_v59  ;;  %v5042_v43 = vld [vmem:[#allocation38_spill] sm:$0xff] }
 0x282   : > { %v2184_v2 = vmax.f32 %v2103_v16, 0.0  ;;  %v1767_v59 = vsel %vm1757_vm6, %v1734_v15, %v5042_v43 }
 0x283   : > { %v2424_v5 = vadd.f32 %v2797_v18, %v2331_v20  ;;  %v1337_v42 = vpop.permute.xlu0 %1336  ;;  %v1799_v16 = vsel %vm339_vm0, %v1767_v59, %v4098_v12  ;;  %v5044_v12 = vld [vmem:[#allocation43_spill] sm:$0xff] }
 0x284   : > { %2688 = vmatmul.msk.f32.gmra.mxu2 %vm1693_vm4, %v2184_v2  ;;  %1446 = vrot.lane.b32.xlu2 %v3783_v41, %s2936_s8  ;;  %v1832_v36 = vsel %vm1822_vm8, %v1799_v16, %v1337_v42  ;;  %v5045_v42 = vld [vmem:[#allocation28_spill] sm:$0xff] }
 0x285   : > { %v2456_v53 = vmax.f32 %v2424_v5, 0.0  ;;  %1265 = vrot.lane.b32.xlu1 %v4010_v0, %s2934_s23  ;;  %v1703_v15 = vsel %vm1693_vm4, %v5045_v42, %v3870_v25 }
 0x286   : > { %v1437_v13 = vpop.permute.xlu2 %1436  ;;  %v1735_v43 = vsel %vm1725_vm5, %v1703_v15, %v3926_v23 }
 0x287   : > { %2488 = vst.msk [vmem:[%s4189_s17 + $0x8] sm:$0xff] %vm339_vm0, %v2456_v53  ;;  %v1433_v20 = vpop.permute.xlu1 %1432  ;;  %v1768_v59 = vsel %vm1757_vm6, %v1735_v43, %v3977_v24  ;;  %v5050_v43 = vld [vmem:[#allocation40_spill] sm:$0xff] }
 0x288   : > { %v1865_v2 = vsel %vm1855_vm7, %v1832_v36, %v1433_v20  ;;  %v5047_v36 = vld [vmem:[#allocation16_spill] sm:$0xff]  ;;  %v5048_v20 = vld [vmem:[#allocation15_spill] sm:$0xff] }
 0x289   : > { %1366 = vrot.lane.b32.xlu0 %v4007_v35, %s2935_s29  ;;  %v1898_v8 = vsel %vm1888_vm9, %v1865_v2, %v1526_v28  ;;  %v5046_v28 = vld [vmem:[#allocation45_spill] sm:$0xff] }
 0x28b   : > { %v1619_v41 = vpop.permute.xlu0 %1618 }
 0x28c   : > { %1462 = vrot.lane.b32.xlu2 %v5043_v30, %s2936_s8  ;;  %v1931_v19 = vsel %vm1921_vm10, %v1898_v8, %v1619_v41 }
 0x28d   : > { %1539 = vrot.lane.b32.xlu1 %v5044_v12, %s2938_s11  ;;  %2658 = vmatmul.msk.f32.gmra.mxu1 %vm1967_vm11, %v1931_v19 }
 0x28e   : > { %v1242_v18 = vpop.permute.xlu2 %1241 }
 0x28f   : > { %v1238_v5 = vpop.permute.xlu1 %1237 }
 0x290   : > { %v1800_v53 = vsel %vm339_vm0, %v1768_v59, %v1238_v5  ;;  %v5049_v5 = vld [vmem:[#allocation29_spill] sm:$0xff] }
 0x291   : > { %1632 = vrot.lane.b32.xlu0 %v5046_v28, %s5001_s18  ;;  %v1833_v25 = vsel %vm1822_vm8, %v1800_v53, %v1339_v40  ;;  %v1704_v40 = vsel %vm1693_vm4, %v5049_v5, %v3890_v58 }
 0x293   : > { %v1435_v16 = vpop.permute.xlu0 %1434 }
 0x294   : > { %1648 = vrot.lane.b32.xlu2 %v5047_v36, %s5001_s18  ;;  %v1866_v23 = vsel %vm1855_vm7, %v1833_v25, %v1435_v16 }
 0x295   : > { %1555 = vrot.lane.b32.xlu1 %v5048_v20, %s2938_s11 }
 0x296   : > { %v1532_v2 = vpop.permute.xlu2 %1531 }
 0x297   : > { %v1528_v41 = vpop.permute.xlu1 %1527 }
 0x298   : > { %v1899_v8 = vsel %vm1888_vm9, %v1866_v23, %v1528_v41  ;;  %v5053_v41 = vld [vmem:[#allocation44_spill] sm:$0xff] }
 0x299   : > { %1251 = vrot.lane.b32.xlu0 %v3747_v17, %s2934_s23  ;;  %v1932_v24 = vsel %vm1921_vm10, %v1899_v8, %v1621_v62  ;;  %v1736_v17 = vsel %vm1725_vm5, %v1704_v40, %v5050_v43 }
 0x29a   : > { %2659 = vmatmul.msk.f32.gmra.mxu1 %vm1967_vm11, %v1932_v24  ;;  %v1769_v62 = vsel %vm1757_vm6, %v1736_v17, %v4018_v44  ;;  %v5054_v24 = vld [vmem:[#allocation11_spill] sm:$0xff] }
 0x29b   : > { %v1240_v19 = vpop.permute.xlu0 %1239  ;;  %v2798_v17 = vld [vmem:[%s3072_s16 + $0x10] sm:$0xff] }
 0x29c   : > { %1352 = vrot.lane.b32.xlu2 %v5038_v46, %s2935_s29  ;;  %v1801_v46 = vsel %vm339_vm0, %v1769_v62, %v1240_v19 }
 0x29d   : > { %1165 = vrot.lane.b32.xlu1 %v3950_v48, %s2933_s21 }
 0x29e   : > { %v1345_v42 = vpop.permute.xlu2 %1344 }
 0x29f   : > { %v1341_v15 = vpop.permute.xlu1 %1340 }
 0x2a0   : > { %v1834_v59 = vsel %vm1822_vm8, %v1801_v46, %v1341_v15  ;;  %v5055_v46 = vld [vmem:[#allocation14_spill] sm:$0xff] }
 0x2a1   : > { %1267 = vrot.lane.b32.xlu0 %v3980_v7, %s2934_s23  ;;  %v1867_v58 = vsel %vm1855_vm7, %v1834_v59, %v1437_v13  ;;  %v5051_v7 = vld [vmem:[#allocation33_spill] sm:$0xff] }
 0x2a2   : > { %v1705_v23 = vsel %vm1693_vm4, %v5051_v7, %v3924_v50 }
 0x2a3   : > { %v1530_v53 = vpop.permute.xlu0 %1529 }
 0x2a4   : > { %1368 = vrot.lane.b32.xlu2 %v3999_v10, %s2935_s29  ;;  %v1900_v16 = vsel %vm1888_vm9, %v1867_v58, %v1530_v53  ;;  %v5052_v10 = vld [vmem:[#allocation42_spill] sm:$0xff]  ;;  %v5056_v58 = vld [vmem:[#allocation13_spill] sm:$0xff] }
 0x2a5   : > { %1448 = vrot.lane.b32.xlu1 %v3795_v22, %s2936_s8  ;;  %v1737_v22 = vsel %vm1725_vm5, %v1705_v23, %v4022_v38  ;;  %v2799_v23 = vld [vmem:[%s3072_s16 + $0x18] sm:$0xff] }
 0x2a6   : > { %v1627_v48 = vpop.permute.xlu2 %1626  ;;  %v1770_v8 = vsel %vm1757_vm6, %v1737_v22, %v3962_v63 }
 0x2a7   : > { %v1623_v44 = vpop.permute.xlu1 %1622  ;;  %v1802_v50 = vsel %vm339_vm0, %v1770_v8, %v1242_v18 }
 0x2a8   : > { %v1933_v25 = vsel %vm1921_vm10, %v1900_v16, %v1623_v44 }
 0x2a9   : > { %2660 = vmatmul.msk.f32.gmra.mxu1 %vm1967_vm11, %v1933_v25  ;;  %1541 = vrot.lane.b32.xlu0 %v5052_v10, %s2938_s11 }
 0x2ab   : > { %v1343_v13 = vpop.permute.xlu0 %1342 }
 0x2ac   : > { %1634 = vrot.lane.b32.xlu2 %v5053_v41, %s5001_s18  ;;  %v1835_v40 = vsel %vm1822_vm8, %v1802_v50, %v1343_v13 }
 0x2ad   : > { %1464 = vrot.lane.b32.xlu1 %v5054_v24, %s2936_s8 }
 0x2ae   : > { %v2333_v19 = vpop.f32.mrf.mxu2  ;;  %v1443_v5 = vpop.permute.xlu2 %1442 }
 0x2af   : > { %v2334_v15 = vadd.f32 %v4162_v29, %v2333_v19  ;;  %v1439_v38 = vpop.permute.xlu1 %1438 }
 0x2b0   : > { %v1868_v43 = vsel %vm1855_vm7, %v1835_v40, %v1439_v38 }
 0x2b1   : > { %v2425_v62 = vadd.f32 %v2798_v17, %v2334_v15  ;;  %1557 = vrot.lane.b32.xlu0 %v5055_v46, %s2938_s11  ;;  %v1901_v53 = vsel %vm1888_vm9, %v1868_v43, %v1532_v2  ;;  %v5057_v43 = vld [vmem:[#allocation52_spill] sm:$0xff]  ;;  %v5058_v17 = vld [vmem:[#allocation19_spill] sm:$0xff] }
 0x2b3   : > { %v2457_v63 = vmax.f32 %v2425_v62, 0.0  ;;  %v1625_v59 = vpop.permute.xlu0 %1624 }
 0x2b4   : > { %1253 = vrot.lane.b32.xlu2 %v5044_v12, %s2934_s23  ;;  %v1934_v18 = vsel %vm1921_vm10, %v1901_v53, %v1625_v59  ;;  %v1706_v12 = vsel %vm1693_vm4, %v3545_v49, %v4004_v61 }
 0x2b5   : > { %2489 = vst.msk [vmem:[%s4189_s17 + $0x10] sm:$0xff] %vm339_vm0, %v2457_v63  ;;  %1650 = vrot.lane.b32.xlu1 %v5056_v58, %s5001_s18  ;;  %2661 = vmatmul.msk.f32.gmra.mxu1 %vm1967_vm11, %v1934_v18  ;;  %v1738_v2 = vsel %vm1725_vm5, %v1706_v12, %v4030_v21  ;;  %v5061_v12 = vld [vmem:[#allocation20_spill] sm:$0xff] }
 0x2b6   : > { %v2336_v16 = vpop.f32.mrf.mxu2  ;;  %v4333_v44 = vpop.permute.xlu2 %1247  ;;  %v1771_v13 = vsel %vm1757_vm6, %v1738_v2, %v4034_v39  ;;  %v2800_v2 = vld [vmem:[%s3072_s16 + $0x20] sm:$0xff] }
 0x2b7   : > { %v2337_v25 = vadd.f32 %v4162_v29, %v2336_v16  ;;  %v1244_v7 = vpop.permute.xlu1 %1243 }
 0x2b8   : > { %v1803_v50 = vsel %vm339_vm0, %v1771_v13, %v1244_v7 }
 0x2b9   : > { %v2426_v22 = vadd.f32 %v2799_v23, %v2337_v25  ;;  %1167 = vrot.lane.b32.xlu0 %v5043_v30, %s2933_s21  ;;  %v1836_v49 = vsel %vm1822_vm8, %v1803_v50, %v1345_v42 }
 0x2bb   : > { %v2458_v8 = vmax.f32 %v2426_v22, 0.0  ;;  %v1441_v19 = vpop.permute.xlu0 %1440 }
 0x2bc   : > { %1269 = vrot.lane.b32.xlu2 %v5048_v20, %s2934_s23  ;;  %v1869_v21 = vsel %vm1855_vm7, %v1836_v49, %v1441_v19 }
 0x2bd   : > { %2490 = vst.msk [vmem:[%s4189_s17 + $0x18] sm:$0xff] %vm339_vm0, %v2458_v8  ;;  %1354 = vrot.lane.b32.xlu1 %v5046_v28, %s2935_s29  ;;  %v1707_v28 = vsel %vm1693_vm4, %v3600_v3, %v4042_v33  ;;  %v5059_v33 = vld [vmem:[#allocation21_spill] sm:$0xff] }
 0x2be   : > { %v4354_v61 = vpop.permute.xlu2 %1263 }
 0x2bf   : > { %v1534_v40 = vpop.permute.xlu1 %1533 }
 0x2c0   : > { %v1902_v39 = vsel %vm1888_vm9, %v1869_v21, %v1534_v40  ;;  %v5062_v21 = vld [vmem:[#allocation51_spill] sm:$0xff] }
 0x2c1   : > { %1450 = vrot.lane.b32.xlu0 %v3848_v60, %s2936_s8  ;;  %v1935_v15 = vsel %vm1921_vm10, %v1902_v39, %v1627_v48  ;;  %v1739_v60 = vsel %vm1725_vm5, %v1707_v28, %v5057_v43  ;;  %v5063_v40 = vld [vmem:[#allocation55_spill] sm:$0xff]  ;;  %v5064_v43 = vld [vmem:[#allocation53_spill] sm:$0xff] }
 0x2c2   : > { %2662 = vmatmul.msk.f32.gmra.mxu1 %vm1967_vm11, %v1935_v15  ;;  %v1772_v48 = vsel %vm1757_vm6, %v1739_v60, %v4053_v47  ;;  %v2801_v15 = vld [vmem:[%s3072_s16 + $0x28] sm:$0xff] }
 0x2c3   : > { %v1246_v20 = vpop.permute.xlu0 %1245 }
 0x2c4   : > { %1543 = vrot.lane.b32.xlu2 %v3896_v32, %s2938_s11  ;;  %v1804_v62 = vsel %vm339_vm0, %v1772_v48, %v1246_v20 }
 0x2c5   : > { %1370 = vrot.lane.b32.xlu1 %v5047_v36, %s2935_s29  ;;  %v5060_v36 = vld [vmem:[#allocation48_spill] sm:$0xff] }
 0x2c6   : > { %v1538_v42 = vpop.permute.xlu2 %1537 }
 0x2c7   : > { %v1347_v38 = vpop.permute.xlu1 %1346 }
 0x2c8   : > { %v1837_v63 = vsel %vm1822_vm8, %v1804_v62, %v1347_v38 }
 0x2c9   : > { %1466 = vrot.lane.b32.xlu0 %v5058_v17, %s2936_s8  ;;  %v1870_v59 = vsel %vm1855_vm7, %v1837_v63, %v1443_v5 }
 0x2cb   : > { %v1536_v3 = vpop.permute.xlu0 %1535 }
 0x2cc   : > { %1559 = vrot.lane.b32.xlu2 %v5059_v33, %s2938_s11  ;;  %v1903_v47 = vsel %vm1888_vm9, %v1870_v59, %v1536_v3  ;;  %v5065_v3 = vld [vmem:[#allocation17_spill] sm:$0xff]  ;;  %v5066_v59 = vld [vmem:[#allocation46_spill] sm:$0xff] }
 0x2cd   : > { %1636 = vrot.lane.b32.xlu1 %v5060_v36, %s5001_s18 }
 0x2ce   : > { %v1554_v53 = vpop.permute.xlu2 %1553 }
 0x2cf   : > { %v1629_v18 = vpop.permute.xlu1 %1628  ;;  %v2339_v16 = vpop.f32.mrf.mxu2 }
 0x2d0   : > { %v2340_v25 = vadd.f32 %v4162_v29, %v2339_v16  ;;  %v1936_v7 = vsel %vm1921_vm10, %v1903_v47, %v1629_v18 }
 0x2d1   : > { %2663 = vmatmul.msk.f32.gmra.mxu1 %vm1967_vm11, %v1936_v7  ;;  %1652 = vrot.lane.b32.xlu0 %v5061_v12, %s5001_s18  ;;  %v543_v7 = vpop.f32.mrf.mxu3 }
 0x2d2   : > { %v2427_v23 = vadd.f32 %v2800_v2, %v2340_v25  ;;  %v5067_v2 = vld [vmem:[#allocation47_spill] sm:$0xff] }
 0x2d3   : > { %v1162_v22 = vpop.permute.xlu0 %1161 }
 0x2d4   : > { %v2459_v13 = vmax.f32 %v2427_v23, 0.0  ;;  %1169 = vrot.lane.b32.xlu2 %v5054_v24, %s2933_s21 }
 0x2d5   : > { %1255 = vrot.lane.b32.xlu1 %v5052_v10, %s2934_s23  ;;  %v1708_v10 = vsel %vm1693_vm4, %v3610_v14, %v5062_v21 }
 0x2d6   : > { %2491 = vst.msk [vmem:[%s4189_s17 + $0x20] sm:$0xff] %vm339_vm0, %v2459_v13  ;;  %v4395_v5 = vpop.permute.xlu2 %1163  ;;  %v1740_v39 = vsel %vm1725_vm5, %v1708_v10, %v5063_v40  ;;  %v5068_v13 = vld [vmem:[#allocation22_spill] sm:$0xff]  ;;  %v5070_v40 = vld [vmem:[#allocation41_spill] sm:$0xff] }
 0x2d7   : > { %v1349_v8 = vpop.permute.xlu1 %1348  ;;  %v1773_v60 = vsel %vm1757_vm6, %v1740_v39, %v5064_v43  ;;  %v544_v39 = vadd.f32 %v5070_v40, %v543_v7 }
 0x2d8   : > { %v1805_v14 = vsel %vm339_vm0, %v1773_v60, %v4333_v44 }
 0x2d9   : > { %1356 = vrot.lane.b32.xlu0 %v5053_v41, %s2935_s29  ;;  %v1838_v48 = vsel %vm1822_vm8, %v1805_v14, %v1349_v8  ;;  %v579_v43 = vmax.f32 %v544_v39, 0.0 }
 0x2db   : > { %v2342_v50 = vpop.f32.mrf.mxu2  ;;  %v1445_v19 = vpop.permute.xlu0 %1444 }
 0x2dc   : > { %v2343_v49 = vadd.f32 %v4162_v29, %v2342_v50  ;;  %1452 = vrot.lane.b32.xlu2 %v3853_v52, %s2936_s8  ;;  %v1871_v63 = vsel %vm1855_vm7, %v1838_v48, %v1445_v19 }
 0x2dd   : > { %1271 = vrot.lane.b32.xlu1 %v5055_v46, %s2934_s23  ;;  %v1781_v46 = vsel %vm1757_vm6, %v4148_v45, %v1162_v22  ;;  %v1904_v45 = vsel %vm1888_vm9, %v1871_v63, %v1538_v42  ;;  %v5069_v42 = vld [vmem:[#allocation18_spill] sm:$0xff] }
 0x2de   : > { %v2428_v41 = vadd.f32 %v2801_v15, %v2343_v49  ;;  %v4410_v20 = vpop.permute.xlu2 %1446  ;;  %v5074_v63 = vld [vmem:[#allocation58_spill] sm:$0xff] }
 0x2df   : > { %v1365_v28 = vpop.permute.xlu1 %1364 }
 0x2e0   : > { %v2460_v38 = vmax.f32 %v2428_v41, 0.0 }
 0x2e1   : > { %1372 = vrot.lane.b32.xlu0 %v5056_v58, %s2935_s29  ;;  %v1813_v58 = vsel %vm339_vm0, %v1781_v46, %v4354_v61 }
 0x2e2   : > { %2492 = vst.msk [vmem:[%s4189_s17 + $0x28] sm:$0xff] %vm339_vm0, %v2460_v38  ;;  %v1846_v47 = vsel %vm1822_vm8, %v1813_v58, %v1365_v28  ;;  %v5071_v28 = vld [vmem:[#allocation56_spill] sm:$0xff] }
 0x2e3   : > { %v1461_v62 = vpop.permute.xlu0 %1460 }
 0x2e4   : > { %1468 = vrot.lane.b32.xlu2 %v5065_v3, %s2936_s8  ;;  %v1879_v16 = vsel %vm1855_vm7, %v1846_v47, %v1461_v62  ;;  %v659_v47 = vrot.slane %v579_v43, 7 }
 0x2e5   : > { %1545 = vrot.lane.b32.xlu1 %v5066_v59, %s2938_s11  ;;  %v1912_v23 = vsel %vm1888_vm9, %v1879_v16, %v1554_v53  ;;  %v546_v53 = vpop.f32.mrf.mxu3 }
 0x2e6   : > { %v4430_v44 = vpop.permute.xlu2 %1462 }
 0x2e7   : > { %v1631_v18 = vpop.permute.xlu1 %1630 }
 0x2e8   : > { %v1937_v25 = vsel %vm1921_vm10, %v1904_v45, %v1631_v18  ;;  %v2802_v45 = vld [vmem:[%s3072_s16 + $0x30] sm:$0xff] }
 0x2e9   : > { %2664 = vmatmul.msk.f32.gmra.mxu1 %vm1967_vm11, %v1937_v25  ;;  %1638 = vrot.lane.b32.xlu0 %v5067_v2, %s5001_s18 }
 0x2eb   : > { %v1647_v61 = vpop.permute.xlu0 %1646 }
 0x2ec   : > { %v1945_v22 = vsel %vm1921_vm10, %v1912_v23, %v1647_v61  ;;  %1654 = vrot.lane.b32.xlu2 %v5068_v13, %s5001_s18 }
 0x2ed   : > { %1561 = vrot.lane.b32.xlu1 %v5069_v42, %s2938_s11  ;;  %2672 = vmatmul.msk.f32.vlgmr.msrb.gmra.mxu3 %vm1967_vm11, %v1945_v22  ;;  %v5075_v22 = vld [vmem:[#allocation49_spill] sm:$0xff] }
 0x2ee   : > { %v2105_v8 = vpop.f32.mrf.mxu1  ;;  %v1649_v50 = vpop.permute.xlu2 %1648 }
 0x2ef   : > { %v2106_v19 = vadd.f32 %v3832_v26, %v2105_v8  ;;  %v1250_v49 = vpop.permute.xlu1 %1249  ;;  %v547_v26 = vadd.f32 %v5070_v40, %v546_v53  ;;  %v4488_v8 = vsel %vm613_vm1, 0.0, %v659_v47 }
 0x2f0   : > { %v1212_v39 = vrot.slane %v4488_v8, 1 }
 0x2f1   : > { %v2185_v21 = vmax.f32 %v2106_v19, 0.0  ;;  %1257 = vrot.lane.b32.xlu0 %v3896_v32, %s2934_s23  ;;  %v5072_v32 = vld [vmem:[#allocation36_spill] sm:$0xff]  ;;  %v580_v60 = vmax.f32 %v547_v26, 0.0  ;;  %v1782_v19 = vsel %vm1757_vm6, %v4200_v56, %v4395_v5  ;;  %v5076_v26 = vld [vmem:[#allocation50_spill] sm:$0xff] }
 0x2f2   : > { %v1709_v38 = vsel %vm1693_vm4, %v5072_v32, %v5071_v28 }
 0x2f3   : > { %2689 = vmatmul.msk.f32.gmra.mxu2 %vm1693_vm4, %v2185_v21  ;;  %v1351_v10 = vpop.permute.xlu0 %1350  ;;  %v4470_v18 = vrot.slane %v580_v60, 7 }
 0x2f4   : > { %1358 = vrot.lane.b32.xlu2 %v5060_v36, %s2935_s29  ;;  %v5073_v36 = vld [vmem:[#allocation59_spill] sm:$0xff] }
 0x2f5   : > { %1171 = vrot.lane.b32.xlu1 %v5058_v17, %s2933_s21  ;;  %v1741_v14 = vsel %vm1725_vm5, %v1709_v38, %v5073_v36 }
 0x2f6   : > { %v4456_v15 = vpop.permute.xlu2 %1352  ;;  %v1774_v58 = vsel %vm1757_vm6, %v1741_v14, %v5074_v63  ;;  %v4525_v63 = vld [vmem:[%s4916_s4] ss:$0 sm:$0xff] }
 0x2f7   : > { %v1266_v41 = vpop.permute.xlu1 %1265 }
 0x2f8   : > { %v1814_v21 = vsel %vm339_vm0, %v1782_v19, %v1266_v41 }
 0x2f9   : > { %1273 = vrot.lane.b32.xlu0 %v5059_v33, %s2934_s23  ;;  %v1806_v33 = vsel %vm339_vm0, %v1774_v58, %v1250_v49 }
 0x2fa   : > { %v2345_v46 = vpop.f32.mrf.mxu2  ;;  %v1839_v7 = vsel %vm1822_vm8, %v1806_v33, %v1351_v10 }
 0x2fb   : > { %v2346_v48 = vadd.f32 %v4162_v29, %v2345_v46  ;;  %v1367_v62 = vpop.permute.xlu0 %1366  ;;  %v1872_v49 = vsel %vm1855_vm7, %v1839_v7, %v4410_v20  ;;  %v1313_v20 = vrot.slane %v4488_v8, 2 }
 0x2fc   : > { %1374 = vrot.lane.b32.xlu2 %v5061_v12, %s2935_s29  ;;  %v4481_v12 = vsel %vm613_vm1, %v659_v47, %v4470_v18  ;;  %v1847_v40 = vsel %vm1822_vm8, %v1814_v21, %v1367_v62  ;;  %v5079_v21 = vld [vmem:[#allocation60_spill] sm:$0xff] }
 0x2fd   : > { %v2429_v16 = vadd.f32 %v2802_v45, %v2346_v48  ;;  %1454 = vrot.lane.b32.xlu1 %v3907_v57, %s2936_s8  ;;  %v1213_v56 = vrot.slane %v4481_v12, 1  ;;  %v1880_v32 = vsel %vm1855_vm7, %v1847_v40, %v4430_v44  ;;  %v1314_v14 = vrot.slane %v4481_v12, 2  ;;  %v2803_v48 = vld [vmem:[%s3072_s16 + $0x38] sm:$0xff] }
 0x2fe   : > { %v4476_v25 = vpop.permute.xlu2 %1368 }
 0x2ff   : > { %v2461_v23 = vmax.f32 %v2429_v16, 0.0  ;;  %v1540_v61 = vpop.permute.xlu1 %1539  ;;  %v4514_v36 = vsel %vm772_vm3, %v1212_v39, %v1213_v56  ;;  %v4531_v16 = vsel %vm943_vm2, %v1313_v20, %v1314_v14 }
 0x300   : > { %v1905_v53 = vsel %vm1888_vm9, %v1872_v49, %v1540_v61 }
 0x301   : > { %2493 = vst.msk [vmem:[%s4189_s17 + $0x30] sm:$0xff] %vm339_vm0, %v2461_v23  ;;  %1547 = vrot.lane.b32.xlu0 %v5075_v22, %s2938_s11  ;;  %v5077_v23 = vld [vmem:[#allocation57_spill] sm:$0xff] }
 0x302   : > { %v1710_v61 = vsel %vm1693_vm4, %v3664_v54, %v5077_v23 }
 0x303   : > { %v1633_v10 = vpop.permute.xlu0 %1632 }
 0x304   : > { %1640 = vrot.lane.b32.xlu2 %v5076_v26, %s5001_s18  ;;  %v1938_v28 = vsel %vm1921_vm10, %v1905_v53, %v1633_v10 }
 0x305   : > { %1470 = vrot.lane.b32.xlu1 %v4488_v8, %s2936_s8  ;;  %2665 = vmatmul.msk.f32.gmra.mxu1 %vm1967_vm11, %v1938_v28 }
 0x306   : > { %v1635_v5 = vpop.permute.xlu2 %1634 }
 0x307   : > { %v1556_v41 = vpop.permute.xlu1 %1555  ;;  %v2348_v38 = vpop.f32.mrf.mxu2 }
 0x308   : > { %v1913_v43 = vsel %vm1888_vm9, %v1880_v32, %v1556_v41  ;;  %v2349_v60 = vadd.f32 %v4162_v29, %v2348_v38 }
 0x309   : > { %1563 = vrot.lane.b32.xlu0 %v4514_v36, %s2938_s11  ;;  %v1946_v46 = vsel %vm1921_vm10, %v1913_v43, %v1649_v50  ;;  %v740_v43 = vsel %vm613_vm1, %v4470_v18, 0.0 }
 0x30a   : > { %v2430_v44 = vadd.f32 %v2803_v48, %v2349_v60  ;;  %2673 = vmatmul.msk.f32.gmra.mxu3 %vm1967_vm11, %v1946_v46  ;;  %v2108_v62 = vpop.f32.mrf.mxu1  ;;  %v1215_v48 = vrot.slane %v740_v43, 1 }
 0x30b   : > { %v2109_v58 = vadd.f32 %v4525_v63, %v2108_v62  ;;  %v1252_v47 = vpop.permute.xlu0 %1251 }
 0x30c   : > { %v2462_v45 = vmax.f32 %v2430_v44, 0.0  ;;  %1157 = vrot.lane.b32.xlu2 %v3853_v52, %s2933_s21  ;;  %v5078_v52 = vld [vmem:[#allocation54_spill] sm:$0xff] }
 0x30d   : > { %v2186_v50 = vmax.f32 %v2109_v58, 0.0  ;;  %1656 = vrot.lane.b32.xlu1 %v4531_v16, %s5001_s18  ;;  %v1742_v49 = vsel %vm1725_vm5, %v1710_v61, %v5078_v52  ;;  %v1316_v58 = vrot.slane %v740_v43, 2 }
 0x30e   : > { %2494 = vst.msk [vmem:[%s4189_s17 + $0x38] sm:$0xff] %vm339_vm0, %v2462_v45  ;;  %v4539_v33 = vpop.permute.xlu2 %1253  ;;  %v1775_v53 = vsel %vm1757_vm6, %v1742_v49, %v5079_v21 }
 0x30f   : > { %v1166_v7 = vpop.permute.xlu1 %1165  ;;  %2690 = vmatmul.msk.f32.gmra.mxu2 %vm1693_vm4, %v2186_v50  ;;  %v1317_v50 = vsel %vm943_vm2, %v1314_v14, %v1316_v58 }
 0x310   : > { %v1783_v60 = vsel %vm1757_vm6, %v4210_v27, %v1166_v7 }
 0x311   : > { %1259 = vrot.lane.b32.xlu0 %v5066_v59, %s2934_s23  ;;  %v1807_v59 = vsel %vm339_vm0, %v1775_v53, %v1252_v47 }
 0x313   : > { %v1268_v19 = vpop.permute.xlu0 %1267 }
 0x314   : > { %1360 = vrot.lane.b32.xlu2 %v5067_v2, %s2935_s29  ;;  %v1840_v2 = vsel %vm1822_vm8, %v1807_v59, %v4456_v15 }
 0x315   : > { %1173 = vrot.lane.b32.xlu1 %v5065_v3, %s2933_s21 }
 0x316   : > { %v4555_v10 = vpop.permute.xlu2 %1269 }
 0x317   : > { %v1449_v40 = vpop.permute.xlu1 %1448  ;;  %v2111_v39 = vpop.f32.mrf.mxu1 }
 0x318   : > { %v2112_v54 = vadd.f32 %v4525_v63, %v2111_v39  ;;  %v1873_v20 = vsel %vm1855_vm7, %v1840_v2, %v1449_v40 }
 0x319   : > { %1275 = vrot.lane.b32.xlu0 %v5069_v42, %s2934_s23 }
 0x31a   : > { %v2187_v28 = vmax.f32 %v2112_v54, 0.0 }
 0x31b   : > { %v1542_v41 = vpop.permute.xlu0 %1541 }
 0x31c   : > { %2691 = vmatmul.msk.f32.gmra.mxu2 %vm1693_vm4, %v2187_v28  ;;  %v1906_v32 = vsel %vm1888_vm9, %v1873_v20, %v1542_v41  ;;  %1376 = vrot.lane.b32.xlu2 %v5068_v13, %s2935_s29  ;;  %v1815_v13 = vsel %vm339_vm0, %v1783_v60, %v1268_v19  ;;  %v5080_v28 = vmov 0.0  }
 0x31d   : > { %1456 = vrot.lane.b32.xlu1 %v3900_v55, %s2936_s8  ;;  %v1939_v38 = vsel %vm1921_vm10, %v1906_v32, %v1635_v5  ;;  %v1848_v55 = vsel %vm1822_vm8, %v1815_v13, %v4476_v25 }
 0x31e   : > { %v1544_v42 = vpop.permute.xlu2 %1543  ;;  %2666 = vmatmul.msk.f32.gmra.mxu1 %vm1967_vm11, %v1939_v38  ;;  %v5082_v38 = vld [vmem:[#allocation10_spill] sm:$0xff] }
 0x31f   : > { %v1465_v15 = vpop.permute.xlu1 %1464 }
 0x320   : > { %v1881_v18 = vsel %vm1855_vm7, %v1848_v55, %v1465_v15 }
 0x321   : > { %1549 = vrot.lane.b32.xlu0 %v3934_v31, %s2938_s11 }
 0x323   : > { %v1558_v46 = vpop.permute.xlu0 %1557 }
 0x324   : > { %1642 = vrot.lane.b32.xlu2 %v3986_v37, %s5001_s18  ;;  %v1914_v44 = vsel %vm1888_vm9, %v1881_v18, %v1558_v46  ;;  %v1216_v37 = vsel %vm772_vm3, %v1213_v56, %v1215_v48 }
 0x325   : > { %1472 = vrot.lane.b32.xlu1 %v4481_v12, %s2936_s8 }
 0x326   : > { %v2114_v5 = vpop.f32.mrf.mxu1  ;;  %v1560_v27 = vpop.permute.xlu2 %1559 }
 0x327   : > { %v2115_v31 = vadd.f32 %v4525_v63, %v2114_v5  ;;  %v1651_v62 = vpop.permute.xlu1 %1650 }
 0x328   : > { %v1947_v47 = vsel %vm1921_vm10, %v1914_v44, %v1651_v62 }
 0x329   : > { %v2188_v25 = vmax.f32 %v2115_v31, 0.0  ;;  %2674 = vmatmul.msk.f32.gmra.mxu3 %vm1967_vm11, %v1947_v47  ;;  %1565 = vrot.lane.b32.xlu0 %v1216_v37, %s2938_s11 }
 0x32b   : > { %2692 = vmatmul.msk.f32.gmra.mxu2 %vm1693_vm4, %v2188_v25  ;;  %v1168_v45 = vpop.permute.xlu0 %1167 }
 0x32c   : > { %1159 = vrot.lane.b32.xlu2 %v3907_v57, %s2933_s21  ;;  %v1784_v49 = vsel %vm1757_vm6, %v4230_v11, %v1168_v45 }
 0x32d   : > { %1658 = vrot.lane.b32.xlu1 %v1317_v50, %s5001_s18 }
 0x32e   : > { %v1170_v7 = vpop.permute.xlu2 %1169 }
 0x32f   : > { %v1355_v23 = vpop.permute.xlu1 %1354  ;;  %v1785_v55 = vsel %vm1757_vm6, %v4217_v4, %v1170_v7 }
 0x331   : > { %1261 = vrot.lane.b32.xlu0 %v5075_v22, %s2934_s23  ;;  %v1808_v22 = vsel %vm339_vm0, %v4096_v34, %v4539_v33 }
 0x332   : > { %v2117_v56 = vpop.f32.mrf.mxu1 }
 0x333   : > { %v2118_v61 = vadd.f32 %v4525_v63, %v2117_v56  ;;  %v1451_v19 = vpop.permute.xlu0 %1450 }
 0x334   : > { %1362 = vrot.lane.b32.xlu2 %v5076_v26, %s2935_s29  ;;  %v1841_v26 = vsel %vm1822_vm8, %v1808_v22, %v1355_v23 }
 0x335   : > { %v2189_v52 = vmax.f32 %v2118_v61, 0.0  ;;  %1175 = vrot.lane.b32.xlu1 %v4488_v8, %s2933_s21  ;;  %v1874_v53 = vsel %vm1855_vm7, %v1841_v26, %v1451_v19  ;;  %v1816_v8 = vsel %vm339_vm0, %v1784_v49, %v4555_v10 }
 0x336   : > { %v1453_v14 = vpop.permute.xlu2 %1452  ;;  %v1907_v11 = vsel %vm1888_vm9, %v1874_v53, %v1544_v42 }
 0x337   : > { %v1371_v57 = vpop.permute.xlu1 %1370  ;;  %2693 = vmatmul.msk.f32.gmra.mxu2 %vm1693_vm4, %v2189_v52 }
 0x338   : > { %v1849_v34 = vsel %vm1822_vm8, %v1816_v8, %v1371_v57  ;;  %v5083_v8 = vld [vmem:[#allocation26_spill] sm:$0xff] }
 0x339   : > { %1277 = vrot.lane.b32.xlu0 %v4514_v36, %s2934_s23 }
 0x33b   : > { %v1467_v21 = vpop.permute.xlu0 %1466 }
 0x33c   : > { %1378 = vrot.lane.b32.xlu2 %v4531_v16, %s2935_s29  ;;  %v1882_v40 = vsel %vm1855_vm7, %v1849_v34, %v1467_v21 }
 0x33d   : > { %1458 = vrot.lane.b32.xlu1 %v3983_v6, %s2936_s8  ;;  %v1915_v10 = vsel %vm1888_vm9, %v1882_v40, %v1560_v27 }
 0x33e   : > { %v1469_v36 = vpop.permute.xlu2 %1468 }
 0x33f   : > { %v1637_v33 = vpop.permute.xlu1 %1636  ;;  %v2120_v59 = vpop.f32.mrf.mxu1 }
 0x340   : > { %v2121_v39 = vadd.f32 %v4525_v63, %v2120_v59  ;;  %v1940_v54 = vsel %vm1921_vm10, %v1907_v11, %v1637_v33  ;;  %v5084_v33 = vld [vmem:[#allocation27_spill] sm:$0xff] }
 0x341   : > { %2667 = vmatmul.msk.f32.gmra.mxu1 %vm1967_vm11, %v1940_v54  ;;  %1551 = vrot.lane.b32.xlu0 %v4010_v0, %s2938_s11  ;;  %v5081_v0 = vld [vmem:[#allocation9_spill] sm:$0xff] }
 0x342   : > { %v2190_v6 = vmax.f32 %v2121_v39, 0.0  ;;  %v2805_v39 = vld [vmem:[%s3072_s16 + $0x40] sm:$0xff] }
 0x343   : > { %v1653_v16 = vpop.permute.xlu0 %1652 }
 0x344   : > { %2694 = vmatmul.msk.f32.gmra.mxu2 %vm1693_vm4, %v2190_v6  ;;  %1644 = vrot.lane.b32.xlu2 %v4007_v35, %s5001_s18  ;;  %v1948_v2 = vsel %vm1921_vm10, %v1915_v10, %v1653_v16 }
 0x345   : > { %1474 = vrot.lane.b32.xlu1 %v5080_v28, %s2936_s8  ;;  %2675 = vmatmul.msk.f32.gmra.mxu3 %vm1967_vm11, %v1948_v2 }
 0x346   : > { %v1655_v20 = vpop.permute.xlu2 %1654 }
 0x347   : > { %v1256_v41 = vpop.permute.xlu1 %1255 }
 0x348   : > { %v1809_v46 = vsel %vm339_vm0, %v4108_v9, %v1256_v41 }
 0x349   : > { %1567 = vrot.lane.b32.xlu0 %v5081_v0, %s2938_s11 }
 0x34b   : > { %v1357_v32 = vpop.permute.xlu0 %1356 }
 0x34c   : > { %1177 = vrot.lane.b32.xlu2 %v4481_v12, %s2933_s21  ;;  %v1842_v12 = vsel %vm1822_vm8, %v1809_v46, %v1357_v32 }
 0x34d   : > { %1660 = vrot.lane.b32.xlu1 %v5082_v38, %s5001_s18  ;;  %v1875_v18 = vsel %vm1855_vm7, %v1842_v12, %v1453_v14 }
 0x34e   : > { %v2123_v35 = vpop.f32.mrf.mxu1  ;;  %v1359_v43 = vpop.permute.xlu2 %1358 }
 0x34f   : > { %v2124_v42 = vadd.f32 %v4525_v63, %v2123_v35  ;;  %v1272_v15 = vpop.permute.xlu1 %1271 }
 0x350   : > { %v1817_v27 = vsel %vm339_vm0, %v1785_v55, %v1272_v15 }
 0x351   : > { %v2191_v60 = vmax.f32 %v2124_v42, 0.0  ;;  %1279 = vrot.lane.b32.xlu0 %v1216_v37, %s2934_s23  ;;  %s2880_s23 = scalar_lea.hbm %s4919_s7, 512 }
 0x353   : > { %2695 = vmatmul.msk.f32.gmra.mxu2 %vm1693_vm4, %v2191_v60  ;;  %v1373_v13 = vpop.permute.xlu0 %1372 }
 0x354   : > { %v1850_v62 = vsel %vm1822_vm8, %v1817_v27, %v1373_v13 }
 0x355   : > { %1380 = vrot.lane.b32.xlu1 %v1317_v50, %s2935_s29  ;;  %v1883_v47 = vsel %vm1855_vm7, %v1850_v62, %v1469_v36  ;;  %v1721_v36 = vsel %vm1693_vm4, %v5043_v30, %v5083_v8  ;;  %s2719_s29 = sshll.u32 %s3001_s28, 8 }
 0x356   : > { %v1375_v5 = vpop.permute.xlu2 %1374  ;;  %v1753_v59 = vsel %vm1725_vm5, %v1721_v36, %v5084_v33  ;;  %s2531_s18 = scalar_lea.hbm %s4919_s7, %s2719_s29 }
 0x357   : > { %v1546_v48 = vpop.permute.xlu1 %1545  ;;  %s2534_s10 = sshll.u32 %s2531_s18, 4  ;;  %s2535_s10 = int_to_ptr.hbm [resolvable:$true] %s2534_s10 }
 0x358   : > { %v1908_v44 = vsel %vm1888_vm9, %v1875_v18, %v1546_v48  ;;  %s2874_s12 = sshra.s32 %s2535_s10, 4  ;;  %s2875_s12 = int_to_ptr.hbm [resolvable:$true] %s2874_s12 }
 0x359   : > { %s2876_s28 = scalar_lea.hbm %s2875_s12, 256  ;;  %p2881_p0 = scmp.lt.s32.totalorder %s2875_s12, %s4919_s7 }
 0x35a   : > { %p2877_p6 = scmp.ne.s32.totalorder %s2875_s12, %s2876_s28  ;;  %p2882_p1 = scmp.lt.s32.totalorder %s2880_s23, %s2876_s28 }
 0x35b   : > { %v1639_v31 = vpop.permute.xlu0 %1638 }
 0x35c   : > { %v1941_v58 = vsel %vm1921_vm10, %v1908_v44, %v1639_v31  ;;  %v5085_v31 = vld [vmem:[#allocation25_spill] sm:$0xff]  ;;  %p2878_p9 = pnand %p2877_p6, %p3030_p11  ;;  %p2883_p3 = por %p2882_p1, %p2881_p0 }
 0x35d   : > { %2668 = vmatmul.msk.f32.gmra.mxu1 %vm1967_vm11, %v1941_v58  ;;  %v1722_v62 = vsel %vm1693_vm4, %v5054_v24, %v5085_v31  ;;  %v2806_v58 = vld [vmem:[%s3072_s16 + $0x48] sm:$0xff] }
 0x35e   : > { %v1641_v45 = vpop.permute.xlu2 %1640  ;;  %p2879_p13 = pneg %p2878_p9 }
 0x35f   : > { %v1562_v9 = vpop.permute.xlu1 %1561 }
 0x360   : > { %v1916_v37 = vsel %vm1888_vm9, %v1883_v47, %v1562_v9  ;;  %p2884_p4 = pnand %p2883_p3, %p2879_p13 }
 0x361   : > { %v1949_v4 = vsel %vm1921_vm10, %v1916_v37, %v1655_v20 }
 0x362   : > { %2676 = vmatmul.msk.f32.gmra.mxu3 %vm1967_vm11, %v1949_v4 }
 0x363   : > { %v1258_v25 = vpop.permute.xlu0 %1257 }
 0x364   : > { %v1810_v52 = vsel %vm339_vm0, %v4134_v1, %v1258_v25  ;;  %v5086_v25 = vld [vmem:[#allocation23_spill] sm:$0xff] }
 0x365   : > { %v1843_v57 = vsel %vm1822_vm8, %v1810_v52, %v1359_v43 }
 0x366   : > { %v2126_v50 = vpop.f32.mrf.mxu1  ;;  %v1158_v19 = vpop.permute.xlu2 %1157 }
 0x367   : > { %v2127_v7 = vadd.f32 %v4525_v63, %v2126_v50  ;;  %v1172_v23 = vpop.permute.xlu1 %1171  ;;  %v1779_v13 = vsel %vm1757_vm6, %v4125_v51, %v1158_v19 }
 0x368   : > { %v1786_v40 = vsel %vm1757_vm6, %v1753_v59, %v1172_v23 }
 0x369   : > { %v2192_v56 = vmax.f32 %v2127_v7, 0.0 }
 0x36b   : > { %2696 = vmatmul.msk.f32.gmra.mxu2 %vm1693_vm4, %v2192_v56  ;;  %v1274_v61 = vpop.permute.xlu0 %1273 }
 0x36c   : > { %v1818_v6 = vsel %vm339_vm0, %v1786_v40, %v1274_v61 }
 0x36d   : > { %v1851_v2 = vsel %vm1822_vm8, %v1818_v6, %v1375_v5 }
 0x36e   : > { %v1361_v11 = vpop.permute.xlu2 %1360 }
 0x36f   : > { %v1455_v14 = vpop.permute.xlu1 %1454 }
 0x370   : > { %v1876_v22 = vsel %vm1855_vm7, %v1843_v57, %v1455_v14 }
 0x373   : > { %v1548_v49 = vpop.permute.xlu0 %1547 }
 0x374   : > { %v1909_v26 = vsel %vm1888_vm9, %v1876_v22, %v1548_v49 }
 0x375   : > { %v1942_v21 = vsel %vm1921_vm10, %v1909_v26, %v1641_v45  ;;  %v1754_v45 = vsel %vm1725_vm5, %v1722_v62, %v5086_v25 }
 0x376   : > { %v2351_v53 = vpop.f32.mrf.mxu2  ;;  %2669 = vmatmul.msk.f32.gmra.mxu1 %vm1967_vm11, %v1942_v21  ;;  %v1377_v0 = vpop.permute.xlu2 %1376 }
 0x377   : > { %v2352_v1 = vadd.f32 %v4162_v29, %v2351_v53  ;;  %v1471_v34 = vpop.permute.xlu1 %1470  ;;  %v2807_v53 = vld [vmem:[%s3072_s16 + $0x50] sm:$0xff] }
 0x378   : > { %v1884_v30 = vsel %vm1855_vm7, %v1851_v2, %v1471_v34 }
 0x379   : > { %v2431_v54 = vadd.f32 %v2805_v39, %v2352_v1 }
 0x37b   : > { %v2463_v16 = vmax.f32 %v2431_v54, 0.0  ;;  %v1564_v10 = vpop.permute.xlu0 %1563  ;;  %v4728_v54 = vld [vmem:[%s4918_s6] ss:$0 sm:$0xff] }
 0x37c   : > { %v1917_v28 = vsel %vm1888_vm9, %v1884_v30, %v1564_v10  ;;  %v2809_v10 = vld [vmem:[%s3072_s16 + $0x58] sm:$0xff] }
 0x37d   : > { %2495 = vst.msk [vmem:[%s4189_s17 + $0x40] sm:$0xff] %vm339_vm0, %v2463_v16 }
 0x37e   : > { %v1643_v60 = vpop.permute.xlu2 %1642 }
 0x37f   : > { %v1657_v20 = vpop.permute.xlu1 %1656 }
 0x380   : > { %v1950_v41 = vsel %vm1921_vm10, %v1917_v28, %v1657_v20 }
 0x381   : > { %2677 = vmatmul.msk.f32.gmra.mxu3 %vm1967_vm11, %v1950_v41 }
 0x382   : > { %v2129_v32 = vpop.f32.mrf.mxu1 }
 0x383   : > { %v2130_v38 = vadd.f32 %v4525_v63, %v2129_v32  ;;  %v1260_v35 = vpop.permute.xlu0 %1259 }
 0x384   : > { %v1811_v46 = vsel %vm339_vm0, %v1779_v13, %v1260_v35  ;;  %v5088_v35 = vld [vmem:[#allocation30_spill] sm:$0xff] }
 0x385   : > { %v2193_v42 = vmax.f32 %v2130_v38, 0.0  ;;  %v1844_v48 = vsel %vm1822_vm8, %v1811_v46, %v1361_v11  ;;  %v5087_v11 = vld [vmem:[#allocation61_spill] sm:$0xff] }
 0x386   : > { %v1160_v47 = vpop.permute.xlu2 %1159 }
 0x387   : > { %v1174_v15 = vpop.permute.xlu1 %1173  ;;  %2697 = vmatmul.msk.f32.gmra.mxu2 %vm1693_vm4, %v2193_v42  ;;  %v1723_v42 = vsel %vm1693_vm4, %v5058_v17, %v5088_v35 }
 0x388   : > { %v1787_v50 = vsel %vm1757_vm6, %v1754_v45, %v1174_v15  ;;  %v5090_v45 = vld [vmem:[#allocation31_spill] sm:$0xff] }
 0x38b   : > { %v1276_v43 = vpop.permute.xlu0 %1275 }
 0x38c   : > { %v1819_v7 = vsel %vm339_vm0, %v1787_v50, %v1276_v43  ;;  %v5089_v43 = vld [vmem:[#allocation32_spill] sm:$0xff]  ;;  %v1724_v50 = vsel %vm1693_vm4, %v5065_v3, %v5090_v45 }
 0x38d   : > { %v1852_v61 = vsel %vm1822_vm8, %v1819_v7, %v1377_v0 }
 0x38e   : > { %v1363_v49 = vpop.permute.xlu2 %1362 }
 0x38f   : > { %v1457_v12 = vpop.permute.xlu1 %1456 }
 0x390   : > { %v1877_v18 = vsel %vm1855_vm7, %v1844_v48, %v1457_v12  ;;  %v4746_v48 = vpop.f32.mrf.mxu3 }
 0x392   : > { %v2354_v55 = vpop.f32.mrf.mxu2 }
 0x393   : > { %v2355_v5 = vadd.f32 %v4162_v29, %v2354_v55  ;;  %v1550_v27 = vpop.permute.xlu0 %1549 }
 0x394   : > { %v1910_v44 = vsel %vm1888_vm9, %v1877_v18, %v1550_v27  ;;  %v2810_v27 = vld [vmem:[%s3072_s16 + $0x60] sm:$0xff] }
 0x395   : > { %v2432_v51 = vadd.f32 %v2806_v58, %v2355_v5  ;;  %v1943_v9 = vsel %vm1921_vm10, %v1910_v44, %v1643_v60  ;;  %v1755_v60 = vsel %vm1725_vm5, %v1723_v42, %v5089_v43 }
 0x396   : > { %2670 = vmatmul.msk.f32.gmra.mxu1 %vm1967_vm11, %v1943_v9  ;;  %v1379_v33 = vpop.permute.xlu2 %1378 }
 0x397   : > { %v2464_v37 = vmax.f32 %v2432_v51, 0.0  ;;  %v1473_v4 = vpop.permute.xlu1 %1472 }
 0x398   : > { %v1885_v19 = vsel %vm1855_vm7, %v1852_v61, %v1473_v4  ;;  %v4758_v4 = vpop.f32.mrf.mxu3 }
 0x399   : > { %2496 = vst.msk [vmem:[%s4189_s17 + $0x48] sm:$0xff] %vm339_vm0, %v2464_v37 }
 0x39b   : > { %v2132_v24 = vpop.f32.mrf.mxu1  ;;  %v1566_v23 = vpop.permute.xlu0 %1565 }
 0x39c   : > { %v2133_v56 = vadd.f32 %v4525_v63, %v2132_v24  ;;  %v1918_v14 = vsel %vm1888_vm9, %v1885_v19, %v1566_v23  ;;  %v5091_v24 = vld [vmem:[#allocation34_spill] sm:$0xff] }
 0x39d   : > { %v1756_v23 = vsel %vm1725_vm5, %v1724_v50, %v5091_v24 }
 0x39e   : > { %v2194_v52 = vmax.f32 %v2133_v56, 0.0  ;;  %v1645_v0 = vpop.permute.xlu2 %1644 }
 0x39f   : > { %v1659_v57 = vpop.permute.xlu1 %1658  ;;  %v2357_v22 = vpop.f32.mrf.mxu2 }
 0x3a0   : > { %v2358_v26 = vadd.f32 %v4162_v29, %v2357_v22  ;;  %v1951_v21 = vsel %vm1921_vm10, %v1918_v14, %v1659_v57  ;;  %2698 = vmatmul.msk.f32.gmra.mxu2 %vm1693_vm4, %v2194_v52  ;;  %v1780_v29 = vsel %vm1757_vm6, %v5087_v11, %v1160_v47 }
 0x3a1   : > { %2678 = vmatmul.msk.f32.gmra.mxu3 %vm1967_vm11, %v1951_v21 }
 0x3a2   : > { %v2433_v8 = vadd.f32 %v2807_v53, %v2358_v26 }
 0x3a3   : > { %v1262_v36 = vpop.permute.xlu0 %1261 }
 0x3a4   : > { %v2465_v1 = vmax.f32 %v2433_v8, 0.0  ;;  %v1812_v39 = vsel %vm339_vm0, %v1780_v29, %v1262_v36  ;;  %v2812_v29 = vld [vmem:[%s3072_s16 + $0x70] sm:$0xff] }
 0x3a5   : > { %v1845_v30 = vsel %vm1822_vm8, %v1812_v39, %v1363_v49  ;;  %v2811_v49 = vld [vmem:[%s3072_s16 + $0x68] sm:$0xff] }
 0x3a6   : > { %2497 = vst.msk [vmem:[%s4189_s17 + $0x50] sm:$0xff] %vm339_vm0, %v2465_v1  ;;  %v1178_v25 = vpop.permute.xlu2 %1177 }
 0x3a7   : > { %v1176_v34 = vpop.permute.xlu1 %1175  ;;  %v1789_v56 = vsel %vm1757_vm6, %v1756_v23, %v1178_v25  ;;  %v2151_v23 = vadd.f32 %v4525_v63, %v4746_v48 }
 0x3a8   : > { %v1788_v13 = vsel %vm1757_vm6, %v1755_v60, %v1176_v34 }
 0x3ab   : > { %v1278_v59 = vpop.permute.xlu0 %1277 }
 0x3ac   : > { %v1820_v46 = vsel %vm339_vm0, %v1788_v13, %v1278_v59  ;;  %v2156_v21 = vpop.f32.mrf.mxu3 }
 0x3ad   : > { %v1853_v5 = vsel %vm1822_vm8, %v1820_v46, %v1379_v33  ;;  %v2157_v36 = vadd.f32 %v4525_v63, %v2156_v21 }
 0x3ae   : > { %v2360_v40 = vpop.f32.mrf.mxu2 }
 0x3af   : > { %v2361_v6 = vadd.f32 %v4728_v54, %v2360_v40  ;;  %v1459_v16 = vpop.permute.xlu1 %1458  ;;  %v2202_v1 = vmax.f32 %v2157_v36, 0.0 }
 0x3b0   : > { %v1878_v20 = vsel %vm1855_vm7, %v1845_v30, %v1459_v16 }
 0x3b1   : > { %v2434_v2 = vadd.f32 %v2809_v10, %v2361_v6 }
 0x3b3   : > { %v2466_v28 = vmax.f32 %v2434_v2, 0.0  ;;  %v1552_v41 = vpop.permute.xlu0 %1551 }
 0x3b4   : > { %v1911_v32 = vsel %vm1888_vm9, %v1878_v20, %v1552_v41 }
 0x3b5   : > { %2498 = vst.msk [vmem:[%s4189_s17 + $0x58] sm:$0xff] %vm339_vm0, %v2466_v28  ;;  %v1944_v38 = vsel %vm1921_vm10, %v1911_v32, %v1645_v0  ;;  %v2813_v32 = vld [vmem:[%s3072_s16 + $0x78] sm:$0xff] }
 0x3b6   : > { %2671 = vmatmul.msk.f32.gmra.mxu1 %vm1967_vm11, %v1944_v38 }
 0x3b7   : > { %v1475_v15 = vpop.permute.xlu1 %1474 }
 0x3b8   : > { %v1886_v17 = vsel %vm1855_vm7, %v1853_v5, %v1475_v15 }
 0x3ba   : > { %v2363_v12 = vpop.f32.mrf.mxu2 }
 0x3bb   : > { %v2364_v55 = vadd.f32 %v4728_v54, %v2363_v12  ;;  %v1568_v18 = vpop.permute.xlu0 %1567 }
 0x3bc   : > { %v1919_v58 = vsel %vm1888_vm9, %v1886_v17, %v1568_v18 }
 0x3bd   : > { %v2435_v44 = vadd.f32 %v2810_v27, %v2364_v55 }
 0x3be   : > { %v2135_v31 = vpop.f32.mrf.mxu1 }
 0x3bf   : > { %v2467_v62 = vmax.f32 %v2435_v44, 0.0  ;;  %v2136_v51 = vadd.f32 %v4525_v63, %v2135_v31  ;;  %v1661_v9 = vpop.permute.xlu1 %1660 }
 0x3c0   : > { %v1952_v47 = vsel %vm1921_vm10, %v1919_v58, %v1661_v9 }
 0x3c1   : > { %2499 = vst.msk [vmem:[%s4189_s17 + $0x60] sm:$0xff] %vm339_vm0, %v2467_v62  ;;  %v2195_v37 = vmax.f32 %v2136_v51, 0.0  ;;  %2679 = vmatmul.msk.f32.gmra.mxu3 %vm1967_vm11, %v1952_v47  ;;  %v2815_v47 = vld [vmem:[%s3072_s16 + $0x88] sm:$0xff] }
 0x3c3   : > { %2699 = vmatmul.msk.f32.gmra.mxu2 %vm1693_vm4, %v2195_v37  ;;  %v1280_v7 = vpop.permute.xlu0 %1279 }
 0x3c4   : > { %v1821_v61 = vsel %vm339_vm0, %v1789_v56, %v1280_v7  ;;  %v2200_v56 = vmax.f32 %v2151_v23, 0.0 }
 0x3c7   : > { %v1381_v19 = vpop.permute.xlu1 %1380  ;;  %v2366_v52 = vpop.f32.mrf.mxu2 }
 0x3c8   : > { %v1854_v14 = vsel %vm1822_vm8, %v1821_v61, %v1381_v19  ;;  %v2367_v57 = vadd.f32 %v4728_v54, %v2366_v52  ;;  %v2159_v34 = vpop.f32.mrf.mxu3  ;;  %v2154_v61 = vadd.f32 %v4525_v63, %v4758_v4 }
 0x3c9   : > { %v1887_v22 = vsel %vm1855_vm7, %v1854_v14, %v1475_v15  ;;  %v2160_v33 = vadd.f32 %v4525_v63, %v2159_v34 }
 0x3ca   : > { %v2436_v3 = vadd.f32 %v2811_v49, %v2367_v57  ;;  %v1920_v26 = vsel %vm1888_vm9, %v1887_v22, %v1568_v18  ;;  %v2814_v18 = vld [vmem:[%s3072_s16 + $0x80] sm:$0xff]  ;;  %v2201_v14 = vmax.f32 %v2154_v61, 0.0 }
 0x3cb   : > { %v1953_v53 = vsel %vm1921_vm10, %v1920_v26, %v1661_v9  ;;  %v2203_v39 = vmax.f32 %v2160_v33, 0.0 }
 0x3cc   : > { %v2468_v8 = vmax.f32 %v2436_v3, 0.0  ;;  %2680 = vmatmul.msk.f32.gmra.mxu3 %vm1967_vm11, %v1953_v53  ;;  %v2816_v3 = vld [vmem:[%s3072_s16 + $0x90] sm:$0xff] }
 0x3ce   : > { %2500 = vst.msk [vmem:[%s4189_s17 + $0x68] sm:$0xff] %vm339_vm0, %v2468_v8 }
 0x3d4   : > { %2706 = vmatmul.msk.f32.vlgmr.msra.gmra.mxu3 %vm1693_vm4, %v2202_v1  ;;  %v2817_v1 = vld [vmem:[%s3072_s16 + $0xc8] sm:$0xff] }
 0x3d6   : > { %v2369_v59 = vpop.f32.mrf.mxu2 }
 0x3d7   : > { %v2370_v11 = vadd.f32 %v4728_v54, %v2369_v59 }
 0x3d9   : > { %v2437_v40 = vadd.f32 %v2812_v29, %v2370_v11 }
 0x3da   : > { %v2138_v6 = vpop.f32.mrf.mxu1 }
 0x3db   : > { %v2469_v16 = vmax.f32 %v2437_v40, 0.0  ;;  %v2139_v10 = vadd.f32 %v4525_v63, %v2138_v6 }
 0x3dc   : > { %2707 = vmatmul.msk.f32.gmra.mxu3 %vm1693_vm4, %v2203_v39 }
 0x3dd   : > { %2501 = vst.msk [vmem:[%s4189_s17 + $0x70] sm:$0xff] %vm339_vm0, %v2469_v16  ;;  %v2196_v2 = vmax.f32 %v2139_v10, 0.0  ;;  %v2819_v16 = vld [vmem:[%s3072_s16 + $0x98] sm:$0xff] }
 0x3df   : > { %2700 = vmatmul.msk.f32.gmra.mxu2 %vm1693_vm4, %v2196_v2 }
 0x3e5   : > { %v2162_v30 = vpop.f32.mrf.mxu3 }
 0x3e6   : > { %v2163_v28 = vadd.f32 %v4525_v63, %v2162_v30 }
 0x3e8   : > { %v2204_v20 = vmax.f32 %v2163_v28, 0.0 }
 0x3ea   : > { %2708 = vmatmul.msk.f32.gmra.mxu3 %vm1693_vm4, %v2204_v20  ;;  %v2820_v20 = vld [vmem:[%s3072_s16 + $0xd8] sm:$0xff] }
 0x3ee   : > { %v2372_v41 = vpop.f32.mrf.mxu2 }
 0x3ef   : > { %v2373_v0 = vadd.f32 %v4728_v54, %v2372_v41 }
 0x3f1   : > { %v2438_v38 = vadd.f32 %v2813_v32, %v2373_v0 }
 0x3f3   : > { %v2470_v35 = vmax.f32 %v2438_v38, 0.0  ;;  %v2141_v42 = vpop.f32.mrf.mxu1 }
 0x3f4   : > { %v2142_v15 = vadd.f32 %v4525_v63, %v2141_v42 }
 0x3f5   : > { %2502 = vst.msk [vmem:[%s4189_s17 + $0x78] sm:$0xff] %vm339_vm0, %v2470_v35  ;;  %v2821_v35 = vld [vmem:[%s3072_s16 + $0xa0] sm:$0xff] }
 0x3f6   : > { %v2197_v43 = vmax.f32 %v2142_v15, 0.0 }
 0x3f8   : > { %2701 = vmatmul.msk.f32.gmra.mxu2 %vm1693_vm4, %v2197_v43 }
 0x404   : > { %v2165_v60 = vpop.f32.mrf.mxu3 }
 0x405   : > { %v2166_v13 = vadd.f32 %v4525_v63, %v2165_v60 }
 0x407   : > { %v2205_v46 = vmax.f32 %v2166_v13, 0.0  ;;  %v2822_v13 = vld [vmem:[%s3072_s16 + $0xe0] sm:$0xff] }
 0x409   : > { %2709 = vmatmul.msk.f32.gmra.mxu3 %vm1693_vm4, %v2205_v46 }
 0x40a   : > { %v2375_v12 = vpop.f32.mrf.mxu2 }
 0x40b   : > { %v2376_v55 = vadd.f32 %v4728_v54, %v2375_v12 }
 0x40d   : > { %v2439_v5 = vadd.f32 %v2814_v18, %v2376_v55 }
 0x40f   : > { %v2471_v27 = vmax.f32 %v2439_v5, 0.0  ;;  %v2823_v5 = vld [vmem:[%s3072_s16 + $0xa8] sm:$0xff] }
 0x411   : > { %2503 = vst.msk [vmem:[%s4189_s17 + $0x80] sm:$0xff] %vm339_vm0, %v2471_v27 }
 0x413   : > { %v2144_v44 = vpop.f32.mrf.mxu1 }
 0x414   : > { %v2145_v17 = vadd.f32 %v4525_v63, %v2144_v44 }
 0x416   : > { %v2198_v31 = vmax.f32 %v2145_v17, 0.0 }
 0x418   : > { %2702 = vmatmul.msk.f32.gmra.mxu2 %vm1693_vm4, %v2198_v31 }
 0x423   : > { %v2378_v62 = vpop.f32.mrf.mxu2 }
 0x424   : > { %v2168_v58 = vpop.f32.mrf.mxu3  ;;  %v2379_v51 = vadd.f32 %v4728_v54, %v2378_v62  ;;  %v2824_v62 = vld [vmem:[%s3072_s16 + $0xe8] sm:$0xff] }
 0x425   : > { %v2169_v9 = vadd.f32 %v4525_v63, %v2168_v58 }
 0x426   : > { %v2440_v37 = vadd.f32 %v2815_v47, %v2379_v51 }
 0x427   : > { %v2206_v25 = vmax.f32 %v2169_v9, 0.0 }
 0x428   : > { %v2472_v45 = vmax.f32 %v2440_v37, 0.0  ;;  %v2825_v37 = vld [vmem:[%s3072_s16 + $0xb0] sm:$0xff] }
 0x429   : > { %2710 = vmatmul.msk.f32.gmra.mxu3 %vm1693_vm4, %v2206_v25 }
 0x42a   : > { %2504 = vst.msk [vmem:[%s4189_s17 + $0x88] sm:$0xff] %vm339_vm0, %v2472_v45 }
 0x433   : > { %v2147_v50 = vpop.f32.mrf.mxu1 }
 0x434   : > { %v2148_v7 = vadd.f32 %v4525_v63, %v2147_v50 }
 0x436   : > { %v2199_v24 = vmax.f32 %v2148_v7, 0.0 }
 0x438   : > { %2703 = vmatmul.msk.f32.gmra.mxu2 %vm1693_vm4, %v2199_v24  ;;  %v2826_v24 = vld [vmem:[%s3072_s16 + $0xb8] sm:$0xff] }
 0x440   : > { %2704 = vmatmul.msk.f32.gmra.mxu2 %vm1693_vm4, %v2200_v56 }
 0x444   : > { %v2171_v19 = vpop.f32.mrf.mxu3 }
 0x445   : > { %v2172_v52 = vadd.f32 %v4525_v63, %v2171_v19 }
 0x446   : > { %v2381_v57 = vpop.f32.mrf.mxu2 }
 0x447   : > { %v2207_v22 = vmax.f32 %v2172_v52, 0.0  ;;  %v2382_v49 = vadd.f32 %v4728_v54, %v2381_v57  ;;  %v2827_v57 = vld [vmem:[%s3072_s16 + $0xc0] sm:$0xff] }
 0x448   : > { %2705 = vmatmul.msk.f32.gmra.mxu2 %vm1693_vm4, %v2201_v14 }
 0x449   : > { %v2441_v48 = vadd.f32 %v2816_v3, %v2382_v49  ;;  %2711 = vmatmul.msk.f32.gmra.mxu3 %vm1693_vm4, %v2207_v22  ;;  %v2828_v49 = vld [vmem:[%s3072_s16 + $0xf0] sm:$0xff] }
 0x44b   : > { %v2473_v26 = vmax.f32 %v2441_v48, 0.0 }
 0x44d   : > { %2505 = vst.msk [vmem:[%s4189_s17 + $0x90] sm:$0xff] %vm339_vm0, %v2473_v26 }
 0x44f   : > { %v2174_v4 = vpop.f32.mrf.mxu3 }
 0x450   : > { %v2175_v21 = vadd.f32 %v4525_v63, %v2174_v4  ;;  %v2818_v63 = vld [vmem:[%s3072_s16 + $0xd0] sm:$0xff] }
 0x452   : > { %v2208_v53 = vmax.f32 %v2175_v21, 0.0 }
 0x454   : > { %2712 = vmatmul.msk.f32.gmra.mxu3 %vm1693_vm4, %v2208_v53  ;;  %v2829_v53 = vld [vmem:[%s3072_s16 + $0xf8] sm:$0xff] }
 0x457   : > { %v2402_v8 = vpop.f32.mrf.mxu3 }
 0x458   : > { %v2403_v36 = vadd.f32 %v4728_v54, %v2402_v8 }
 0x45a   : > { %v2448_v34 = vadd.f32 %v2817_v1, %v2403_v36 }
 0x45c   : > { %v2480_v33 = vmax.f32 %v2448_v34, 0.0 }
 0x45e   : > { %2512 = vst.msk [vmem:[%s4189_s17 + $0xc8] sm:$0xff] %vm339_vm0, %v2480_v33 }
 0x45f   : > { %v2405_v59 = vpop.f32.mrf.mxu3 }
 0x460   : > { %v2406_v11 = vadd.f32 %v4728_v54, %v2405_v59 }
 0x462   : > { %v2449_v29 = vadd.f32 %v2818_v63, %v2406_v11  ;;  %v2384_v40 = vpop.f32.mrf.mxu2 }
 0x463   : > { %v2385_v39 = vadd.f32 %v4728_v54, %v2384_v40 }
 0x464   : > { %v2481_v6 = vmax.f32 %v2449_v29, 0.0 }
 0x465   : > { %v2442_v10 = vadd.f32 %v2819_v16, %v2385_v39 }
 0x466   : > { %2513 = vst.msk [vmem:[%s4189_s17 + $0xd0] sm:$0xff] %vm339_vm0, %v2481_v6 }
 0x467   : > { %v2474_v2 = vmax.f32 %v2442_v10, 0.0 }
 0x469   : > { %2506 = vst.msk [vmem:[%s4189_s17 + $0x98] sm:$0xff] %vm339_vm0, %v2474_v2 }
 0x46d   : > { %v2408_v30 = vpop.f32.mrf.mxu3 }
 0x46e   : > { %v2409_v28 = vadd.f32 %v4728_v54, %v2408_v30 }
 0x470   : > { %v2450_v41 = vadd.f32 %v2820_v20, %v2409_v28 }
 0x472   : > { %v2482_v0 = vmax.f32 %v2450_v41, 0.0 }
 0x474   : > { %2514 = vst.msk [vmem:[%s4189_s17 + $0xd8] sm:$0xff] %vm339_vm0, %v2482_v0 }
 0x47b   : > { %v2387_v32 = vpop.f32.mrf.mxu2 }
 0x47c   : > { %v2388_v38 = vadd.f32 %v4728_v54, %v2387_v32 }
 0x47e   : > { %v2443_v42 = vadd.f32 %v2821_v35, %v2388_v38 }
 0x480   : > { %v2475_v15 = vmax.f32 %v2443_v42, 0.0 }
 0x482   : > { %2507 = vst.msk [vmem:[%s4189_s17 + $0xa0] sm:$0xff] %vm339_vm0, %v2475_v15 }
 0x48c   : > { %v2411_v43 = vpop.f32.mrf.mxu3 }
 0x48d   : > { %v2412_v60 = vadd.f32 %v4728_v54, %v2411_v43 }
 0x48f   : > { %v2451_v46 = vadd.f32 %v2822_v13, %v2412_v60 }
 0x491   : > { %v2483_v12 = vmax.f32 %v2451_v46, 0.0 }
 0x493   : > { %2515 = vst.msk [vmem:[%s4189_s17 + $0xe0] sm:$0xff] %vm339_vm0, %v2483_v12 }
 0x49b   : > { %v2390_v55 = vpop.f32.mrf.mxu2 }
 0x49c   : > { %v2391_v18 = vadd.f32 %v4728_v54, %v2390_v55 }
 0x49e   : > { %v2444_v27 = vadd.f32 %v2823_v5, %v2391_v18 }
 0x4a0   : > { %v2476_v44 = vmax.f32 %v2444_v27, 0.0 }
 0x4a2   : > { %2508 = vst.msk [vmem:[%s4189_s17 + $0xa8] sm:$0xff] %vm339_vm0, %v2476_v44 }
 0x4ac   : > { %v2414_v17 = vpop.f32.mrf.mxu3 }
 0x4ad   : > { %v2415_v31 = vadd.f32 %v4728_v54, %v2414_v17 }
 0x4af   : > { %v2452_v58 = vadd.f32 %v2824_v62, %v2415_v31 }
 0x4b1   : > { %v2484_v51 = vmax.f32 %v2452_v58, 0.0 }
 0x4b3   : > { %2516 = vst.msk [vmem:[%s4189_s17 + $0xe8] sm:$0xff] %vm339_vm0, %v2484_v51 }
 0x4bb   : > { %v2393_v9 = vpop.f32.mrf.mxu2 }
 0x4bc   : > { %v2394_v47 = vadd.f32 %v4728_v54, %v2393_v9 }
 0x4be   : > { %v2445_v25 = vadd.f32 %v2825_v37, %v2394_v47 }
 0x4c0   : > { %v2477_v45 = vmax.f32 %v2445_v25, 0.0 }
 0x4c2   : > { %2509 = vst.msk [vmem:[%s4189_s17 + $0xb0] sm:$0xff] %vm339_vm0, %v2477_v45 }
 0x4c3   : > { %v2396_v50 = vpop.f32.mrf.mxu2 }
 0x4c4   : > { %v2397_v7 = vadd.f32 %v4728_v54, %v2396_v50 }
 0x4c6   : > { %v2446_v23 = vadd.f32 %v2826_v24, %v2397_v7 }
 0x4c8   : > { %v2478_v56 = vmax.f32 %v2446_v23, 0.0 }
 0x4ca   : > { %2510 = vst.msk [vmem:[%s4189_s17 + $0xb8] sm:$0xff] %vm339_vm0, %v2478_v56 }
 0x4cb   : > { %v2399_v61 = vpop.f32.mrf.mxu2 }
 0x4cc   : > { %v2400_v19 = vadd.f32 %v4728_v54, %v2399_v61  ;;  %v2417_v52 = vpop.f32.mrf.mxu3 }
 0x4cd   : > { %v2418_v14 = vadd.f32 %v4728_v54, %v2417_v52 }
 0x4ce   : > { %v2447_v22 = vadd.f32 %v2827_v57, %v2400_v19 }
 0x4cf   : > { %v2453_v3 = vadd.f32 %v2828_v49, %v2418_v14 }
 0x4d0   : > { %v2479_v48 = vmax.f32 %v2447_v22, 0.0 }
 0x4d1   : > { %v2485_v26 = vmax.f32 %v2453_v3, 0.0 }
 0x4d2   : > { %2511 = vst.msk [vmem:[%s4189_s17 + $0xc0] sm:$0xff] %vm339_vm0, %v2479_v48 }
 0x4d3   : > { %2517 = vst.msk [vmem:[%s4189_s17 + $0xf0] sm:$0xff] %vm339_vm0, %v2485_v26 }
 0x4d7   : > { %v2420_v4 = vpop.f32.mrf.mxu3 }
 0x4d8   : > { %v2421_v21 = vadd.f32 %v4728_v54, %v2420_v4 }
 0x4da   : > { %v2454_v8 = vadd.f32 %v2829_v53, %v2421_v21 }
 0x4dc   : > { %v2486_v36 = vmax.f32 %v2454_v8, 0.0 }
 0x4de   : > { %2518 = vst.msk [vmem:[%s4189_s17 + $0xf8] sm:$0xff] %vm339_vm0, %v2486_v36 }
 0x4df   : > { %2887 = shalt.err (!%p2884_p4)
}
 0x4e0   : > { %s2939_s22 = smov 128  }
 0x4e1   : > { %2736 = dma.vmem_to_hbm [thread:$0]  (%p3030_p11), %s2533_s15, 4096, %s2535_s10, %s2520_s9, %s2939_s22, %s2939_s22, %s2931_s19  }
 0x4e2 PF: > { %s2549_s17 = sand.u32 1, %s2914_s24   ;;  %p5092_p7 = scmp.ge.s32.totalorder %s2926_s27, 2 }
 0x4e3   : > { %s2550_s8 = scalar_lea.sflag [#allocation4], %s2549_s17 }
 0x4e4   : > { %p2743_p5 = pnand %p5092_p7, %p3034_p12 }
 0x4e6   : > { %p2744_p8 = pneg %p2743_p5 }
 0x4e8   : > { %2909 = dma.done.wait (%p2744_p8), %s2550_s8, 4096  }
 0x4e9   : > { %2911 = vsyncadd (%p2744_p8), %s2550_s8, 4294963200  ;;  %s5093_s11 = sld [smem:[#allocation8_spill]]  ;;  %p20_p10 = scmp.ge.s32.totalorder %s3005_s30, 4  }
 0x4ea   : > { %s5094_s24 = smov %s2918_s25  ;;  %s5095_s25 = smov %s2922_s26 }
 0x4eb   : > { %s5097_s27 = smov %s3005_s30  ;;  %22 = sbr.rel (!%p20_p10) target bundleno = 5 (0x5), region = 93 }
 0x4ef   : > { %s5096_s26 = smov %s5093_s11 }
 0x4f0   :  { %2556 = vsyncpa [#allocation3], 1 }
 0x4f1   :  { %2558 = vsyncpa [#allocation3 + $0x1], 1 }
 0x4f2   :  { %2559 = vsyncpa [#allocation4], 1 }
 0x4f3   :  { %2561 = vsyncpa [#allocation4 + $0x1], 1 }

</bundles_post_ra>
